<compile_context>
chip_gen: v6e
topology: v6e:2x2x1
jax: 0.10.0
libtpu: 0.0.40
codegen_flags: <defaults>
</compile_context>

<pallas_src>
import functools
import math

import jax
import jax.numpy as jnp
from jax.experimental import pallas as pl
from jax.experimental.pallas import tpu as pltpu


# --------------------------------------------------------------------------
# Fused kernel: (optional pre-pool) + pad + pool + (conv3x3 -> BN -> ReLU) x2
# --------------------------------------------------------------------------
def _first_octave_kernel(x_ref, wh_ref, wl_ref, sh_ref, bh_ref, sl_ref,
                         bl_ref, pw_ref, oh_ref, ol_ref,
                         xpad_ref, xpool_ref, colh_ref, coll_ref,
                         *, cin, H, W, TH, pre_pool):
    """Grid = (batch, H-tile).

    x_ref    : (1, Cin, H_in, W_in)  full NCHW image (resident across tiles)
    wh_ref   : (CH, 9*Cin)           im2col-layout weights, high branch (bf16)
    wl_ref   : (CL, 9*Cin)           im2col-layout weights, low branch  (bf16)
    s*_ref   : (C, 1)  b*_ref: (C,1) folded BN scale / bias (f32)
    pw_ref   : (W_in, W_in//2)       0/1 column-pairing matrix for the pool
    oh_ref   : (1, CH, TH*W)         high output tile, channels on sublanes
    ol_ref   : (1, CL, (TH/2)*(W/2)) low output tile
    xpad_ref : (Cin, H+2, W+2)       per-image zero-padded x          (f32)
    xpool_ref: (Cin, H/2+2, W/2+2)   per-image zero-padded pooled x   (f32)
    col*_ref : (9*Cin, pix)          per-tile im2col scratch          (bf16)
    """
    i = pl.program_id(1)                       # H-tile index
    H2, W2 = H // 2, W // 2
    TH2 = TH // 2

    # ---- once per image: (optional stride-2 pre-pool), zero padding, and the
    # 2x2 average pool for the low branch.  x is read from HBM exactly once;
    # neither the padded copy nor X_h2l ever touch HBM.
    @pl.when(i == 0)
    def _prepare():
        if pre_pool:
            # stride==2: the working image is AvgPool2d(2,2)(x), computed here
            # in VMEM (replaces the standalone avg-pool pallas_call).
            x0 = x_ref[0].astype(jnp.float32)                 # (cin, 2H, 2W)
            t0 = x0.reshape(cin * H, 2, 2 * W)
            ph0 = t0[:, 0, :] + t0[:, 1, :]                   # exact row-pair sums
            xv = 0.25 * jnp.dot(ph0, pw_ref[...],
                                preferred_element_type=jnp.float32)
            xv = xv.reshape(cin, H, W)
        else:
            xv = x_ref[0].astype(jnp.float32)                 # (cin, H, W)

        # zero only the 1-pixel border; the interior is fully overwritten.
        zc = jnp.zeros((cin, H + 2, 1), xpad_ref.dtype)
        zr = jnp.zeros((cin, 1, W + 2), xpad_ref.dtype)
        xpad_ref[:, :, 0:1] = zc
        xpad_ref[:, :, W + 1:W + 2] = zc
        xpad_ref[:, 0:1, :] = zr
        xpad_ref[:, H + 1:H + 2, :] = zr
        xpad_ref[:, 1:H + 1, 1:W + 1] = xv

        # AvgPool2d(2,2) for the low branch: exact f32 row-pair add, then a
        # small matmul against the 0/1 column-pairing matrix (no strided ds).
        t1 = xv.reshape(cin * H2, 2, W)
        ph1 = t1[:, 0, :] + t1[:, 1, :]                       # (cin*H2, W)
        pooled = 0.25 * jnp.dot(ph1, pw_ref[0:W, 0:W2],
                                preferred_element_type=jnp.float32)
        zc2 = jnp.zeros((cin, H2 + 2, 1), xpool_ref.dtype)
        zr2 = jnp.zeros((cin, 1, W2 + 2), xpool_ref.dtype)
        xpool_ref[:, :, 0:1] = zc2
        xpool_ref[:, :, W2 + 1:W2 + 2] = zc2
        xpool_ref[:, 0:1, :] = zr2
        xpool_ref[:, H2 + 1:H2 + 2, :] = zr2
        xpool_ref[:, 1:H2 + 1, 1:W2 + 1] = pooled.reshape(cin, H2, W2)

    # ---- one conv+BN+ReLU branch: 9 shifted lane-dense patch copies into the
    # col scratch, ONE MXU matmul (bf16 operands, f32 accumulation), fused
    # BN+ReLU, lane-dense NCHW store (no transpose).
    def conv_bn_relu(src_ref, col_ref, rows, cols, row0,
                     w_ref, s_ref, b_ref, o_ref):
        pix = rows * cols
        for kh in range(3):
            for kw in range(3):
                k = kh * 3 + kw
                patch = src_ref[:, pl.ds(row0 + kh, rows), pl.ds(kw, cols)]
                col_ref[k * cin:(k + 1) * cin, :] = (
                    patch.reshape(cin, pix).astype(col_ref.dtype))
        acc = jnp.dot(w_ref[...], col_ref[...],
                      preferred_element_type=jnp.float32)     # (Cout, pix)
        y = jnp.maximum(acc * s_ref[...] + b_ref[...], 0.0)   # BN + ReLU
        o_ref[0] = y.astype(o_ref.dtype)

    conv_bn_relu(xpad_ref, colh_ref, TH, W, i * TH,
                 wh_ref, sh_ref, bh_ref, oh_ref)
    conv_bn_relu(xpool_ref, coll_ref, TH2, W2, i * TH2,
                 wl_ref, sl_ref, bl_ref, ol_ref)


def _fused_first_octave(x_nchw, wh, wl, sh, bh, sl, bl, pw, *,
                        H, W, tile_rows, pre_pool, mxu_dtype, out_dtype,
                        vmem_limit_bytes):
    N, Cin, H_in, W_in = x_nchw.shape
    CH, CL = wh.shape[0], wl.shape[0]
    H2, W2 = H // 2, W // 2
    TH = tile_rows
    TH2 = TH // 2
    n_tiles = H // TH

    kernel = functools.partial(_first_octave_kernel, cin=Cin, H=H, W=W,
                               TH=TH, pre_pool=pre_pool)
    return pl.pallas_call(
        kernel,
        out_shape=(
            jax.ShapeDtypeStruct((N, CH, H * W), out_dtype),
            jax.ShapeDtypeStruct((N, CL, H2 * W2), out_dtype),
        ),
        grid_spec=pltpu.PrefetchScalarGridSpec(
            num_scalar_prefetch=0,
            grid=(N, n_tiles),
            in_specs=[
                # x block index depends only on the batch -> fetched once per
                # image and kept resident across H-tiles.
                pl.BlockSpec((1, Cin, H_in, W_in), lambda b, i: (b, 0, 0, 0)),
                pl.BlockSpec((CH, 9 * Cin), lambda b, i: (0, 0)),
                pl.BlockSpec((CL, 9 * Cin), lambda b, i: (0, 0)),
                pl.BlockSpec((CH, 1), lambda b, i: (0, 0)),
                pl.BlockSpec((CH, 1), lambda b, i: (0, 0)),
                pl.BlockSpec((CL, 1), lambda b, i: (0, 0)),
                pl.BlockSpec((CL, 1), lambda b, i: (0, 0)),
                pl.BlockSpec((W_in, W_in // 2), lambda b, i: (0, 0)),
            ],
            out_specs=(
                pl.BlockSpec((1, CH, TH * W), lambda b, i: (b, 0, i)),
                pl.BlockSpec((1, CL, TH2 * W2), lambda b, i: (b, 0, i)),
            ),
            scratch_shapes=[
                pltpu.VMEM((Cin, H + 2, W + 2), jnp.float32),
                pltpu.VMEM((Cin, H2 + 2, W2 + 2), jnp.float32),
                pltpu.VMEM((9 * Cin, TH * W), mxu_dtype),
                pltpu.VMEM((9 * Cin, TH2 * W2), mxu_dtype),
            ],
        ),
        compiler_params=pltpu.CompilerParams(
            dimension_semantics=("parallel", "arbitrary"),
            vmem_limit_bytes=vmem_limit_bytes),
    )(x_nchw, wh, wl, sh, bh, sl, bl, pw)


# --------------------------------------------------------------------------
# Tile selection (generation-aware VMEM budget)
# --------------------------------------------------------------------------
def _vmem_capacity_bytes():
    try:
        info = pltpu.get_tpu_info()
        cap = int(getattr(info, "vmem_capacity_bytes", 0) or 0)
        if cap > 0:
            return cap
    except Exception:
        pass
    return 64 * 1024 * 1024          # v7x-safe fallback


def _estimate_vmem_bytes(Cin, H, W, CH, CL, th, H_in, W_in,
                         x_bytes, mxu_bytes, out_bytes):
    H2, W2, th2 = H // 2, W // 2, th // 2
    est = 2 * Cin * H_in * W_in * x_bytes               # x block (2 buffers)
    est += Cin * (H + 2) * (W + 2) * 4                  # xpad scratch (f32)
    est += Cin * (H2 + 2) * (W2 + 2) * 4                # xpool scratch (f32)
    est += 9 * Cin * th * W * mxu_bytes                 # col_h scratch
    est += 9 * Cin * th2 * W2 * mxu_bytes               # col_l scratch
    est += 2 * CH * th * W * out_bytes                  # high out (2 buffers)
    est += 2 * CL * th2 * W2 * out_bytes                # low out  (2 buffers)
    est += (CH * th * W + CL * th2 * W2) * 4            # f32 accumulators
    est += W_in * max(W_in // 2, 1) * 4                 # pool matrix
    est += 2 * (CH + CL) * (9 * Cin * mxu_bytes + 8)    # weights + BN params
    return int(est * 1.25)                              # layout-padding slack


def _tile_ok(H, W, th):
    if H % th or th % 2:
        return False
    if th != H and ((th * W) % 128 or ((th // 2) * (W // 2)) % 128):
        return False                 # keep output stores lane-dense
    return True


def _pick_tile_rows(H, W, Cin, CH, CL, H_in, W_in,
                    x_bytes, mxu_bytes, out_bytes, budget):
    valid = [th for th in range(H, 1, -1) if _tile_ok(H, W, th)]
    if not valid:
        return H
    for th in valid:                 # largest first (fewest pipeline steps)
        if _estimate_vmem_bytes(Cin, H, W, CH, CL, th, H_in, W_in,
                                x_bytes, mxu_bytes, out_bytes) <= budget:
            return th
    return valid[-1]


# --------------------------------------------------------------------------
# Wrapper
# --------------------------------------------------------------------------
@functools.partial(jax.jit, static_argnames=("stride", "tile_rows",
                                             "mxu_dtype", "out_dtype"))
def first_octave_conv(x_nchw, w_h2h_oihw, s_h2h, b_h2h,
                      w_h2l_oihw, s_h2l, b_h2l,
                      stride=1, tile_rows=None,
                      mxu_dtype=jnp.bfloat16, out_dtype=None):
    """FirstOctaveConv forward.  Inputs/outputs are NCHW (PyTorch layout).

    mxu_dtype controls conv-operand precision (bf16 default; pass jnp.float32
    for exactness).  out_dtype defaults to x.dtype (pass bf16 to halve the
    dominant HBM writeback traffic if the consumer accepts it).
    """
    N, Cin, H_in, W_in = x_nchw.shape
    if stride not in (1, 2):
        raise ValueError("stride must be 1 or 2")
    pre_pool = stride == 2
    if pre_pool and (H_in % 2 or W_in % 2):
        raise ValueError("H and W must be even for AvgPool2d(2,2).")
    H, W = (H_in // 2, W_in // 2) if pre_pool else (H_in, W_in)
    if H % 2 or W % 2:
        # TODO(synk): PyTorch AvgPool2d floors odd sizes; not supported here.
        raise ValueError("H and W must be even for AvgPool2d(2,2).")

    CH, CL = w_h2h_oihw.shape[0], w_h2l_oihw.shape[0]
    out_dt = x_nchw.dtype if out_dtype is None else out_dtype
    x_bytes = jnp.dtype(x_nchw.dtype).itemsize
    mxu_bytes = jnp.dtype(mxu_dtype).itemsize
    out_bytes = jnp.dtype(out_dt).itemsize

    cap = _vmem_capacity_bytes()
    if tile_rows is None:
        th = _pick_tile_rows(H, W, Cin, CH, CL, H_in, W_in,
                             x_bytes, mxu_bytes, out_bytes,
                             budget=int(cap * 0.7))
    else:
        th = tile_rows
        if not _tile_ok(H, W, th):
            raise ValueError(
                f"tile_rows={th}: must be an even divisor of H={H} with "
                f"tile_rows*W and (tile_rows//2)*(W//2) multiples of 128 "
                f"(or tile_rows == H)")
    vmem_limit = int(cap * 0.85)

    # OIHW -> (Cout, 9*Cin) im2col weight layout (k-major, c-minor), pre-cast
    # to the MXU dtype so the weight DMA is halved and no per-tile cast runs.
    def prep_w(w_oihw):
        c_out = w_oihw.shape[0]
        return (jnp.transpose(w_oihw, (0, 2, 3, 1))
                .reshape(c_out, 9 * Cin).astype(mxu_dtype))

    wh, wl = prep_w(w_h2h_oihw), prep_w(w_h2l_oihw)
    sh = s_h2h.reshape(-1, 1).astype(jnp.float32)
    bh = b_h2h.reshape(-1, 1).astype(jnp.float32)
    sl = s_h2l.reshape(-1, 1).astype(jnp.float32)
    bl = b_h2l.reshape(-1, 1).astype(jnp.float32)

    # 0/1 column-pairing matrix: pooled[:, j] uses columns 2j and 2j+1.
    # (The (W, W/2) matrix needed for the second pool is its top-left block.)
    j = jnp.arange(W_in // 2)
    pw = jnp.zeros((W_in, W_in // 2), jnp.float32)
    pw = pw.at[2 * j, j].set(1.0).at[2 * j + 1, j].set(1.0)

    oh, ol = _fused_first_octave(x_nchw, wh, wl, sh, bh, sl, bl, pw,
                                 H=H, W=W, tile_rows=th, pre_pool=pre_pool,
                                 mxu_dtype=mxu_dtype, out_dtype=out_dt,
                                 vmem_limit_bytes=vmem_limit)
    x_h = oh.reshape(N, CH, H, W)                 # free: contiguous reshape
    x_l = ol.reshape(N, CL, H // 2, W // 2)       # free: contiguous reshape
    return x_h, x_l


# --------------------------------------------------------------------------
# Parameter init (mirrors module __init__; BN folded for inference)
# --------------------------------------------------------------------------
def init_params(key, in_ch, out_ch, alpha=0.25, k=3, eps=1e-5):
    low_ch = int(alpha * out_ch)
    high_ch = out_ch - low_ch
    k1, k2, k3, k4 = jax.random.split(key, 4)
    std = 1.0 / math.sqrt(in_ch * k * k)
    w_h2h = jax.random.normal(k1, (high_ch, in_ch, k, k), jnp.float32) * std
    w_h2l = jax.random.normal(k2, (low_ch, in_ch, k, k), jnp.float32) * std

    def bn_fold(kk, c):
        kg, kb, km, kv = jax.random.split(kk, 4)
        gamma = 1.0 + 0.2 * jax.random.normal(kg, (c,), jnp.float32)
        beta = 0.1 * jax.random.normal(kb, (c,), jnp.float32)
        rmean = 0.1 * jax.random.normal(km, (c,), jnp.float32)
        rvar = jnp.abs(1.0 + 0.2 * jax.random.normal(kv, (c,), jnp.float32))
        scale = gamma / jnp.sqrt(rvar + eps)
        return scale, beta - rmean * scale

    s_h2h, b_h2h = bn_fold(k3, high_ch)
    s_h2l, b_h2l = bn_fold(k4, low_ch)
    return {"w_h2h_oihw": w_h2h, "s_h2h": s_h2h, "b_h2h": b_h2h,
            "w_h2l_oihw": w_h2l, "s_h2l": s_h2l, "b_h2l": b_h2l}


# --------------------------------------------------------------------------
# Pure-JAX reference (PyTorch semantics; conv operands rounded to the same
# MXU dtype the kernel uses, f32 accumulation, same pool pairing order)
# --------------------------------------------------------------------------
def ref_forward(x_nchw, p, stride=1, mxu_dtype=jnp.bfloat16):
    def rnd(a):
        return a.astype(mxu_dtype).astype(jnp.float32)

    def pool(x):
        v = x[:, :, 0::2, :] + x[:, :, 1::2, :]
        return 0.25 * (v[:, :, :, 0::2] + v[:, :, :, 1::2])

    def conv_bn_relu(x, w_oihw, scale, bias):
        y = jax.lax.conv_general_dilated(
            rnd(x), rnd(w_oihw), (1, 1), ((1, 1), (1, 1)),
            dimension_numbers=("NCHW", "OIHW", "NCHW"),
            precision=jax.lax.Precision.HIGHEST)
        y = y * scale[None, :, None, None] + bias[None, :, None, None]
        return jnp.maximum(y, 0.0)

    if stride == 2:
        x_nchw = pool(x_nchw)
    x_h2l = pool(x_nchw)
    x_h = conv_bn_relu(x_nchw, p["w_h2h_oihw"], p["s_h2h"], p["b_h2h"])
    x_l = conv_bn_relu(x_h2l, p["w_h2l_oihw"], p["s_h2l"], p["b_h2l"])
    return x_h, x_l


# --------------------------------------------------------------------------
if __name__ == "__main__":
    key = jax.random.PRNGKey(0)
    kx, kp = jax.random.split(key)

    N, IN_CH, OUT_CH, H, W = 2, 4, 8, 32, 32
    x = jax.random.normal(kx, (N, IN_CH, H, W), jnp.float32)     # NCHW
    params = init_params(kp, IN_CH, OUT_CH, alpha=0.25, k=3)
    args = (x, params["w_h2h_oihw"], params["s_h2h"], params["b_h2h"],
            params["w_h2l_oihw"], params["s_h2l"], params["b_h2l"])

    CL = int(0.25 * OUT_CH)
    CHH = OUT_CH - CL

    # stride=1 path; tile_rows=16 -> two H-tiles per image (exercises the
    # dynamic-row-offset im2col path and the per-image prep at tile 0).
    x_h, x_l = first_octave_conv(*args, stride=1, tile_rows=16)
    x_h = jax.block_until_ready(x_h)
    x_l = jax.block_until_ready(x_l)
    assert x_h.shape == (N, CHH, H, W), x_h.shape
    assert x_l.shape == (N, CL, H // 2, W // 2), x_l.shape

    # Reference rounds conv operands to the same MXU dtype; remaining
    # differences come only from f32 accumulation order (<< 5e-3).
    ref_h, ref_l = ref_forward(x, params, stride=1, mxu_dtype=jnp.bfloat16)
    err_h = float(jnp.max(jnp.abs(x_h - ref_h)))
    err_l = float(jnp.max(jnp.abs(x_l - ref_l)))
    assert err_h < 5e-3, err_h
    assert err_l < 5e-3, err_l

    # stride=2 path: the extra AvgPool2d is folded into the same kernel.
    x_h2, x_l2 = first_octave_conv(*args, stride=2)
    x_h2 = jax.block_until_ready(x_h2)
    x_l2 = jax.block_until_ready(x_l2)
    assert x_h2.shape == (N, CHH, H // 2, W // 2), x_h2.shape
    assert x_l2.shape == (N, CL, H // 4, W // 4), x_l2.shape
    ref_h2, ref_l2 = ref_forward(x, params, stride=2, mxu_dtype=jnp.bfloat16)
    err_h2 = float(jnp.max(jnp.abs(x_h2 - ref_h2)))
    err_l2 = float(jnp.max(jnp.abs(x_l2 - ref_l2)))
    assert err_h2 < 5e-3, err_h2
    assert err_l2 < 5e-3, err_l2

    print("KERNEL_OK")
</pallas_src>

<mosaic_0001>
module attributes {stable_mosaic.version = 11 : i64} {
  func.func @_first_octave_kernel(%arg0: i32, %arg1: i32, %arg2: memref<1x4x32x32xf32, #tpu.memory_space<vmem>>, %arg3: memref<6x36xbf16, #tpu.memory_space<vmem>>, %arg4: memref<2x36xbf16, #tpu.memory_space<vmem>>, %arg5: memref<6x1xf32, #tpu.memory_space<vmem>>, %arg6: memref<6x1xf32, #tpu.memory_space<vmem>>, %arg7: memref<2x1xf32, #tpu.memory_space<vmem>>, %arg8: memref<2x1xf32, #tpu.memory_space<vmem>>, %arg9: memref<32x16xf32, #tpu.memory_space<vmem>>, %arg10: memref<1x6x512xf32, #tpu.memory_space<vmem>>, %arg11: memref<1x2x128xf32, #tpu.memory_space<vmem>>, %arg12: memref<4x34x34xf32, #tpu.memory_space<vmem>>, %arg13: memref<4x18x18xf32, #tpu.memory_space<vmem>>, %arg14: memref<36x512xbf16, #tpu.memory_space<vmem>>, %arg15: memref<36x128xbf16, #tpu.memory_space<vmem>>) attributes {dimension_semantics = [#tpu.dimension_semantics<parallel>, #tpu.dimension_semantics<arbitrary>], iteration_bounds = array<i64: 2, 2>, scalar_prefetch = 0 : i64, scratch_operands = 4 : i64, tpu.core_type = #tpu.core_type<tc>, window_params = [{transform_indices = @transform_0, window_bounds = array<i64: 1, 4, 32, 32>}, {pipeline_mode = #tpu.pipeline_mode<synchronous>, transform_indices = @transform_1, window_bounds = array<i64: 6, 36>}, {pipeline_mode = #tpu.pipeline_mode<synchronous>, transform_indices = @transform_2, window_bounds = array<i64: 2, 36>}, {pipeline_mode = #tpu.pipeline_mode<synchronous>, transform_indices = @transform_3, window_bounds = array<i64: 6, 1>}, {pipeline_mode = #tpu.pipeline_mode<synchronous>, transform_indices = @transform_4, window_bounds = array<i64: 6, 1>}, {pipeline_mode = #tpu.pipeline_mode<synchronous>, transform_indices = @transform_5, window_bounds = array<i64: 2, 1>}, {pipeline_mode = #tpu.pipeline_mode<synchronous>, transform_indices = @transform_6, window_bounds = array<i64: 2, 1>}, {pipeline_mode = #tpu.pipeline_mode<synchronous>, transform_indices = @transform_7, window_bounds = array<i64: 32, 16>}, {transform_indices = @transform_8, window_bounds = array<i64: 1, 6, 512>}, {transform_indices = @transform_9, window_bounds = array<i64: 1, 2, 128>}]} {
    %c0_i32 = arith.constant 0 : i32
    %0 = arith.cmpi eq, %arg1, %c0_i32 : i32
    %1 = arith.extui %0 : i1 to i32
    %c0_i32_0 = arith.constant 0 : i32
    %2 = arith.cmpi ne, %1, %c0_i32_0 : i32
    scf.if %2 {
      %c0_103 = arith.constant 0 : index
      %c0_104 = arith.constant 0 : index
      %c0_105 = arith.constant 0 : index
      %c0_106 = arith.constant 0 : index
      %141 = vector.load %arg2[%c0_103, %c0_104, %c0_105, %c0_106] : memref<1x4x32x32xf32, #tpu.memory_space<vmem>>, vector<1x4x32x32xf32>
      %142 = vector.shape_cast %141 : vector<1x4x32x32xf32> to vector<4x32x32xf32>
      %cst_107 = arith.constant 0.000000e+00 : f32
      %143 = vector.broadcast %cst_107 : f32 to vector<4x34x1xf32>
      %cst_108 = arith.constant 0.000000e+00 : f32
      %144 = vector.broadcast %cst_108 : f32 to vector<4x1x34xf32>
      %c0_109 = arith.constant 0 : index
      %c0_110 = arith.constant 0 : index
      %c0_111 = arith.constant 0 : index
      %145 = vector.load %arg12[%c0_109, %c0_110, %c0_111] : memref<4x34x34xf32, #tpu.memory_space<vmem>>, vector<4x34x1xf32>
      tpu.vector_store %arg12[%c0_109, %c0_110, %c0_111], %143 {strides = array<i32>} : memref<4x34x34xf32, #tpu.memory_space<vmem>>, vector<4x34x1xf32>,
      %c0_112 = arith.constant 0 : index
      %c0_113 = arith.constant 0 : index
      %c33 = arith.constant 33 : index
      %146 = vector.load %arg12[%c0_112, %c0_113, %c33] : memref<4x34x34xf32, #tpu.memory_space<vmem>>, vector<4x34x1xf32>
      tpu.vector_store %arg12[%c0_112, %c0_113, %c33], %143 {strides = array<i32>} : memref<4x34x34xf32, #tpu.memory_space<vmem>>, vector<4x34x1xf32>,
      %c0_114 = arith.constant 0 : index
      %c0_115 = arith.constant 0 : index
      %c0_116 = arith.constant 0 : index
      %147 = vector.load %arg12[%c0_114, %c0_115, %c0_116] : memref<4x34x34xf32, #tpu.memory_space<vmem>>, vector<4x1x34xf32>
      tpu.vector_store %arg12[%c0_114, %c0_115, %c0_116], %144 {strides = array<i32>} : memref<4x34x34xf32, #tpu.memory_space<vmem>>, vector<4x1x34xf32>,
      %c0_117 = arith.constant 0 : index
      %c33_118 = arith.constant 33 : index
      %c0_119 = arith.constant 0 : index
      %148 = vector.load %arg12[%c0_117, %c33_118, %c0_119] : memref<4x34x34xf32, #tpu.memory_space<vmem>>, vector<4x1x34xf32>
      tpu.vector_store %arg12[%c0_117, %c33_118, %c0_119], %144 {strides = array<i32>} : memref<4x34x34xf32, #tpu.memory_space<vmem>>, vector<4x1x34xf32>,
      %c0_120 = arith.constant 0 : index
      %c1_121 = arith.constant 1 : index
      %c1_122 = arith.constant 1 : index
      %149 = vector.load %arg12[%c0_120, %c1_121, %c1_122] : memref<4x34x34xf32, #tpu.memory_space<vmem>>, vector<4x32x32xf32>
      tpu.vector_store %arg12[%c0_120, %c1_121, %c1_122], %142 {strides = array<i32>} : memref<4x34x34xf32, #tpu.memory_space<vmem>>, vector<4x32x32xf32>,
      %150 = vector.shape_cast %142 : vector<4x32x32xf32> to vector<64x2x32xf32>
      %151 = vector.extract_strided_slice %150 {offsets = [0, 0, 0], sizes = [64, 1, 32], strides = [1, 1, 1]} : vector<64x2x32xf32> to vector<64x1x32xf32>
      %152 = vector.shape_cast %151 : vector<64x1x32xf32> to vector<64x32xf32>
      %153 = vector.extract_strided_slice %150 {offsets = [0, 1, 0], sizes = [64, 1, 32], strides = [1, 1, 1]} : vector<64x2x32xf32> to vector<64x1x32xf32>
      %154 = vector.shape_cast %153 : vector<64x1x32xf32> to vector<64x32xf32>
      %155 = arith.addf %152, %154 : vector<64x32xf32>
      %c0_123 = arith.constant 0 : index
      %c0_124 = arith.constant 0 : index
      %156 = vector.load %arg9[%c0_123, %c0_124] : memref<32x16xf32, #tpu.memory_space<vmem>>, vector<32x16xf32>
      %cst_125 = arith.constant dense<0.000000e+00> : vector<64x16xf32>
      %157 = tpu.matmul %155, %156, %cst_125 {dimension_numbers = #tpu.dot_dimension_numbers<[1], [0], [0], [1], [0, 0, 1, 1], [], []>} : vector<64x32xf32>, vector<32x16xf32>, vector<64x16xf32> -> vector<64x16xf32>
      %cst_126 = arith.constant 2.500000e-01 : f32
      %158 = vector.broadcast %cst_126 : f32 to vector<64x16xf32>
      %159 = arith.mulf %158, %157 : vector<64x16xf32>
      %cst_127 = arith.constant 0.000000e+00 : f32
      %160 = vector.broadcast %cst_127 : f32 to vector<4x18x1xf32>
      %cst_128 = arith.constant 0.000000e+00 : f32
      %161 = vector.broadcast %cst_128 : f32 to vector<4x1x18xf32>
      %c0_129 = arith.constant 0 : index
      %c0_130 = arith.constant 0 : index
      %c0_131 = arith.constant 0 : index
      %162 = vector.load %arg13[%c0_129, %c0_130, %c0_131] : memref<4x18x18xf32, #tpu.memory_space<vmem>>, vector<4x18x1xf32>
      tpu.vector_store %arg13[%c0_129, %c0_130, %c0_131], %160 {strides = array<i32>} : memref<4x18x18xf32, #tpu.memory_space<vmem>>, vector<4x18x1xf32>,
      %c0_132 = arith.constant 0 : index
      %c0_133 = arith.constant 0 : index
      %c17 = arith.constant 17 : index
      %163 = vector.load %arg13[%c0_132, %c0_133, %c17] : memref<4x18x18xf32, #tpu.memory_space<vmem>>, vector<4x18x1xf32>
      tpu.vector_store %arg13[%c0_132, %c0_133, %c17], %160 {strides = array<i32>} : memref<4x18x18xf32, #tpu.memory_space<vmem>>, vector<4x18x1xf32>,
      %c0_134 = arith.constant 0 : index
      %c0_135 = arith.constant 0 : index
      %c0_136 = arith.constant 0 : index
      %164 = vector.load %arg13[%c0_134, %c0_135, %c0_136] : memref<4x18x18xf32, #tpu.memory_space<vmem>>, vector<4x1x18xf32>
      tpu.vector_store %arg13[%c0_134, %c0_135, %c0_136], %161 {strides = array<i32>} : memref<4x18x18xf32, #tpu.memory_space<vmem>>, vector<4x1x18xf32>,
      %c0_137 = arith.constant 0 : index
      %c17_138 = arith.constant 17 : index
      %c0_139 = arith.constant 0 : index
      %165 = vector.load %arg13[%c0_137, %c17_138, %c0_139] : memref<4x18x18xf32, #tpu.memory_space<vmem>>, vector<4x1x18xf32>
      tpu.vector_store %arg13[%c0_137, %c17_138, %c0_139], %161 {strides = array<i32>} : memref<4x18x18xf32, #tpu.memory_space<vmem>>, vector<4x1x18xf32>,
      %166 = vector.shape_cast %159 : vector<64x16xf32> to vector<4x16x16xf32>
      %c0_140 = arith.constant 0 : index
      %c1_141 = arith.constant 1 : index
      %c1_142 = arith.constant 1 : index
      %167 = vector.load %arg13[%c0_140, %c1_141, %c1_142] : memref<4x18x18xf32, #tpu.memory_space<vmem>>, vector<4x16x16xf32>
      tpu.vector_store %arg13[%c0_140, %c1_141, %c1_142], %166 {strides = array<i32>} : memref<4x18x18xf32, #tpu.memory_space<vmem>>, vector<4x16x16xf32>,
    } else {
    }
    %c16_i32 = arith.constant 16 : i32
    %3 = arith.muli %arg1, %c16_i32 : i32
    %c0_i32_1 = arith.constant 0 : i32
    %4 = arith.addi %3, %c0_i32_1 : i32
    %c0 = arith.constant 0 : index
    %5 = arith.index_cast %4 : i32 to index
    %c0_2 = arith.constant 0 : index
    %6 = vector.load %arg12[%c0, %5, %c0_2] : memref<4x34x34xf32, #tpu.memory_space<vmem>>, vector<4x16x32xf32>
    %7 = vector.shape_cast %6 : vector<4x16x32xf32> to vector<4x512xf32>
    %8 = arith.truncf %7 : vector<4x512xf32> to vector<4x512xbf16>
    %c0_3 = arith.constant 0 : index
    %c0_4 = arith.constant 0 : index
    %9 = vector.load %arg14[%c0_3, %c0_4] : memref<36x512xbf16, #tpu.memory_space<vmem>>, vector<4x512xbf16>
    tpu.vector_store %arg14[%c0_3, %c0_4], %8 {strides = array<i32>} : memref<36x512xbf16, #tpu.memory_space<vmem>>, vector<4x512xbf16>,
    %c0_i32_5 = arith.constant 0 : i32
    %10 = arith.addi %3, %c0_i32_5 : i32
    %c0_6 = arith.constant 0 : index
    %11 = arith.index_cast %10 : i32 to index
    %c1 = arith.constant 1 : index
    %12 = vector.load %arg12[%c0_6, %11, %c1] : memref<4x34x34xf32, #tpu.memory_space<vmem>>, vector<4x16x32xf32>
    %13 = vector.shape_cast %12 : vector<4x16x32xf32> to vector<4x512xf32>
    %14 = arith.truncf %13 : vector<4x512xf32> to vector<4x512xbf16>
    %c4 = arith.constant 4 : index
    %c0_7 = arith.constant 0 : index
    %15 = vector.load %arg14[%c4, %c0_7] : memref<36x512xbf16, #tpu.memory_space<vmem>>, vector<4x512xbf16>
    tpu.vector_store %arg14[%c4, %c0_7], %14 {strides = array<i32>} : memref<36x512xbf16, #tpu.memory_space<vmem>>, vector<4x512xbf16>,
    %c0_i32_8 = arith.constant 0 : i32
    %16 = arith.addi %3, %c0_i32_8 : i32
    %c0_9 = arith.constant 0 : index
    %17 = arith.index_cast %16 : i32 to index
    %c2 = arith.constant 2 : index
    %18 = vector.load %arg12[%c0_9, %17, %c2] : memref<4x34x34xf32, #tpu.memory_space<vmem>>, vector<4x16x32xf32>
    %19 = vector.shape_cast %18 : vector<4x16x32xf32> to vector<4x512xf32>
    %20 = arith.truncf %19 : vector<4x512xf32> to vector<4x512xbf16>
    %c8 = arith.constant 8 : index
    %c0_10 = arith.constant 0 : index
    %21 = vector.load %arg14[%c8, %c0_10] : memref<36x512xbf16, #tpu.memory_space<vmem>>, vector<4x512xbf16>
    tpu.vector_store %arg14[%c8, %c0_10], %20 {strides = array<i32>} : memref<36x512xbf16, #tpu.memory_space<vmem>>, vector<4x512xbf16>,
    %c1_i32 = arith.constant 1 : i32
    %22 = arith.addi %3, %c1_i32 : i32
    %c0_11 = arith.constant 0 : index
    %23 = arith.index_cast %22 : i32 to index
    %c0_12 = arith.constant 0 : index
    %24 = vector.load %arg12[%c0_11, %23, %c0_12] : memref<4x34x34xf32, #tpu.memory_space<vmem>>, vector<4x16x32xf32>
    %25 = vector.shape_cast %24 : vector<4x16x32xf32> to vector<4x512xf32>
    %26 = arith.truncf %25 : vector<4x512xf32> to vector<4x512xbf16>
    %c12 = arith.constant 12 : index
    %c0_13 = arith.constant 0 : index
    %27 = vector.load %arg14[%c12, %c0_13] : memref<36x512xbf16, #tpu.memory_space<vmem>>, vector<4x512xbf16>
    tpu.vector_store %arg14[%c12, %c0_13], %26 {strides = array<i32>} : memref<36x512xbf16, #tpu.memory_space<vmem>>, vector<4x512xbf16>,
    %c1_i32_14 = arith.constant 1 : i32
    %28 = arith.addi %3, %c1_i32_14 : i32
    %c0_15 = arith.constant 0 : index
    %29 = arith.index_cast %28 : i32 to index
    %c1_16 = arith.constant 1 : index
    %30 = vector.load %arg12[%c0_15, %29, %c1_16] : memref<4x34x34xf32, #tpu.memory_space<vmem>>, vector<4x16x32xf32>
    %31 = vector.shape_cast %30 : vector<4x16x32xf32> to vector<4x512xf32>
    %32 = arith.truncf %31 : vector<4x512xf32> to vector<4x512xbf16>
    %c16 = arith.constant 16 : index
    %c0_17 = arith.constant 0 : index
    %33 = vector.load %arg14[%c16, %c0_17] : memref<36x512xbf16, #tpu.memory_space<vmem>>, vector<4x512xbf16>
    tpu.vector_store %arg14[%c16, %c0_17], %32 {strides = array<i32>} : memref<36x512xbf16, #tpu.memory_space<vmem>>, vector<4x512xbf16>,
    %c1_i32_18 = arith.constant 1 : i32
    %34 = arith.addi %3, %c1_i32_18 : i32
    %c0_19 = arith.constant 0 : index
    %35 = arith.index_cast %34 : i32 to index
    %c2_20 = arith.constant 2 : index
    %36 = vector.load %arg12[%c0_19, %35, %c2_20] : memref<4x34x34xf32, #tpu.memory_space<vmem>>, vector<4x16x32xf32>
    %37 = vector.shape_cast %36 : vector<4x16x32xf32> to vector<4x512xf32>
    %38 = arith.truncf %37 : vector<4x512xf32> to vector<4x512xbf16>
    %c20 = arith.constant 20 : index
    %c0_21 = arith.constant 0 : index
    %39 = vector.load %arg14[%c20, %c0_21] : memref<36x512xbf16, #tpu.memory_space<vmem>>, vector<4x512xbf16>
    tpu.vector_store %arg14[%c20, %c0_21], %38 {strides = array<i32>} : memref<36x512xbf16, #tpu.memory_space<vmem>>, vector<4x512xbf16>,
    %c2_i32 = arith.constant 2 : i32
    %40 = arith.addi %3, %c2_i32 : i32
    %c0_22 = arith.constant 0 : index
    %41 = arith.index_cast %40 : i32 to index
    %c0_23 = arith.constant 0 : index
    %42 = vector.load %arg12[%c0_22, %41, %c0_23] : memref<4x34x34xf32, #tpu.memory_space<vmem>>, vector<4x16x32xf32>
    %43 = vector.shape_cast %42 : vector<4x16x32xf32> to vector<4x512xf32>
    %44 = arith.truncf %43 : vector<4x512xf32> to vector<4x512xbf16>
    %c24 = arith.constant 24 : index
    %c0_24 = arith.constant 0 : index
    %45 = vector.load %arg14[%c24, %c0_24] : memref<36x512xbf16, #tpu.memory_space<vmem>>, vector<4x512xbf16>
    tpu.vector_store %arg14[%c24, %c0_24], %44 {strides = array<i32>} : memref<36x512xbf16, #tpu.memory_space<vmem>>, vector<4x512xbf16>,
    %c2_i32_25 = arith.constant 2 : i32
    %46 = arith.addi %3, %c2_i32_25 : i32
    %c0_26 = arith.constant 0 : index
    %47 = arith.index_cast %46 : i32 to index
    %c1_27 = arith.constant 1 : index
    %48 = vector.load %arg12[%c0_26, %47, %c1_27] : memref<4x34x34xf32, #tpu.memory_space<vmem>>, vector<4x16x32xf32>
    %49 = vector.shape_cast %48 : vector<4x16x32xf32> to vector<4x512xf32>
    %50 = arith.truncf %49 : vector<4x512xf32> to vector<4x512xbf16>
    %c28 = arith.constant 28 : index
    %c0_28 = arith.constant 0 : index
    %51 = vector.load %arg14[%c28, %c0_28] : memref<36x512xbf16, #tpu.memory_space<vmem>>, vector<4x512xbf16>
    tpu.vector_store %arg14[%c28, %c0_28], %50 {strides = array<i32>} : memref<36x512xbf16, #tpu.memory_space<vmem>>, vector<4x512xbf16>,
    %c2_i32_29 = arith.constant 2 : i32
    %52 = arith.addi %3, %c2_i32_29 : i32
    %c0_30 = arith.constant 0 : index
    %53 = arith.index_cast %52 : i32 to index
    %c2_31 = arith.constant 2 : index
    %54 = vector.load %arg12[%c0_30, %53, %c2_31] : memref<4x34x34xf32, #tpu.memory_space<vmem>>, vector<4x16x32xf32>
    %55 = vector.shape_cast %54 : vector<4x16x32xf32> to vector<4x512xf32>
    %56 = arith.truncf %55 : vector<4x512xf32> to vector<4x512xbf16>
    %c32 = arith.constant 32 : index
    %c0_32 = arith.constant 0 : index
    %57 = vector.load %arg14[%c32, %c0_32] : memref<36x512xbf16, #tpu.memory_space<vmem>>, vector<4x512xbf16>
    tpu.vector_store %arg14[%c32, %c0_32], %56 {strides = array<i32>} : memref<36x512xbf16, #tpu.memory_space<vmem>>, vector<4x512xbf16>,
    %c0_33 = arith.constant 0 : index
    %c0_34 = arith.constant 0 : index
    %58 = vector.load %arg3[%c0_33, %c0_34] : memref<6x36xbf16, #tpu.memory_space<vmem>>, vector<6x36xbf16>
    %c0_35 = arith.constant 0 : index
    %c0_36 = arith.constant 0 : index
    %59 = vector.load %arg14[%c0_35, %c0_36] : memref<36x512xbf16, #tpu.memory_space<vmem>>, vector<36x512xbf16>
    %cst = arith.constant dense<0.000000e+00> : vector<6x512xf32>
    %60 = tpu.matmul %58, %59, %cst {dimension_numbers = #tpu.dot_dimension_numbers<[1], [0], [0], [1], [0, 0, 1, 1], [], []>} : vector<6x36xbf16>, vector<36x512xbf16>, vector<6x512xf32> -> vector<6x512xf32>
    %c0_37 = arith.constant 0 : index
    %c0_38 = arith.constant 0 : index
    %61 = vector.load %arg5[%c0_37, %c0_38] : memref<6x1xf32, #tpu.memory_space<vmem>>, vector<6x1xf32>
    %62 = vector.broadcast %61 : vector<6x1xf32> to vector<6x512xf32>
    %63 = arith.mulf %60, %62 : vector<6x512xf32>
    %c0_39 = arith.constant 0 : index
    %c0_40 = arith.constant 0 : index
    %64 = vector.load %arg6[%c0_39, %c0_40] : memref<6x1xf32, #tpu.memory_space<vmem>>, vector<6x1xf32>
    %65 = vector.broadcast %64 : vector<6x1xf32> to vector<6x512xf32>
    %66 = arith.addf %63, %65 : vector<6x512xf32>
    %cst_41 = arith.constant 0.000000e+00 : f32
    %67 = vector.broadcast %cst_41 : f32 to vector<6x512xf32>
    %68 = arith.maximumf %66, %67 : vector<6x512xf32>
    %c0_42 = arith.constant 0 : index
    %c0_43 = arith.constant 0 : index
    %c0_44 = arith.constant 0 : index
    %69 = vector.load %arg10[%c0_42, %c0_43, %c0_44] : memref<1x6x512xf32, #tpu.memory_space<vmem>>, vector<1x6x512xf32>
    %70 = vector.shape_cast %69 : vector<1x6x512xf32> to vector<6x512xf32>
    %71 = vector.shape_cast %68 : vector<6x512xf32> to vector<1x6x512xf32>
    tpu.vector_store %arg10[%c0_42, %c0_43, %c0_44], %71 {strides = array<i32>} : memref<1x6x512xf32, #tpu.memory_space<vmem>>, vector<1x6x512xf32>,
    %c8_i32 = arith.constant 8 : i32
    %72 = arith.muli %arg1, %c8_i32 : i32
    %c0_i32_45 = arith.constant 0 : i32
    %73 = arith.addi %72, %c0_i32_45 : i32
    %c0_46 = arith.constant 0 : index
    %74 = arith.index_cast %73 : i32 to index
    %c0_47 = arith.constant 0 : index
    %75 = vector.load %arg13[%c0_46, %74, %c0_47] : memref<4x18x18xf32, #tpu.memory_space<vmem>>, vector<4x8x16xf32>
    %76 = vector.shape_cast %75 : vector<4x8x16xf32> to vector<4x128xf32>
    %77 = arith.truncf %76 : vector<4x128xf32> to vector<4x128xbf16>
    %c0_48 = arith.constant 0 : index
    %c0_49 = arith.constant 0 : index
    %78 = vector.load %arg15[%c0_48, %c0_49] : memref<36x128xbf16, #tpu.memory_space<vmem>>, vector<4x128xbf16>
    tpu.vector_store %arg15[%c0_48, %c0_49], %77 {strides = array<i32>} : memref<36x128xbf16, #tpu.memory_space<vmem>>, vector<4x128xbf16>,
    %c0_i32_50 = arith.constant 0 : i32
    %79 = arith.addi %72, %c0_i32_50 : i32
    %c0_51 = arith.constant 0 : index
    %80 = arith.index_cast %79 : i32 to index
    %c1_52 = arith.constant 1 : index
    %81 = vector.load %arg13[%c0_51, %80, %c1_52] : memref<4x18x18xf32, #tpu.memory_space<vmem>>, vector<4x8x16xf32>
    %82 = vector.shape_cast %81 : vector<4x8x16xf32> to vector<4x128xf32>
    %83 = arith.truncf %82 : vector<4x128xf32> to vector<4x128xbf16>
    %c4_53 = arith.constant 4 : index
    %c0_54 = arith.constant 0 : index
    %84 = vector.load %arg15[%c4_53, %c0_54] : memref<36x128xbf16, #tpu.memory_space<vmem>>, vector<4x128xbf16>
    tpu.vector_store %arg15[%c4_53, %c0_54], %83 {strides = array<i32>} : memref<36x128xbf16, #tpu.memory_space<vmem>>, vector<4x128xbf16>,
    %c0_i32_55 = arith.constant 0 : i32
    %85 = arith.addi %72, %c0_i32_55 : i32
    %c0_56 = arith.constant 0 : index
    %86 = arith.index_cast %85 : i32 to index
    %c2_57 = arith.constant 2 : index
    %87 = vector.load %arg13[%c0_56, %86, %c2_57] : memref<4x18x18xf32, #tpu.memory_space<vmem>>, vector<4x8x16xf32>
    %88 = vector.shape_cast %87 : vector<4x8x16xf32> to vector<4x128xf32>
    %89 = arith.truncf %88 : vector<4x128xf32> to vector<4x128xbf16>
    %c8_58 = arith.constant 8 : index
    %c0_59 = arith.constant 0 : index
    %90 = vector.load %arg15[%c8_58, %c0_59] : memref<36x128xbf16, #tpu.memory_space<vmem>>, vector<4x128xbf16>
    tpu.vector_store %arg15[%c8_58, %c0_59], %89 {strides = array<i32>} : memref<36x128xbf16, #tpu.memory_space<vmem>>, vector<4x128xbf16>,
    %c1_i32_60 = arith.constant 1 : i32
    %91 = arith.addi %72, %c1_i32_60 : i32
    %c0_61 = arith.constant 0 : index
    %92 = arith.index_cast %91 : i32 to index
    %c0_62 = arith.constant 0 : index
    %93 = vector.load %arg13[%c0_61, %92, %c0_62] : memref<4x18x18xf32, #tpu.memory_space<vmem>>, vector<4x8x16xf32>
    %94 = vector.shape_cast %93 : vector<4x8x16xf32> to vector<4x128xf32>
    %95 = arith.truncf %94 : vector<4x128xf32> to vector<4x128xbf16>
    %c12_63 = arith.constant 12 : index
    %c0_64 = arith.constant 0 : index
    %96 = vector.load %arg15[%c12_63, %c0_64] : memref<36x128xbf16, #tpu.memory_space<vmem>>, vector<4x128xbf16>
    tpu.vector_store %arg15[%c12_63, %c0_64], %95 {strides = array<i32>} : memref<36x128xbf16, #tpu.memory_space<vmem>>, vector<4x128xbf16>,
    %c1_i32_65 = arith.constant 1 : i32
    %97 = arith.addi %72, %c1_i32_65 : i32
    %c0_66 = arith.constant 0 : index
    %98 = arith.index_cast %97 : i32 to index
    %c1_67 = arith.constant 1 : index
    %99 = vector.load %arg13[%c0_66, %98, %c1_67] : memref<4x18x18xf32, #tpu.memory_space<vmem>>, vector<4x8x16xf32>
    %100 = vector.shape_cast %99 : vector<4x8x16xf32> to vector<4x128xf32>
    %101 = arith.truncf %100 : vector<4x128xf32> to vector<4x128xbf16>
    %c16_68 = arith.constant 16 : index
    %c0_69 = arith.constant 0 : index
    %102 = vector.load %arg15[%c16_68, %c0_69] : memref<36x128xbf16, #tpu.memory_space<vmem>>, vector<4x128xbf16>
    tpu.vector_store %arg15[%c16_68, %c0_69], %101 {strides = array<i32>} : memref<36x128xbf16, #tpu.memory_space<vmem>>, vector<4x128xbf16>,
    %c1_i32_70 = arith.constant 1 : i32
    %103 = arith.addi %72, %c1_i32_70 : i32
    %c0_71 = arith.constant 0 : index
    %104 = arith.index_cast %103 : i32 to index
    %c2_72 = arith.constant 2 : index
    %105 = vector.load %arg13[%c0_71, %104, %c2_72] : memref<4x18x18xf32, #tpu.memory_space<vmem>>, vector<4x8x16xf32>
    %106 = vector.shape_cast %105 : vector<4x8x16xf32> to vector<4x128xf32>
    %107 = arith.truncf %106 : vector<4x128xf32> to vector<4x128xbf16>
    %c20_73 = arith.constant 20 : index
    %c0_74 = arith.constant 0 : index
    %108 = vector.load %arg15[%c20_73, %c0_74] : memref<36x128xbf16, #tpu.memory_space<vmem>>, vector<4x128xbf16>
    tpu.vector_store %arg15[%c20_73, %c0_74], %107 {strides = array<i32>} : memref<36x128xbf16, #tpu.memory_space<vmem>>, vector<4x128xbf16>,
    %c2_i32_75 = arith.constant 2 : i32
    %109 = arith.addi %72, %c2_i32_75 : i32
    %c0_76 = arith.constant 0 : index
    %110 = arith.index_cast %109 : i32 to index
    %c0_77 = arith.constant 0 : index
    %111 = vector.load %arg13[%c0_76, %110, %c0_77] : memref<4x18x18xf32, #tpu.memory_space<vmem>>, vector<4x8x16xf32>
    %112 = vector.shape_cast %111 : vector<4x8x16xf32> to vector<4x128xf32>
    %113 = arith.truncf %112 : vector<4x128xf32> to vector<4x128xbf16>
    %c24_78 = arith.constant 24 : index
    %c0_79 = arith.constant 0 : index
    %114 = vector.load %arg15[%c24_78, %c0_79] : memref<36x128xbf16, #tpu.memory_space<vmem>>, vector<4x128xbf16>
    tpu.vector_store %arg15[%c24_78, %c0_79], %113 {strides = array<i32>} : memref<36x128xbf16, #tpu.memory_space<vmem>>, vector<4x128xbf16>,
    %c2_i32_80 = arith.constant 2 : i32
    %115 = arith.addi %72, %c2_i32_80 : i32
    %c0_81 = arith.constant 0 : index
    %116 = arith.index_cast %115 : i32 to index
    %c1_82 = arith.constant 1 : index
    %117 = vector.load %arg13[%c0_81, %116, %c1_82] : memref<4x18x18xf32, #tpu.memory_space<vmem>>, vector<4x8x16xf32>
    %118 = vector.shape_cast %117 : vector<4x8x16xf32> to vector<4x128xf32>
    %119 = arith.truncf %118 : vector<4x128xf32> to vector<4x128xbf16>
    %c28_83 = arith.constant 28 : index
    %c0_84 = arith.constant 0 : index
    %120 = vector.load %arg15[%c28_83, %c0_84] : memref<36x128xbf16, #tpu.memory_space<vmem>>, vector<4x128xbf16>
    tpu.vector_store %arg15[%c28_83, %c0_84], %119 {strides = array<i32>} : memref<36x128xbf16, #tpu.memory_space<vmem>>, vector<4x128xbf16>,
    %c2_i32_85 = arith.constant 2 : i32
    %121 = arith.addi %72, %c2_i32_85 : i32
    %c0_86 = arith.constant 0 : index
    %122 = arith.index_cast %121 : i32 to index
    %c2_87 = arith.constant 2 : index
    %123 = vector.load %arg13[%c0_86, %122, %c2_87] : memref<4x18x18xf32, #tpu.memory_space<vmem>>, vector<4x8x16xf32>
    %124 = vector.shape_cast %123 : vector<4x8x16xf32> to vector<4x128xf32>
    %125 = arith.truncf %124 : vector<4x128xf32> to vector<4x128xbf16>
    %c32_88 = arith.constant 32 : index
    %c0_89 = arith.constant 0 : index
    %126 = vector.load %arg15[%c32_88, %c0_89] : memref<36x128xbf16, #tpu.memory_space<vmem>>, vector<4x128xbf16>
    tpu.vector_store %arg15[%c32_88, %c0_89], %125 {strides = array<i32>} : memref<36x128xbf16, #tpu.memory_space<vmem>>, vector<4x128xbf16>,
    %c0_90 = arith.constant 0 : index
    %c0_91 = arith.constant 0 : index
    %127 = vector.load %arg4[%c0_90, %c0_91] : memref<2x36xbf16, #tpu.memory_space<vmem>>, vector<2x36xbf16>
    %c0_92 = arith.constant 0 : index
    %c0_93 = arith.constant 0 : index
    %128 = vector.load %arg15[%c0_92, %c0_93] : memref<36x128xbf16, #tpu.memory_space<vmem>>, vector<36x128xbf16>
    %cst_94 = arith.constant dense<0.000000e+00> : vector<2x128xf32>
    %129 = tpu.matmul %127, %128, %cst_94 {dimension_numbers = #tpu.dot_dimension_numbers<[1], [0], [0], [1], [0, 0, 1, 1], [], []>} : vector<2x36xbf16>, vector<36x128xbf16>, vector<2x128xf32> -> vector<2x128xf32>
    %c0_95 = arith.constant 0 : index
    %c0_96 = arith.constant 0 : index
    %130 = vector.load %arg7[%c0_95, %c0_96] : memref<2x1xf32, #tpu.memory_space<vmem>>, vector<2x1xf32>
    %131 = vector.broadcast %130 : vector<2x1xf32> to vector<2x128xf32>
    %132 = arith.mulf %129, %131 : vector<2x128xf32>
    %c0_97 = arith.constant 0 : index
    %c0_98 = arith.constant 0 : index
    %133 = vector.load %arg8[%c0_97, %c0_98] : memref<2x1xf32, #tpu.memory_space<vmem>>, vector<2x1xf32>
    %134 = vector.broadcast %133 : vector<2x1xf32> to vector<2x128xf32>
    %135 = arith.addf %132, %134 : vector<2x128xf32>
    %cst_99 = arith.constant 0.000000e+00 : f32
    %136 = vector.broadcast %cst_99 : f32 to vector<2x128xf32>
    %137 = arith.maximumf %135, %136 : vector<2x128xf32>
    %c0_100 = arith.constant 0 : index
    %c0_101 = arith.constant 0 : index
    %c0_102 = arith.constant 0 : index
    %138 = vector.load %arg11[%c0_100, %c0_101, %c0_102] : memref<1x2x128xf32, #tpu.memory_space<vmem>>, vector<1x2x128xf32>
    %139 = vector.shape_cast %138 : vector<1x2x128xf32> to vector<2x128xf32>
    %140 = vector.shape_cast %137 : vector<2x128xf32> to vector<1x2x128xf32>
    tpu.vector_store %arg11[%c0_100, %c0_101, %c0_102], %140 {strides = array<i32>} : memref<1x2x128xf32, #tpu.memory_space<vmem>>, vector<1x2x128xf32>,
    return
  }
  func.func @transform_0(%arg0: i32, %arg1: i32) -> (i32, i32, i32, i32) {
    %c0_i32 = arith.constant 0 : i32
    %c0_i32_0 = arith.constant 0 : i32
    %c0_i32_1 = arith.constant 0 : i32
    %c0_i32_2 = arith.constant 0 : i32
    return %arg0, %c0_i32, %c0_i32_0, %c0_i32_1 : i32, i32, i32, i32
  }
  func.func @transform_1(%arg0: i32, %arg1: i32) -> (i32, i32) {
    %c0_i32 = arith.constant 0 : i32
    %c0_i32_0 = arith.constant 0 : i32
    %c0_i32_1 = arith.constant 0 : i32
    return %c0_i32, %c0_i32_0 : i32, i32
  }
  func.func @transform_2(%arg0: i32, %arg1: i32) -> (i32, i32) {
    %c0_i32 = arith.constant 0 : i32
    %c0_i32_0 = arith.constant 0 : i32
    %c0_i32_1 = arith.constant 0 : i32
    return %c0_i32, %c0_i32_0 : i32, i32
  }
  func.func @transform_3(%arg0: i32, %arg1: i32) -> (i32, i32) {
    %c0_i32 = arith.constant 0 : i32
    %c0_i32_0 = arith.constant 0 : i32
    %c0_i32_1 = arith.constant 0 : i32
    return %c0_i32, %c0_i32_0 : i32, i32
  }
  func.func @transform_4(%arg0: i32, %arg1: i32) -> (i32, i32) {
    %c0_i32 = arith.constant 0 : i32
    %c0_i32_0 = arith.constant 0 : i32
    %c0_i32_1 = arith.constant 0 : i32
    return %c0_i32, %c0_i32_0 : i32, i32
  }
  func.func @transform_5(%arg0: i32, %arg1: i32) -> (i32, i32) {
    %c0_i32 = arith.constant 0 : i32
    %c0_i32_0 = arith.constant 0 : i32
    %c0_i32_1 = arith.constant 0 : i32
    return %c0_i32, %c0_i32_0 : i32, i32
  }
  func.func @transform_6(%arg0: i32, %arg1: i32) -> (i32, i32) {
    %c0_i32 = arith.constant 0 : i32
    %c0_i32_0 = arith.constant 0 : i32
    %c0_i32_1 = arith.constant 0 : i32
    return %c0_i32, %c0_i32_0 : i32, i32
  }
  func.func @transform_7(%arg0: i32, %arg1: i32) -> (i32, i32) {
    %c0_i32 = arith.constant 0 : i32
    %c0_i32_0 = arith.constant 0 : i32
    %c0_i32_1 = arith.constant 0 : i32
    return %c0_i32, %c0_i32_0 : i32, i32
  }
  func.func @transform_8(%arg0: i32, %arg1: i32) -> (i32, i32, i32) {
    %c0_i32 = arith.constant 0 : i32
    %c0_i32_0 = arith.constant 0 : i32
    return %arg0, %c0_i32, %arg1 : i32, i32, i32
  }
  func.func @transform_9(%arg0: i32, %arg1: i32) -> (i32, i32, i32) {
    %c0_i32 = arith.constant 0 : i32
    %c0_i32_0 = arith.constant 0 : i32
    return %arg0, %c0_i32, %arg1 : i32, i32, i32
  }
}

</mosaic_0001>

<bundles_post_ra>
// kernel: first_octave_conv.1
= control target key start
LH: loop header
LB: loop body
LE: loop exit
PB: predicated region body
PF: predicated region fallthrough
CT: control target
= control target key end

     0   :  { %s6385_s30 = smov 0   ;;  %s6387_s10 = smov 0   ;;  %s8712_s0 = inlined_call_operand.vmem [shape: f32[2,4,32,32], index: 0, kind: input, shape index: {}]   ;;  %s8713_s1 = inlined_call_operand.vmem [shape: bf16[6,36], index: 1, kind: input, shape index: {}]   ;;  %s8714_s2 = inlined_call_operand.vmem [shape: bf16[2,36], index: 2, kind: input, shape index: {}]   ;;  %s8715_s3 = inlined_call_operand.vmem [shape: f32[6,1], index: 3, kind: input, shape index: {}]   ;;  %s8716_s4 = inlined_call_operand.vmem [shape: f32[6,1], index: 4, kind: input, shape index: {}]   ;;  %s8717_s5 = inlined_call_operand.vmem [shape: f32[2,1], index: 5, kind: input, shape index: {}]   ;;  %s8718_s6 = inlined_call_operand.vmem [shape: f32[2,1], index: 6, kind: input, shape index: {}]   ;;  %s8719_s7 = inlined_call_operand.vmem [shape: f32[32,16], index: 7, kind: input, shape index: {}]   ;;  %s8720_s8 = inlined_call_operand.vmem [shape: f32[2,6,1024], index: 8, kind: output, shape index: {0}]   ;;  %s8721_s9 = inlined_call_operand.vmem [shape: f32[2,2,256], index: 9, kind: output, shape index: {1}]  }
   0x1   :  { %s6389_s11 = smov 0   ;;  %s6391_s12 = smov 0  }
   0x2   :  { %s6393_s13 = smov 0  }
   0x3 LB: > { %8755 = sst [smem:[#allocation6_spill]] %s6308_s11  ;;  %s29_s14 = sadd.s32 1, %s6308_s11  ;;  %s6316_s13 = sphi %s6393_s13, %s20_s13   ;;  %s6312_s12 = sphi %s6391_s12, %s8836_s12   ;;  %s6308_s11 = sphi %s6389_s11, %s8835_s11   ;;  %s6304_s10 = sphi %s6387_s10, %s8834_s10   ;;  %s6300_s30 = sphi %s6385_s30, %s8833_s30  }
   0x4   : > { %8756 = sst [smem:[#allocation7_spill]] %s6312_s12  ;;  %s32_s15 = sadd.s32 1, %s6312_s12 }
   0x5   : > { %p30_p0 = scmp.ge.s32.totalorder %s29_s14, 2  ;;  %p5453_p1 = scmp.ge.s32.totalorder %s6316_s13, 1 }
   0x6   : > { %p306_p2 = scmp.lt.s32.totalorder %s6316_s13, 5 }
   0x7   : > { %s8838_s14 = smov (%p30_p0, %s29_s14), 0  ;;  %s8840_s15 = smov (!%p30_p0, %s32_s15), %s6312_s12 }
   0x8   : > { %8757 = sst [smem:[#allocation8_spill]] %s8838_s14  ;;  %p307_p3 = pnand %p5453_p1, %p306_p2 }
   0x9   : > { %p34_p4 = scmp.ge.s32.totalorder %s8840_s15, 2 }
   0xa   : > { %310 = sbr.rel (%p307_p3) target bundleno = 1213 (0x4bd), region = 52 }
   0xb   : > { %s8842_s15 = smov (%p34_p4, %s8840_s15), 0 }
   0xc   : > { %8758 = sst [smem:[#allocation9_spill]] %s8842_s15 }
   0xf   : > { %p354_p5 = scmp.lt.s32.totalorder %s6304_s10, 1  ;;  %s5456_s16 = sshll.u32 %s6300_s30, 2 }
  0x10   : > { %p362_p6 = scmp.lt.s32.totalorder %s5456_s16, 7  ;;  %p371_p7 = scmp.lt.s32.totalorder %s6300_s30, 1 }
  0x11   : > { %s8844_s10 = smov (!%p354_p5, %s6304_s10), 1  ;;  %p5461_p8 = scmp.ne.s32.totalorder %s6300_s30, 0 }
  0x12   : > { %s8846_s16 = smov (!%p362_p6, %s5456_s16), 7  ;;  %s5656_s17 = sshll.u32 %s8844_s10, 7 }
  0x13   : > { %s5457_s18 = sshll.u32 %s8844_s10, 3  ;;  %s6422_s21 = scalar_lea.vmem %s8712_s0, %s5656_s17 }
  0x14   : > { %s365_s22 = sadd.s32 %s5457_s18, %s8846_s16  ;;  %s5459_s27 = sshll.u32 %s8844_s10, 1 }
  0x15   : > { %s5458_s23 = sshll.u32 %s365_s22, 3  ;;  %s6319_s20 = smov (!%p5461_p8), 1  }
  0x16   : > { %s6427_s26 = scalar_lea.vmem %s8720_s8, %s5458_s23 }
  0x17   : > { %s372_s28 = scalar_select %p371_p7, %s6300_s30, 1 }
  0x18   : > { %381 = sbr.rel (%p5461_p8) target bundleno = 434 (0x1b2), region = 56 }
  0x19   : > { %s374_s29 = sadd.s32 %s5459_s27, %s372_s28 }
  0x1a   : > { %s5460_s15 = sshll.u32 %s374_s29, 1 }
  0x1b   : > { %s6433_s11 = scalar_lea.vmem %s8721_s9, %s5460_s15 }
  0x1d   : > { %v1127_v0 = vld [vmem:[%s8719_s7 + $0x18] sm:$0xff]  ;;  %v1126_v1 = vld [vmem:[%s8719_s7 + $0x10] sm:$0xff]  ;;  %v536_v2 = vlaneseq  ;;  %v1125_v3 = vld [vmem:[%s8719_s7 + $0x8] sm:$0xff]  ;;  %v6318_v6 = vmov 1983009808   ;;  %vm1448_vm0 = vcmask 1041409  }
  0x1e   : > { %5695 = vmatprep.subr.mxu0 %v1127_v0  ;;  %5725 = vmatprep.subr.mxu1 %v1127_v0  ;;  %v382_v4 = vld [vmem:[%s6422_s21] sm:$0xff]  ;;  %v6447_v5 = vld [vmem:[%s6422_s21 + $0x8] sm:$0xff]  ;;  %v534_v7 = vunpack.c.l.s4 %v6318_v6  ;;  %v384_v9 = vld [vmem:[%s6422_s21 + $0x10] sm:$0xff]  ;;  %vm1450_vm1 = vcmask 1042434   ;;  %vm1452_vm2 = vcmask 1043459   ;;  %vm1454_vm3 = vcmask 1044484  }
  0x1f   : > { %5696 = vmatpush3.msra.mxu0 %v1127_v0  ;;  %5729 = vmatpush3.msra.mxu1 %v1127_v0  ;;  %v537_v8 = vshrl.u32 %v536_v2, 7  ;;  %v6451_v10 = vld [vmem:[%s6422_s21 + $0x18] sm:$0xff]  ;;  %v6454_v11 = vld [vmem:[%s6422_s21 + $0x40] sm:$0xff]  ;;  %v532_v12 = vcombine.high %v382_v4, %v382_v4  ;;  %v549_v14 = vcombine.high %v6447_v5, %v6447_v5  ;;  %v6459_v15 = vld [vmem:[%s6422_s21 + $0x48] sm:$0xff]  ;;  %v566_v19 = vcombine.high %v384_v9, %v384_v9 }
  0x20   : > { %5697 = vmatprep.subr.mxu0 %v1126_v1  ;;  %5726 = vmatprep.subr.mxu1 %v1126_v1  ;;  %v535_v13 = vunpack.c.0.s8 %v534_v7  ;;  %v6462_v16 = vld [vmem:[%s6422_s21 + $0x50] sm:$0xff]  ;;  %v6465_v17 = vld [vmem:[%s6422_s21 + $0x58] sm:$0xff]  ;;  %v1124_v18 = vld [vmem:[%s8719_s7] sm:$0xff]  ;;  %v583_v20 = vcombine.high %v6451_v10, %v6451_v10  ;;  %v668_v21 = vcombine.high %v6454_v11, %v6454_v11  ;;  %v685_v25 = vcombine.high %v6459_v15, %v6459_v15 }
  0x21   : > { %5698 = vmatpush3.msra.mxu0 %v1126_v1  ;;  %5730 = vmatpush3.msra.mxu1 %v1126_v1  ;;  %v6475_v22 = vld [vmem:[%s6422_s21 + $0x20] sm:$0xff]  ;;  %v6478_v23 = vld [vmem:[%s6422_s21 + $0x28] sm:$0xff]  ;;  %v702_v26 = vcombine.high %v6462_v16, %v6462_v16  ;;  %v719_v27 = vcombine.high %v6465_v17, %v6465_v17  ;;  %v6497_v34 = vsub.s32 0, %v537_v8  ;;  %vm1456_vm4 = vcmask 1045509  }
  0x22   : > { %5699 = vmatprep.subr.mxu0 %v1125_v3  ;;  %5727 = vmatprep.subr.mxu1 %v1125_v3  ;;  %v6480_v24 = vsub.s32 %v535_v13, %v537_v8  ;;  %v600_v28 = vcombine.high %v6475_v22, %v6475_v22  ;;  %v617_v29 = vcombine.high %v6478_v23, %v6478_v23  ;;  %vm1458_vm5 = vcmask 1046534  }
  0x23   : > { %5700 = vmatpush3.msra.mxu0 %v1125_v3  ;;  %5731 = vmatpush3.msra.mxu1 %v1125_v3  ;;  %vm1460_vm6 = vcmask 1047559   ;;  %vm1511_vm7 = vcmask 261120   ;;  %vm398_vm8 = vcmask 7168   ;;  %vm420_vm9 = vcmask 277768  }
  0x24   : > { %5701 = vmatprep.subr.mxu0 %v1124_v18  ;;  %v539_v30 = vrot.slane %v382_v4, %v6480_v24  ;;  %v546_v31 = vrot.slane %v532_v12, %v6480_v24  ;;  %v556_v32 = vrot.slane %v6447_v5, %v6480_v24  ;;  %v563_v33 = vrot.slane %v549_v14, %v6480_v24 }
  0x25   : > { %5702 = vmatpush3.msra.mxu0 %v1124_v18  ;;  %5728 = vmatprep.subr.mxu1 %v1124_v18  ;;  %v573_v35 = vrot.slane %v384_v9, %v6480_v24  ;;  %v580_v36 = vrot.slane %v566_v19, %v6480_v24  ;;  %v6503_v37 = vrot.slane %v6451_v10, %v6480_v24  ;;  %vm515_vm10 = vcmask 269320  }
  0x26   : > { %v547_v38 = vcombine.high %v539_v30, %v539_v30  ;;  %v548_v39 = vcombine.high %v546_v31, %v546_v31  ;;  %v564_v40 = vcombine.high %v556_v32, %v556_v32  ;;  %v565_v41 = vcombine.high %v563_v33, %v563_v33  ;;  %5732 = vmatpush3.msra.mxu1 %v1124_v18 }
  0x27   : > { %v5462_v42 = vrot.slane %v539_v30, 9  ;;  %v5464_v43 = vrot.slane %v546_v31, 9  ;;  %v5466_v44 = vrot.slane %v556_v32, 9  ;;  %v5468_v45 = vrot.slane %v563_v33, 9  ;;  %471 = vrot.lane.b32.xlu1 %v384_v9, %s6319_s20  ;;  %467 = vrot.lane.b32.xlu0 %v382_v4, %s6319_s20 }
  0x28   : > { %v5463_v46 = vrot.slane %v547_v38, 9  ;;  %v5465_v47 = vrot.slane %v548_v39, 9  ;;  %v5467_v48 = vrot.slane %v564_v40, 9  ;;  %v5469_v49 = vrot.slane %v565_v41, 9 }
  0x29   : > { %v1060_v50 = vadd.f32 %v5462_v42, %v539_v30  ;;  %v1062_v51 = vadd.f32 %v5464_v43, %v546_v31  ;;  %v1064_v52 = vadd.f32 %v5466_v44, %v556_v32  ;;  %v1066_v53 = vadd.f32 %v5468_v45, %v563_v33  ;;  %v6537_v43 = vld [vmem:[%s6422_s21 + $0x38] sm:$0xff] }
  0x2a   : > { %v1061_v54 = vadd.f32 %v5463_v46, %v547_v38  ;;  %v1063_v55 = vadd.f32 %v5465_v47, %v548_v39  ;;  %v1065_v56 = vadd.f32 %v5467_v48, %v564_v40  ;;  %v1067_v57 = vadd.f32 %v5469_v49, %v565_v41  ;;  %v6542_v47 = vld [vmem:[%s6422_s21 + $0x30] sm:$0xff] }
  0x2b   : > { %v1195_v58 = vrot.slane %v1060_v50, %v6497_v34  ;;  %v1203_v59 = vrot.slane %v1062_v51, %v6497_v34  ;;  %v1211_v60 = vrot.slane %v1064_v52, %v6497_v34  ;;  %v1219_v61 = vrot.slane %v1066_v53, %v6497_v34  ;;  %473 = vrot.lane.b32.xlu1 %v6451_v10, %s6319_s20 }
  0x2c   : > { %v1199_v62 = vrot.slane %v1061_v54, %v6497_v34  ;;  %v1207_v63 = vrot.slane %v1063_v55, %v6497_v34  ;;  %v1215_v0 = vrot.slane %v1065_v56, %v6497_v34  ;;  %v1223_v1 = vrot.slane %v1067_v57, %v6497_v34  ;;  %469 = vrot.lane.b32.xlu0 %v6447_v5, %s6319_s20 }
  0x2d   : > { %v581_v2 = vcombine.high %v573_v35, %v573_v35  ;;  %v582_v3 = vcombine.high %v580_v36, %v580_v36  ;;  %v597_v4 = vrot.slane %v583_v20, %v6480_v24  ;;  %v598_v6 = vcombine.high %v6503_v37, %v6503_v37 }
  0x2e   : > { %v1449_v7 = vsel %vm1448_vm0, %v1199_v62, %v1195_v58  ;;  %v5470_v8 = vrot.slane %v573_v35, 9  ;;  %v5472_v9 = vrot.slane %v580_v36, 9  ;;  %v5474_v12 = vrot.slane %v6503_v37, 9 }
  0x2f   : > { %v1451_v13 = vsel %vm1450_vm1, %v1203_v59, %v1449_v7  ;;  %v599_v14 = vcombine.high %v597_v4, %v597_v4  ;;  %v5471_v5 = vrot.slane %v581_v2, 9  ;;  %v5473_v18 = vrot.slane %v582_v3, 9  ;;  %477 = vrot.lane.b32.xlu1 %v6478_v23, %s6319_s20 }
  0x30   : > { %v1453_v10 = vsel %vm1452_vm2, %v1207_v63, %v1451_v13  ;;  %v5475_v19 = vrot.slane %v598_v6, 9  ;;  %v5476_v20 = vrot.slane %v597_v4, 9  ;;  %v1068_v30 = vadd.f32 %v5470_v8, %v573_v35  ;;  %475 = vrot.lane.b32.xlu0 %v6475_v22, %s6319_s20 }
  0x31   : > { %v1455_v31 = vsel %vm1454_vm3, %v1211_v60, %v1453_v10  ;;  %v5477_v32 = vrot.slane %v599_v14, 9  ;;  %v1069_v33 = vadd.f32 %v5471_v5, %v581_v2  ;;  %v1070_v38 = vadd.f32 %v5472_v9, %v580_v36 }
  0x32   : > { %v1457_v39 = vsel %vm1456_vm4, %v1215_v0, %v1455_v31  ;;  %v1071_v40 = vadd.f32 %v5473_v18, %v582_v3  ;;  %v1072_v41 = vadd.f32 %v5474_v12, %v6503_v37  ;;  %v1073_v42 = vadd.f32 %v5475_v19, %v598_v6 }
  0x33   : > { %v1459_v44 = vsel %vm1458_vm5, %v1219_v61, %v1457_v39  ;;  %v1074_v45 = vadd.f32 %v5476_v20, %v597_v4  ;;  %v1075_v35 = vadd.f32 %v5477_v32, %v599_v14  ;;  %v1227_v46 = vrot.slane %v1068_v30, %v6497_v34  ;;  %481 = vrot.lane.b32.xlu1 %v6537_v43, %s6319_s20 }
  0x34   : > { %v1461_v36 = vsel %vm1460_vm6, %v1223_v1, %v1459_v44  ;;  %v1231_v48 = vrot.slane %v1069_v33, %v6497_v34  ;;  %v1235_v37 = vrot.slane %v1070_v38, %v6497_v34  ;;  %v1239_v49 = vrot.slane %v1071_v40, %v6497_v34  ;;  %479 = vrot.lane.b32.xlu0 %v6542_v47, %s6319_s20  ;;  %v6599_v38 = vld [vmem:[%s6422_s21 + $0x68] sm:$0xff] }
  0x35   : > { %5703 = vmatprep.mubr.msk.f32.mxu0 %vm1511_vm7, %v1461_v36  ;;  %v1243_v50 = vrot.slane %v1072_v41, %v6497_v34  ;;  %v1247_v51 = vrot.slane %v1073_v42, %v6497_v34  ;;  %v1251_v52 = vrot.slane %v1074_v45, %v6497_v34  ;;  %v1255_v53 = vrot.slane %v1075_v35, %v6497_v34  ;;  %v6606_v42 = vld [vmem:[%s6422_s21 + $0x60] sm:$0xff] }
  0x36   : > { %v1462_v54 = vsel %vm1448_vm0, %v1231_v48, %v1227_v46  ;;  %v675_v55 = vrot.slane %v6454_v11, %v6480_v24  ;;  %v682_v56 = vrot.slane %v668_v21, %v6480_v24  ;;  %v692_v57 = vrot.slane %v6459_v15, %v6480_v24 }
  0x37   : > { %v1463_v58 = vsel %vm1450_vm1, %v1235_v37, %v1462_v54  ;;  %v699_v59 = vrot.slane %v685_v25, %v6480_v24  ;;  %v6573_v60 = vrot.slane %v6462_v16, %v6480_v24  ;;  %v6579_v61 = vrot.slane %v702_v26, %v6480_v24  ;;  %485 = vrot.lane.b32.xlu1 %v6459_v15, %s6319_s20  ;;  %v6629_v54 = vld [vmem:[%s6422_s21 + $0x78] sm:$0xff] }
  0x38   : > { %v1464_v21 = vsel %vm1452_vm2, %v1239_v49, %v1463_v58  ;;  %v683_v62 = vcombine.high %v675_v55, %v675_v55  ;;  %v684_v63 = vcombine.high %v682_v56, %v682_v56  ;;  %v700_v0 = vcombine.high %v692_v57, %v692_v57  ;;  %483 = vrot.lane.b32.xlu0 %v6454_v11, %s6319_s20 }
  0x39   : > { %v1465_v25 = vsel %vm1454_vm3, %v1243_v50, %v1464_v21  ;;  %v701_v1 = vcombine.high %v699_v59, %v699_v59  ;;  %v5494_v2 = vrot.slane %v675_v55, 9  ;;  %v5496_v3 = vrot.slane %v682_v56, 9 }
  0x3a   : > { %v1466_v4 = vsel %vm1456_vm4, %v1247_v51, %v1465_v25  ;;  %v5495_v26 = vrot.slane %v683_v62, 9  ;;  %v5497_v6 = vrot.slane %v684_v63, 9  ;;  %v5498_v7 = vrot.slane %v692_v57, 9 }
  0x3b   : > { %v1467_v15 = vsel %vm1458_vm5, %v1251_v52, %v1466_v4  ;;  %v5499_v8 = vrot.slane %v700_v0, 9  ;;  %v5500_v9 = vrot.slane %v699_v59, 9  ;;  %v5501_v12 = vrot.slane %v701_v1, 9  ;;  %489 = vrot.lane.b32.xlu1 %v6465_v17, %s6319_s20 }
  0x3c   : > { %v1468_v11 = vsel %vm1460_vm6, %v1255_v53, %v1467_v15  ;;  %v1092_v13 = vadd.f32 %v5494_v2, %v675_v55  ;;  %v1093_v14 = vadd.f32 %v5495_v26, %v683_v62  ;;  %v1094_v5 = vadd.f32 %v5496_v3, %v682_v56  ;;  %487 = vrot.lane.b32.xlu0 %v6462_v16, %s6319_s20 }
  0x3d   : > { %5704 = vmatmul.mubr.msk.f32.vlgmr.msra.gmra.mxu0 %vm1511_vm7, %v1468_v11  ;;  %v1095_v18 = vadd.f32 %v5497_v6, %v684_v63  ;;  %v1096_v10 = vadd.f32 %v5498_v7, %v692_v57  ;;  %v1097_v19 = vadd.f32 %v5499_v8, %v700_v0  ;;  %v1098_v20 = vadd.f32 %v5500_v9, %v699_v59  ;;  %v6633_v59 = vld [vmem:[%s6422_s21 + $0x70] sm:$0xff] }
  0x3e   : > { %v1099_v30 = vadd.f32 %v5501_v12, %v701_v1  ;;  %v1323_v31 = vrot.slane %v1092_v13, %v6497_v34  ;;  %v1327_v32 = vrot.slane %v1093_v14, %v6497_v34  ;;  %v1331_v33 = vrot.slane %v1094_v5, %v6497_v34 }
  0x3f   : > { %v1335_v39 = vrot.slane %v1095_v18, %v6497_v34  ;;  %v1339_v40 = vrot.slane %v1096_v10, %v6497_v34  ;;  %v1343_v16 = vrot.slane %v1097_v19, %v6497_v34  ;;  %v1347_v41 = vrot.slane %v1098_v20, %v6497_v34  ;;  %493 = vrot.lane.b32.xlu1 %v6599_v38, %s6319_s20 }
  0x40   : > { %v1351_v44 = vrot.slane %v1099_v30, %v6497_v34  ;;  %v1483_v45 = vsel %vm1448_vm0, %v1327_v32, %v1323_v31  ;;  %v717_v35 = vcombine.high %v6573_v60, %v6573_v60  ;;  %v718_v46 = vcombine.high %v6579_v61, %v6579_v61  ;;  %491 = vrot.lane.b32.xlu0 %v6606_v42, %s6319_s20 }
  0x41   : > { %v1484_v36 = vsel %vm1450_vm1, %v1331_v33, %v1483_v45  ;;  %v726_v48 = vrot.slane %v6465_v17, %v6480_v24  ;;  %v733_v37 = vrot.slane %v719_v27, %v6480_v24  ;;  %v5502_v49 = vrot.slane %v6573_v60, 9 }
  0x42   : > { %v1485_v50 = vsel %vm1452_vm2, %v1335_v39, %v1484_v36  ;;  %v5503_v51 = vrot.slane %v717_v35, 9  ;;  %v5504_v52 = vrot.slane %v6579_v61, 9  ;;  %v5505_v53 = vrot.slane %v718_v46, 9 }
  0x43   : > { %v1486_v55 = vsel %vm1454_vm3, %v1339_v40, %v1485_v50  ;;  %v734_v56 = vcombine.high %v726_v48, %v726_v48  ;;  %v735_v57 = vcombine.high %v733_v37, %v733_v37  ;;  %v5506_v58 = vrot.slane %v726_v48, 9  ;;  %497 = vrot.lane.b32.xlu1 %v6629_v54, %s6319_s20 }
  0x44   : > { %v1487_v17 = vsel %vm1456_vm4, %v1343_v16, %v1486_v55  ;;  %v5508_v27 = vrot.slane %v733_v37, 9  ;;  %v1100_v21 = vadd.f32 %v5502_v49, %v6573_v60  ;;  %v1101_v62 = vadd.f32 %v5503_v51, %v717_v35  ;;  %495 = vrot.lane.b32.xlu0 %v6633_v59, %s6319_s20 }
  0x45   : > { %v1488_v63 = vsel %vm1458_vm5, %v1347_v41, %v1487_v17  ;;  %v5507_v0 = vrot.slane %v734_v56, 9  ;;  %v5509_v25 = vrot.slane %v735_v57, 9  ;;  %v1102_v1 = vadd.f32 %v5504_v52, %v6579_v61 }
  0x46   : > { %v1489_v2 = vsel %vm1460_vm6, %v1351_v44, %v1488_v63  ;;  %v1103_v3 = vadd.f32 %v5505_v53, %v718_v46  ;;  %v1104_v4 = vadd.f32 %v5506_v58, %v726_v48  ;;  %v1106_v26 = vadd.f32 %v5508_v27, %v733_v37 }
  0x47   : > { %5709 = vmatprep.mubr.msk.f32.mxu1 %vm1511_vm7, %v1489_v2  ;;  %v1105_v6 = vadd.f32 %v5507_v0, %v734_v56  ;;  %v1107_v7 = vadd.f32 %v5509_v25, %v735_v57  ;;  %v1355_v60 = vrot.slane %v1100_v21, %v6497_v34  ;;  %v1359_v15 = vrot.slane %v1101_v62, %v6497_v34 }
  0x48   : > { %v1363_v8 = vrot.slane %v1102_v1, %v6497_v34  ;;  %v1367_v9 = vrot.slane %v1103_v3, %v6497_v34  ;;  %v1371_v12 = vrot.slane %v1104_v4, %v6497_v34  ;;  %v1379_v61 = vrot.slane %v1106_v26, %v6497_v34 }
  0x49   : > { %v1375_v11 = vrot.slane %v1105_v6, %v6497_v34  ;;  %v1383_v13 = vrot.slane %v1107_v7, %v6497_v34  ;;  %v1490_v14 = vsel %vm1448_vm0, %v1359_v15, %v1355_v60  ;;  %v607_v5 = vrot.slane %v6475_v22, %v6480_v24 }
  0x4a   : > { %v1491_v18 = vsel %vm1450_vm1, %v1363_v8, %v1490_v14  ;;  %v614_v10 = vrot.slane %v600_v28, %v6480_v24  ;;  %v624_v19 = vrot.slane %v6478_v23, %v6480_v24  ;;  %v631_v20 = vrot.slane %v617_v29, %v6480_v24 }
  0x4b   : > { %v1492_v30 = vsel %vm1452_vm2, %v1367_v9, %v1491_v18  ;;  %v615_v31 = vcombine.high %v607_v5, %v607_v5  ;;  %v5478_v32 = vrot.slane %v607_v5, 9  ;;  %v634_v33 = vcombine.high %v6542_v47, %v6542_v47 }
  0x4c   : > { %v1493_v39 = vsel %vm1454_vm3, %v1371_v12, %v1492_v30  ;;  %v616_v40 = vcombine.high %v614_v10, %v614_v10  ;;  %v632_v22 = vcombine.high %v624_v19, %v624_v19  ;;  %v633_v28 = vcombine.high %v631_v20, %v631_v20 }
  0x4d   : > { %v1494_v16 = vsel %vm1456_vm4, %v1375_v11, %v1493_v39  ;;  %v5479_v41 = vrot.slane %v615_v31, 9  ;;  %v5480_v44 = vrot.slane %v614_v10, 9  ;;  %v5482_v45 = vrot.slane %v624_v19, 9 }
  0x4e   : > { %v1495_v23 = vsel %vm1458_vm5, %v1379_v61, %v1494_v16  ;;  %v5481_v29 = vrot.slane %v616_v40, 9  ;;  %v5483_v35 = vrot.slane %v632_v22, 9  ;;  %v5484_v46 = vrot.slane %v631_v20, 9 }
  0x4f   : > { %v1496_v36 = vsel %vm1460_vm6, %v1383_v13, %v1495_v23  ;;  %v5485_v48 = vrot.slane %v633_v28, 9  ;;  %v1076_v37 = vadd.f32 %v5478_v32, %v607_v5  ;;  %v1077_v49 = vadd.f32 %v5479_v41, %v615_v31 }
  0x50   : > { %5710 = vmatmul.mubr.msk.f32.vlgmr.msra.gmra.mxu1 %vm1511_vm7, %v1496_v36  ;;  %v1078_v50 = vadd.f32 %v5480_v44, %v614_v10  ;;  %v1079_v51 = vadd.f32 %v5481_v29, %v616_v40  ;;  %v1080_v52 = vadd.f32 %v5482_v45, %v624_v19  ;;  %v1081_v53 = vadd.f32 %v5483_v35, %v632_v22 }
  0x51   : > { %v1082_v55 = vadd.f32 %v5484_v46, %v631_v20  ;;  %v1083_v56 = vadd.f32 %v5485_v48, %v633_v28  ;;  %v1259_v57 = vrot.slane %v1076_v37, %v6497_v34  ;;  %v1263_v58 = vrot.slane %v1077_v49, %v6497_v34 }
  0x52   : > { %v1267_v17 = vrot.slane %v1078_v50, %v6497_v34  ;;  %v1271_v27 = vrot.slane %v1079_v51, %v6497_v34  ;;  %v1275_v21 = vrot.slane %v1080_v52, %v6497_v34  ;;  %v1279_v62 = vrot.slane %v1081_v53, %v6497_v34 }
  0x53   : > { %v1283_v63 = vrot.slane %v1082_v55, %v6497_v34  ;;  %v1287_v0 = vrot.slane %v1083_v56, %v6497_v34  ;;  %v1469_v25 = vsel %vm1448_vm0, %v1263_v58, %v1259_v57  ;;  %v641_v1 = vrot.slane %v6542_v47, %v6480_v24 }
  0x54   : > { %v1470_v2 = vsel %vm1450_vm1, %v1267_v17, %v1469_v25  ;;  %v648_v3 = vrot.slane %v634_v33, %v6480_v24  ;;  %v651_v4 = vcombine.high %v6537_v43, %v6537_v43  ;;  %v658_v26 = vrot.slane %v6537_v43, %v6480_v24 }
  0x55   : > { %v1471_v6 = vsel %vm1452_vm2, %v1271_v27, %v1470_v2  ;;  %v649_v7 = vcombine.high %v641_v1, %v641_v1  ;;  %v5486_v60 = vrot.slane %v641_v1, 9  ;;  %v736_v15 = vcombine.high %v6606_v42, %v6606_v42 }
  0x56   : > { %v1472_v8 = vsel %vm1454_vm3, %v1275_v21, %v1471_v6  ;;  %v650_v47 = vcombine.high %v648_v3, %v648_v3  ;;  %v665_v9 = vrot.slane %v651_v4, %v6480_v24  ;;  %v666_v12 = vcombine.high %v658_v26, %v658_v26 }
  0x57   : > { %v1473_v61 = vsel %vm1456_vm4, %v1279_v62, %v1472_v8  ;;  %v5487_v11 = vrot.slane %v649_v7, 9  ;;  %v5488_v13 = vrot.slane %v648_v3, 9  ;;  %v5490_v14 = vrot.slane %v658_v26, 9 }
  0x58   : > { %v1474_v43 = vsel %vm1458_vm5, %v1283_v63, %v1473_v61  ;;  %v667_v5 = vcombine.high %v665_v9, %v665_v9  ;;  %v5489_v18 = vrot.slane %v650_v47, 9  ;;  %v5491_v10 = vrot.slane %v666_v12, 9 }
  0x59   : > { %v1475_v19 = vsel %vm1460_vm6, %v1287_v0, %v1474_v43  ;;  %v5492_v20 = vrot.slane %v665_v9, 9  ;;  %v1084_v30 = vadd.f32 %v5486_v60, %v641_v1  ;;  %v1085_v31 = vadd.f32 %v5487_v11, %v649_v7 }
  0x5a   : > { %5706 = vmatprep.mubr.msk.f32.mxu0 %vm1511_vm7, %v1475_v19  ;;  %v5493_v32 = vrot.slane %v667_v5, 9  ;;  %v1086_v33 = vadd.f32 %v5488_v13, %v648_v3  ;;  %v1087_v39 = vadd.f32 %v5489_v18, %v650_v47  ;;  %v1088_v40 = vadd.f32 %v5490_v14, %v658_v26 }
  0x5b   : > { %v1089_v22 = vadd.f32 %v5491_v10, %v666_v12  ;;  %v1090_v28 = vadd.f32 %v5492_v20, %v665_v9  ;;  %v1291_v16 = vrot.slane %v1084_v30, %v6497_v34  ;;  %v1295_v41 = vrot.slane %v1085_v31, %v6497_v34 }
  0x5c   : > { %v1091_v44 = vadd.f32 %v5493_v32, %v667_v5  ;;  %v1299_v45 = vrot.slane %v1086_v33, %v6497_v34  ;;  %v1303_v23 = vrot.slane %v1087_v39, %v6497_v34  ;;  %v1307_v29 = vrot.slane %v1088_v40, %v6497_v34 }
  0x5d   : > { %v1311_v35 = vrot.slane %v1089_v22, %v6497_v34  ;;  %v1315_v46 = vrot.slane %v1090_v28, %v6497_v34  ;;  %v1476_v36 = vsel %vm1448_vm0, %v1295_v41, %v1291_v16  ;;  %v743_v48 = vrot.slane %v6606_v42, %v6480_v24 }
  0x5e   : > { %v1319_v37 = vrot.slane %v1091_v44, %v6497_v34  ;;  %v1477_v49 = vsel %vm1450_vm1, %v1299_v45, %v1476_v36  ;;  %v750_v50 = vrot.slane %v736_v15, %v6480_v24  ;;  %v753_v51 = vcombine.high %v6599_v38, %v6599_v38 }
  0x5f   : > { %v1478_v52 = vsel %vm1452_vm2, %v1303_v23, %v1477_v49  ;;  %v751_v53 = vcombine.high %v743_v48, %v743_v48  ;;  %v760_v55 = vrot.slane %v6599_v38, %v6480_v24  ;;  %v5510_v56 = vrot.slane %v743_v48, 9 }
  0x60   : > { %v1479_v57 = vsel %vm1454_vm3, %v1307_v29, %v1478_v52  ;;  %v752_v58 = vcombine.high %v750_v50, %v750_v50  ;;  %v767_v42 = vrot.slane %v753_v51, %v6480_v24  ;;  %v5512_v17 = vrot.slane %v750_v50, 9 }
  0x61   : > { %v1480_v27 = vsel %vm1456_vm4, %v1311_v35, %v1479_v57  ;;  %v768_v21 = vcombine.high %v760_v55, %v760_v55  ;;  %v5511_v62 = vrot.slane %v751_v53, 9  ;;  %v5514_v63 = vrot.slane %v760_v55, 9 }
  0x62   : > { %v1481_v0 = vsel %vm1458_vm5, %v1315_v46, %v1480_v27  ;;  %v769_v25 = vcombine.high %v767_v42, %v767_v42  ;;  %v5513_v1 = vrot.slane %v752_v58, 9  ;;  %v5516_v2 = vrot.slane %v767_v42, 9 }
  0x63   : > { %v1482_v3 = vsel %vm1460_vm6, %v1319_v37, %v1481_v0  ;;  %v5515_v38 = vrot.slane %v768_v21, 9  ;;  %v1108_v4 = vadd.f32 %v5510_v56, %v743_v48  ;;  %v1109_v26 = vadd.f32 %v5511_v62, %v751_v53 }
  0x64   : > { %5707 = vmatmul.mubr.msk.f32.gmra.mxu0 %vm1511_vm7, %v1482_v3  ;;  %v5517_v6 = vrot.slane %v769_v25, 9  ;;  %v1110_v7 = vadd.f32 %v5512_v17, %v750_v50  ;;  %v1111_v60 = vadd.f32 %v5513_v1, %v752_v58  ;;  %v1112_v15 = vadd.f32 %v5514_v63, %v760_v55 }
  0x65   : > { %v1113_v8 = vadd.f32 %v5515_v38, %v768_v21  ;;  %v1114_v47 = vadd.f32 %v5516_v2, %v767_v42  ;;  %v1387_v9 = vrot.slane %v1108_v4, %v6497_v34  ;;  %v1391_v12 = vrot.slane %v1109_v26, %v6497_v34 }
  0x66   : > { %v1115_v61 = vadd.f32 %v5517_v6, %v769_v25  ;;  %v1395_v11 = vrot.slane %v1110_v7, %v6497_v34  ;;  %v1399_v13 = vrot.slane %v1111_v60, %v6497_v34  ;;  %v1403_v14 = vrot.slane %v1112_v15, %v6497_v34 }
  0x67   : > { %v1407_v43 = vrot.slane %v1113_v8, %v6497_v34  ;;  %v1497_v5 = vsel %vm1448_vm0, %v1391_v12, %v1387_v9  ;;  %v770_v18 = vcombine.high %v6633_v59, %v6633_v59  ;;  %v1411_v10 = vrot.slane %v1114_v47, %v6497_v34 }
  0x68   : > { %v1498_v19 = vsel %vm1450_vm1, %v1395_v11, %v1497_v5  ;;  %v777_v20 = vrot.slane %v6633_v59, %v6480_v24  ;;  %v787_v30 = vcombine.high %v6629_v54, %v6629_v54  ;;  %v1415_v31 = vrot.slane %v1115_v61, %v6497_v34 }
  0x69   : > { %v1499_v32 = vsel %vm1452_vm2, %v1399_v13, %v1498_v19  ;;  %v784_v33 = vrot.slane %v770_v18, %v6480_v24  ;;  %v794_v39 = vrot.slane %v6629_v54, %v6480_v24  ;;  %vm442_vm11 = vcmask 270336  }
  0x6a   : > { %v1500_v40 = vsel %vm1454_vm3, %v1403_v14, %v1499_v32  ;;  %v785_v22 = vcombine.high %v777_v20, %v777_v20  ;;  %v801_v28 = vrot.slane %v787_v30, %v6480_v24  ;;  %v5518_v16 = vrot.slane %v777_v20, 9 }
  0x6b   : > { %v1501_v59 = vsel %vm1456_vm4, %v1407_v43, %v1500_v40  ;;  %v786_v41 = vcombine.high %v784_v33, %v784_v33  ;;  %v802_v44 = vcombine.high %v794_v39, %v794_v39  ;;  %v5520_v45 = vrot.slane %v784_v33, 9 }
  0x6c   : > { %v1502_v23 = vsel %vm1458_vm5, %v1411_v10, %v1501_v59  ;;  %v803_v29 = vcombine.high %v801_v28, %v801_v28  ;;  %v5519_v35 = vrot.slane %v785_v22, 9  ;;  %v5522_v46 = vrot.slane %v794_v39, 9 }
  0x6d   : > { %v1503_v36 = vsel %vm1460_vm6, %v1415_v31, %v1502_v23  ;;  %v5521_v48 = vrot.slane %v786_v41, 9  ;;  %v5523_v54 = vrot.slane %v802_v44, 9  ;;  %v5524_v37 = vrot.slane %v801_v28, 9 }
  0x6e   : > { %5712 = vmatprep.mubr.msk.f32.mxu1 %vm1511_vm7, %v1503_v36  ;;  %v5525_v49 = vrot.slane %v803_v29, 9  ;;  %v1116_v24 = vadd.f32 %v5518_v16, %v777_v20  ;;  %v1117_v50 = vadd.f32 %v5519_v35, %v785_v22  ;;  %v1118_v51 = vadd.f32 %v5520_v45, %v784_v33 }
  0x6f   : > { %v1119_v52 = vadd.f32 %v5521_v48, %v786_v41  ;;  %v1120_v53 = vadd.f32 %v5522_v46, %v794_v39  ;;  %v1121_v55 = vadd.f32 %v5523_v54, %v802_v44  ;;  %v1122_v56 = vadd.f32 %v5524_v37, %v801_v28 }
  0x70   : > { %v1123_v57 = vadd.f32 %v5525_v49, %v803_v29  ;;  %v1419_v58 = vrot.slane %v1116_v24, %v6497_v34  ;;  %v1423_v42 = vrot.slane %v1117_v50, %v6497_v34  ;;  %v1427_v17 = vrot.slane %v1118_v51, %v6497_v34 }
  0x71   : > { %v1431_v27 = vrot.slane %v1119_v52, %v6497_v34  ;;  %v1435_v21 = vrot.slane %v1120_v53, %v6497_v34  ;;  %v1439_v62 = vrot.slane %v1121_v55, %v6497_v34  ;;  %v1443_v0 = vrot.slane %v1122_v56, %v6497_v34 }
  0x72   : > { %v1504_v63 = vsel %vm1448_vm0, %v1423_v42, %v1419_v58  ;;  %v1447_v1 = vrot.slane %v1123_v57, %v6497_v34  ;;  %v6320_v34 = vmov 0.0   ;;  %vm403_vm12 = vcmask 1024  }
  0x73   : > { %v1505_v25 = vsel %vm1450_vm1, %v1427_v17, %v1504_v63  ;;  %401 = vst.msk [vmem:[#allocation2 + $0x10] sm:$0xff] %vm398_vm8, %v6320_v34  ;;  %402 = vst.msk [vmem:[#allocation2 + $0x18] sm:$0xff] %vm398_vm8, %v6320_v34  ;;  %vm425_vm13 = vcmask 271624   ;;  %vm1653_vm14 = vcmask 146568   ;;  %vm1656_vm15 = vcmask 140424  }
  0x74   : > { %v1506_v2 = vsel %vm1452_vm2, %v1431_v27, %v1505_v25  ;;  %399 = vst.msk [vmem:[#allocation2] sm:$0xff] %vm398_vm8, %v6320_v34  ;;  %400 = vst.msk [vmem:[#allocation2 + $0x8] sm:$0xff] %vm398_vm8, %v6320_v34  ;;  %vm1667_vm0 = vcmask 139264   ;;  %vm1708_vm1 = vcmask 138248  }
  0x75   : > { %v1507_v3 = vsel %vm1454_vm3, %v1435_v21, %v1506_v2  ;;  %405 = vst.msk [vmem:[#allocation2 + $0x28] sm:$0xff] %vm398_vm8, %v6320_v34  ;;  %406 = vst.msk [vmem:[#allocation2 + $0x30] sm:$0xff] %vm398_vm8, %v6320_v34 }
  0x76   : > { %v1508_v38 = vsel %vm1456_vm4, %v1439_v62, %v1507_v3  ;;  %407 = vst.msk [vmem:[#allocation2 + $0x38] sm:$0xff] %vm398_vm8, %v6320_v34  ;;  %408 = vst.msk [vmem:[#allocation2 + $0x40] sm:$0xff] %vm398_vm8, %v6320_v34 }
  0x77   : > { %v1509_v4 = vsel %vm1458_vm5, %v1443_v0, %v1508_v38  ;;  %410 = vst.msk [vmem:[#allocation2 + $0x50] sm:$0xff] %vm398_vm8, %v6320_v34  ;;  %411 = vst.msk [vmem:[#allocation2 + $0x58] sm:$0xff] %vm398_vm8, %v6320_v34 }
  0x78   : > { %v1510_v26 = vsel %vm1460_vm6, %v1447_v1, %v1509_v4  ;;  %412 = vst.msk [vmem:[#allocation2 + $0x60] sm:$0xff] %vm398_vm8, %v6320_v34  ;;  %413 = vst.msk [vmem:[#allocation2 + $0x68] sm:$0xff] %vm398_vm8, %v6320_v34 }
  0x79   : > { %5713 = vmatmul.mubr.msk.f32.gmra.mxu1 %vm1511_vm7, %v1510_v26  ;;  %415 = vst.msk [vmem:[#allocation2 + $0x78] sm:$0xff] %vm398_vm8, %v6320_v34  ;;  %416 = vst.msk [vmem:[#allocation2 + $0x80] sm:$0xff] %vm398_vm8, %v6320_v34 }
  0x7a   : > { %417 = vst.msk [vmem:[#allocation2 + $0x88] sm:$0xff] %vm398_vm8, %v6320_v34  ;;  %418 = vst.msk [vmem:[#allocation2 + $0x90] sm:$0xff] %vm398_vm8, %v6320_v34 }
  0x7b   : > { %1641 = vst.msk [vmem:[#allocation3] sm:$0xff] %vm398_vm8, %v6320_v34  ;;  %1642 = vst.msk [vmem:[#allocation3 + $0x8] sm:$0xff] %vm398_vm8, %v6320_v34 }
  0x7c   : > { %1644 = vst.msk [vmem:[#allocation3 + $0x18] sm:$0xff] %vm398_vm8, %v6320_v34  ;;  %1645 = vst.msk [vmem:[#allocation3 + $0x20] sm:$0xff] %vm398_vm8, %v6320_v34 }
  0x7d   : > { %1647 = vst.msk [vmem:[#allocation3 + $0x30] sm:$0xff] %vm398_vm8, %v6320_v34  ;;  %1648 = vst.msk [vmem:[#allocation3 + $0x38] sm:$0xff] %vm398_vm8, %v6320_v34 }
  0x7e   : > { %1650 = vst.msk [vmem:[#allocation3 + $0x48] sm:$0xff] %vm398_vm8, %v6320_v34  ;;  %1651 = vst.msk [vmem:[#allocation3 + $0x50] sm:$0xff] %vm398_vm8, %v6320_v34 }
  0x7f   : > { %423 = vst.msk [vmem:[#allocation2 + $0x10] sm:$0xff] %vm420_vm9, %v6320_v34  ;;  %424 = vst.msk [vmem:[#allocation2 + $0x18] sm:$0xff] %vm420_vm9, %v6320_v34 }
  0x80   : > { %421 = vst.msk [vmem:[#allocation2] sm:$0xff] %vm420_vm9, %v6320_v34  ;;  %422 = vst.msk [vmem:[#allocation2 + $0x8] sm:$0xff] %vm420_vm9, %v6320_v34 }
  0x81   : > { %427 = vst.msk [vmem:[#allocation2 + $0x28] sm:$0xff] %vm420_vm9, %v6320_v34  ;;  %428 = vst.msk [vmem:[#allocation2 + $0x30] sm:$0xff] %vm420_vm9, %v6320_v34 }
  0x82   : > { %429 = vst.msk [vmem:[#allocation2 + $0x38] sm:$0xff] %vm420_vm9, %v6320_v34  ;;  %430 = vst.msk [vmem:[#allocation2 + $0x40] sm:$0xff] %vm420_vm9, %v6320_v34 }
  0x83   : > { %432 = vst.msk [vmem:[#allocation2 + $0x50] sm:$0xff] %vm420_vm9, %v6320_v34  ;;  %433 = vst.msk [vmem:[#allocation2 + $0x58] sm:$0xff] %vm420_vm9, %v6320_v34 }
  0x84   : > { %434 = vst.msk [vmem:[#allocation2 + $0x60] sm:$0xff] %vm420_vm9, %v6320_v34  ;;  %435 = vst.msk [vmem:[#allocation2 + $0x68] sm:$0xff] %vm420_vm9, %v6320_v34 }
  0x85   : > { %437 = vst.msk [vmem:[#allocation2 + $0x78] sm:$0xff] %vm420_vm9, %v6320_v34  ;;  %438 = vst.msk [vmem:[#allocation2 + $0x80] sm:$0xff] %vm420_vm9, %v6320_v34 }
  0x86   : > { %439 = vst.msk [vmem:[#allocation2 + $0x88] sm:$0xff] %vm420_vm9, %v6320_v34  ;;  %440 = vst.msk [vmem:[#allocation2 + $0x90] sm:$0xff] %vm420_vm9, %v6320_v34 }
  0x87   : > { %404 = vst.msk [vmem:[#allocation2 + $0x20] sm:$0x3] %vm403_vm12, %v6320_v34  ;;  %409 = vst.msk [vmem:[#allocation2 + $0x48] sm:$0x3] %vm403_vm12, %v6320_v34 }
  0x88   : > { %414 = vst.msk [vmem:[#allocation2 + $0x70] sm:$0x3] %vm403_vm12, %v6320_v34  ;;  %419 = vst.msk [vmem:[#allocation2 + $0x98] sm:$0x3] %vm403_vm12, %v6320_v34 }
  0x89   : > { %1643 = vst.msk [vmem:[#allocation3 + $0x10] sm:$0x3] %vm403_vm12, %v6320_v34  ;;  %1646 = vst.msk [vmem:[#allocation3 + $0x28] sm:$0x3] %vm403_vm12, %v6320_v34 }
  0x8a   : > { %1649 = vst.msk [vmem:[#allocation3 + $0x40] sm:$0x3] %vm403_vm12, %v6320_v34  ;;  %1652 = vst.msk [vmem:[#allocation3 + $0x58] sm:$0x3] %vm403_vm12, %v6320_v34 }
  0x8b   : > { %1655 = vst.msk [vmem:[#allocation3 + $0x8] sm:$0xff] %vm1653_vm14, %v6320_v34  ;;  %1654 = vst.msk [vmem:[#allocation3] sm:$0xff] %vm1653_vm14, %v6320_v34 }
  0x8c   : > { %1658 = vst.msk [vmem:[#allocation3 + $0x18] sm:$0xff] %vm1653_vm14, %v6320_v34  ;;  %1659 = vst.msk [vmem:[#allocation3 + $0x20] sm:$0xff] %vm1653_vm14, %v6320_v34 }
  0x8d   : > { %1661 = vst.msk [vmem:[#allocation3 + $0x30] sm:$0xff] %vm1653_vm14, %v6320_v34  ;;  %1662 = vst.msk [vmem:[#allocation3 + $0x38] sm:$0xff] %vm1653_vm14, %v6320_v34 }
  0x8e   : > { %1664 = vst.msk [vmem:[#allocation3 + $0x48] sm:$0xff] %vm1653_vm14, %v6320_v34  ;;  %1665 = vst.msk [vmem:[#allocation3 + $0x50] sm:$0xff] %vm1653_vm14, %v6320_v34 }
  0x8f   : > { %443 = vst.msk [vmem:[#allocation2] sm:$0x1] %vm442_vm11, %v6320_v34  ;;  %444 = vst.msk [vmem:[#allocation2 + $0x28] sm:$0x1] %vm442_vm11, %v6320_v34 }
  0x90   : > { %426 = vst.msk [vmem:[#allocation2 + $0x20] sm:$0x3] %vm425_vm13, %v6320_v34  ;;  %431 = vst.msk [vmem:[#allocation2 + $0x48] sm:$0x3] %vm425_vm13, %v6320_v34 }
  0x91   : > { %445 = vst.msk [vmem:[#allocation2 + $0x50] sm:$0x1] %vm442_vm11, %v6320_v34  ;;  %446 = vst.msk [vmem:[#allocation2 + $0x78] sm:$0x1] %vm442_vm11, %v6320_v34 }
  0x92   : > { %436 = vst.msk [vmem:[#allocation2 + $0x70] sm:$0x3] %vm425_vm13, %v6320_v34  ;;  %441 = vst.msk [vmem:[#allocation2 + $0x98] sm:$0x3] %vm425_vm13, %v6320_v34 }
  0x93   : > { %1657 = vst.msk [vmem:[#allocation3 + $0x10] sm:$0x3] %vm1656_vm15, %v6320_v34  ;;  %1660 = vst.msk [vmem:[#allocation3 + $0x28] sm:$0x3] %vm1656_vm15, %v6320_v34 }
  0x94   : > { %1663 = vst.msk [vmem:[#allocation3 + $0x40] sm:$0x3] %vm1656_vm15, %v6320_v34  ;;  %1666 = vst.msk [vmem:[#allocation3 + $0x58] sm:$0x3] %vm1656_vm15, %v6320_v34 }
  0x95   : > { %1668 = vst.msk [vmem:[#allocation3] sm:$0x1] %vm1667_vm0, %v6320_v34  ;;  %1669 = vst.msk [vmem:[#allocation3 + $0x18] sm:$0x1] %vm1667_vm0, %v6320_v34 }
  0x96   : > { %1670 = vst.msk [vmem:[#allocation3 + $0x30] sm:$0x1] %vm1667_vm0, %v6320_v34  ;;  %1671 = vst.msk [vmem:[#allocation3 + $0x48] sm:$0x1] %vm1667_vm0, %v6320_v34 }
  0x97   : > { %447 = vst.msk [vmem:[#allocation2 + $0x21] sm:$0x1] %vm442_vm11, %v6320_v34  ;;  %448 = vst.msk [vmem:[#allocation2 + $0x49] sm:$0x1] %vm442_vm11, %v6320_v34 }
  0x98   : > { %449 = vst.msk [vmem:[#allocation2 + $0x71] sm:$0x1] %vm442_vm11, %v6320_v34  ;;  %450 = vst.msk [vmem:[#allocation2 + $0x99] sm:$0x1] %vm442_vm11, %v6320_v34 }
  0x99   : > { %v6767_v6 = vpop.permute.xlu1 %471  ;;  %v6769_v7 = vpop.permute.xlu0 %467  ;;  %1672 = vst.msk [vmem:[#allocation3 + $0x11] sm:$0x1] %vm1667_vm0, %v6320_v34  ;;  %1673 = vst.msk [vmem:[#allocation3 + $0x29] sm:$0x1] %vm1667_vm0, %v6320_v34 }
  0x9a   : > { %518 = vst.msk [vmem:[#allocation2 + $0x11] sm:$0xff] %vm515_vm10, %v6767_v6  ;;  %516 = vst.msk [vmem:[#allocation2 + $0x1] sm:$0xff] %vm515_vm10, %v6769_v7 }
  0x9b   : > { %1674 = vst.msk [vmem:[#allocation3 + $0x41] sm:$0x1] %vm1667_vm0, %v6320_v34  ;;  %1675 = vst.msk [vmem:[#allocation3 + $0x59] sm:$0x1] %vm1667_vm0, %v6320_v34 }
  0x9d   : > { %v474_v60 = vpop.permute.xlu1 %473 }
  0x9e   : > { %v470_v15 = vpop.permute.xlu0 %469  ;;  %519 = vst.msk [vmem:[#allocation2 + $0x19] sm:$0xff] %vm515_vm10, %v474_v60 }
  0x9f   : > { %517 = vst.msk [vmem:[#allocation2 + $0x9] sm:$0xff] %vm515_vm10, %v470_v15 }
  0xa1   : > { %v478_v8 = vpop.permute.xlu1 %477 }
  0xa2   : > { %v476_v47 = vpop.permute.xlu0 %475  ;;  %521 = vst.msk [vmem:[#allocation2 + $0x31] sm:$0xff] %vm515_vm10, %v478_v8 }
  0xa3   : > { %520 = vst.msk [vmem:[#allocation2 + $0x29] sm:$0xff] %vm515_vm10, %v476_v47 }
  0xa5   : > { %v482_v9 = vpop.permute.xlu1 %481 }
  0xa6   : > { %v480_v12 = vpop.permute.xlu0 %479  ;;  %523 = vst.msk [vmem:[#allocation2 + $0x41] sm:$0xff] %vm515_vm10, %v482_v9 }
  0xa7   : > { %522 = vst.msk [vmem:[#allocation2 + $0x39] sm:$0xff] %vm515_vm10, %v480_v12 }
  0xa9   : > { %v486_v61 = vpop.permute.xlu1 %485 }
  0xaa   : > { %v484_v11 = vpop.permute.xlu0 %483  ;;  %525 = vst.msk [vmem:[#allocation2 + $0x59] sm:$0xff] %vm515_vm10, %v486_v61 }
  0xab   : > { %524 = vst.msk [vmem:[#allocation2 + $0x51] sm:$0xff] %vm515_vm10, %v484_v11 }
  0xad   : > { %v490_v13 = vpop.permute.xlu1 %489 }
  0xae   : > { %v488_v14 = vpop.permute.xlu0 %487  ;;  %527 = vst.msk [vmem:[#allocation2 + $0x69] sm:$0xff] %vm515_vm10, %v490_v13 }
  0xaf   : > { %526 = vst.msk [vmem:[#allocation2 + $0x61] sm:$0xff] %vm515_vm10, %v488_v14 }
  0xb1   : > { %v494_v43 = vpop.permute.xlu1 %493 }
  0xb2   : > { %v492_v5 = vpop.permute.xlu0 %491  ;;  %529 = vst.msk [vmem:[#allocation2 + $0x81] sm:$0xff] %vm515_vm10, %v494_v43 }
  0xb3   : > { %528 = vst.msk [vmem:[#allocation2 + $0x79] sm:$0xff] %vm515_vm10, %v492_v5 }
  0xb5   : > { %v498_v18 = vpop.permute.xlu1 %497 }
  0xb6   : > { %v496_v10 = vpop.permute.xlu0 %495  ;;  %531 = vst.msk [vmem:[#allocation2 + $0x91] sm:$0xff] %vm515_vm10, %v498_v18 }
  0xb7   : > { %530 = vst.msk [vmem:[#allocation2 + $0x89] sm:$0xff] %vm515_vm10, %v496_v10 }
  0xfd   : > { %v5705_v19 = vpop.f32.mrf.mxu0 }
  0xfe   : > { %v1634_v20 = vmul.f32 0.25, %v5705_v19 }
  0xff   : > { %v1594_v30 = vpop.f32.mrf.mxu0 }
 0x100   : > { %v1633_v31 = vmul.f32 0.25, %v1594_v30  ;;  %1686 = vrot.lane.b32.xlu1 %v1634_v20, %s6319_s20 }
 0x102   : > { %1684 = vrot.lane.b32.xlu0 %v1633_v31, %s6319_s20 }
 0x110   : > { %v5711_v32 = vpop.f32.mrf.mxu1 }
 0x111   : > { %v1638_v33 = vmul.f32 0.25, %v5711_v32 }
 0x112   : > { %v1614_v39 = vpop.f32.mrf.mxu1 }
 0x113   : > { %v1637_v40 = vmul.f32 0.25, %v1614_v39  ;;  %1694 = vrot.lane.b32.xlu1 %v1638_v33, %s6319_s20 }
 0x115   : > { %1692 = vrot.lane.b32.xlu0 %v1637_v40, %s6319_s20 }
 0x124   : > { %v5708_v22 = vpop.f32.mrf.mxu0 }
 0x125   : > { %v1636_v28 = vmul.f32 0.25, %v5708_v22 }
 0x126   : > { %v1604_v16 = vpop.f32.mrf.mxu0 }
 0x127   : > { %v1635_v59 = vmul.f32 0.25, %v1604_v16  ;;  %1690 = vrot.lane.b32.xlu1 %v1636_v28, %s6319_s20 }
 0x129   : > { %1688 = vrot.lane.b32.xlu0 %v1635_v59, %s6319_s20 }
 0x139   : > { %v5714_v41 = vpop.f32.mrf.mxu1 }
 0x13a   : > { %v1640_v44 = vmul.f32 0.25, %v5714_v41 }
 0x13b   : > { %v1624_v45 = vpop.f32.mrf.mxu1 }
 0x13c   : > { %v1639_v23 = vmul.f32 0.25, %v1624_v45  ;;  %1698 = vrot.lane.b32.xlu1 %v1640_v44, %s6319_s20 }
 0x13e   : > { %1696 = vrot.lane.b32.xlu0 %v1639_v23, %s6319_s20 }
 0x172   : > { %v1687_v29 = vpop.permute.xlu1 %1686 }
 0x173   : > { %1710 = vst.msk [vmem:[#allocation3 + $0x9] sm:$0xff] %vm1708_vm1, %v1687_v29 }
 0x174   : > { %v1685_v35 = vpop.permute.xlu0 %1684 }
 0x175   : > { %1709 = vst.msk [vmem:[#allocation3 + $0x1] sm:$0xff] %vm1708_vm1, %v1685_v35 }
 0x185   : > { %v1695_v46 = vpop.permute.xlu1 %1694 }
 0x186   : > { %1714 = vst.msk [vmem:[#allocation3 + $0x39] sm:$0xff] %vm1708_vm1, %v1695_v46 }
 0x187   : > { %v1693_v36 = vpop.permute.xlu0 %1692 }
 0x188   : > { %1713 = vst.msk [vmem:[#allocation3 + $0x31] sm:$0xff] %vm1708_vm1, %v1693_v36 }
 0x199   : > { %v1691_v48 = vpop.permute.xlu1 %1690 }
 0x19a   : > { %1712 = vst.msk [vmem:[#allocation3 + $0x21] sm:$0xff] %vm1708_vm1, %v1691_v48 }
 0x19b   : > { %v1689_v54 = vpop.permute.xlu0 %1688 }
 0x19c   : > { %1711 = vst.msk [vmem:[#allocation3 + $0x19] sm:$0xff] %vm1708_vm1, %v1689_v54 }
 0x1ae   : > { %v1699_v37 = vpop.permute.xlu1 %1698 }
 0x1af   : > { %1716 = vst.msk [vmem:[#allocation3 + $0x51] sm:$0xff] %vm1708_vm1, %v1699_v37 }
 0x1b0   : > { %v1697_v49 = vpop.permute.xlu0 %1696 }
 0x1b1   : > { %1715 = vst.msk [vmem:[#allocation3 + $0x49] sm:$0xff] %vm1708_vm1, %v1697_v49 }
 0x1b2 PF: > { %s5534_s21 = sshll.u32 %s6300_s30, 4  ;;  %v1732_v24 = vlaneseq  ;;  %v6321_v50 = vmov 1983009808   ;;  %v6322_v52 = vmov 1934713408   ;;  %s6323_s23 = smov 127  }
 0x1b3   : > { %v1730_v51 = vunpack.c.l.s4 %v6321_v50  ;;  %v1762_v53 = vunpack.c.l.s4 %v6322_v52  ;;  %s6966_s22 = scalar_lea.vmem [#allocation2], %s5534_s21  ;;  %v8728_v59 = vmov 0.0   ;;  %s5619_s24 = sshll.u32 %s6300_s30, 3  ;;  %vm1911_vm2 = vcmask 261120  }
 0x1b4   : > { %v6969_v55 = vld [vmem:[%s6966_s22] sm:$0xff]  ;;  %v6972_v56 = vld [vmem:[%s6966_s22 + $0x8] sm:$0xff]  ;;  %v1733_v58 = vshrl.u32 %v1732_v24, 7  ;;  %v6982_v42 = vld [vmem:[%s6966_s22 + $0x50] sm:$0xff]  ;;  %s6325_s25 = smov 64   ;;  %s7052_s27 = scalar_lea.vmem [#allocation3], %s5619_s24 }
 0x1b5   : > { %v6975_v57 = vld [vmem:[%s6966_s22 + $0x28] sm:$0xff]  ;;  %1960 = vrot.lane.b32.xlu0 %v6969_v55, %s6323_s23  ;;  %1962 = vrot.lane.b32.xlu1 %v6972_v56, %s6323_s23  ;;  %v6985_v17 = vld [vmem:[%s6966_s22 + $0x78] sm:$0xff]  ;;  %v1731_v27 = vunpack.c.0.s8 %v1730_v51  ;;  %v1763_v21 = vunpack.c.0.s8 %v1762_v53  ;;  %v1727_v62 = vcombine.low %v6969_v55, %v6982_v42  ;;  %v1728_v63 = vcombine.high %v6969_v55, %v6982_v42  ;;  %s6326_s30 = smov 96   ;;  %s6327_s28 = smov 32  }
 0x1b6   : > { %v1743_v0 = vcombine.low %v6975_v57, %v6985_v17  ;;  %v1744_v25 = vcombine.high %v6975_v57, %v6985_v17  ;;  %v6996_v1 = vld [vmem:[%s6966_s22 + $0x30] sm:$0xff]  ;;  %v6999_v2 = vld [vmem:[%s6966_s22 + $0x58] sm:$0xff]  ;;  %v7002_v3 = vld [vmem:[%s6966_s22 + $0x80] sm:$0xff]  ;;  %s6328_s29 = smov 126   ;;  %vm1913_vm3 = vcmask 523264   ;;  %vm1915_vm4 = vcmask 785408  }
 0x1b7   : > { %v7004_v38 = vsub.s32 %v1731_v27, %v1733_v58  ;;  %v1795_v4 = vcombine.low %v6972_v56, %v6999_v2  ;;  %v1796_v26 = vcombine.high %v6972_v56, %v6999_v2  ;;  %v7010_v6 = vsub.s32 %v1763_v21, %v1733_v58  ;;  %v7066_v50 = vld [vmem:[%s6966_s22 + $0x1] sm:$0xff]  ;;  %v7069_v51 = vld [vmem:[%s6966_s22 + $0x51] sm:$0xff]  ;;  %v7072_v52 = vld [vmem:[%s6966_s22 + $0x29] sm:$0xff]  ;;  %s6329_s17 = smov 48   ;;  %s6330_s16 = smov 16  }
 0x1b8   : > { %v1811_v7 = vcombine.low %v6996_v1, %v7002_v3  ;;  %v1812_v34 = vcombine.high %v6996_v1, %v7002_v3  ;;  %v7075_v53 = vld [vmem:[%s6966_s22 + $0x79] sm:$0xff]  ;;  %v2464_v58 = vcombine.low %v7066_v50, %v7069_v51  ;;  %v2465_v27 = vcombine.high %v7066_v50, %v7069_v51  ;;  %s6331_s10 = smov 80   ;;  %s6332_s18 = smov 112  }
 0x1b9   : > { %v1735_v60 = vrot.slane %v1727_v62, %v7004_v38  ;;  %v1742_v15 = vrot.slane %v1728_v63, %v7004_v38  ;;  %v1751_v8 = vrot.slane %v1743_v0, %v7004_v38  ;;  %v1758_v47 = vrot.slane %v1744_v25, %v7004_v38  ;;  %v7090_v63 = vld [vmem:[%s6966_s22 + $0x9] sm:$0xff]  ;;  %v7093_v0 = vld [vmem:[%s6966_s22 + $0x59] sm:$0xff]  ;;  %v7096_v25 = vld [vmem:[%s6966_s22 + $0x31] sm:$0xff] }
 0x1ba   : > { %v1803_v9 = vrot.slane %v1795_v4, %v7004_v38  ;;  %v1810_v12 = vrot.slane %v1796_v26, %v7004_v38  ;;  %v1819_v61 = vrot.slane %v1811_v7, %v7004_v38  ;;  %v1826_v11 = vrot.slane %v1812_v34, %v7004_v38  ;;  %v7099_v4 = vld [vmem:[%s6966_s22 + $0x81] sm:$0xff] }
 0x1bb   : > { %v1760_v13 = vcombine.high %v1735_v60, %v1751_v8  ;;  %v1776_v14 = vcombine.high %v1742_v15, %v1758_v47  ;;  %v1759_v43 = vcombine.low %v1735_v60, %v1751_v8  ;;  %v1775_v5 = vcombine.low %v1742_v15, %v1758_v47 }
 0x1bc   : > { %v1828_v18 = vcombine.high %v1803_v9, %v1819_v61  ;;  %v1844_v10 = vcombine.high %v1810_v12, %v1826_v11  ;;  %v1827_v19 = vcombine.low %v1803_v9, %v1819_v61  ;;  %v1843_v20 = vcombine.low %v1810_v12, %v1826_v11 }
 0x1bd   : > { %v1774_v30 = vrot.slane %v1760_v13, %v7010_v6  ;;  %v1790_v31 = vrot.slane %v1776_v14, %v7010_v6  ;;  %v7027_v32 = vrot.slane %v1759_v43, %v7010_v6  ;;  %v7030_v33 = vrot.slane %v1775_v5, %v7010_v6 }
 0x1be   : > { %v1842_v39 = vrot.slane %v1828_v18, %v7010_v6  ;;  %v1858_v40 = vrot.slane %v1844_v10, %v7010_v6  ;;  %v7035_v22 = vrot.slane %v1827_v19, %v7010_v6  ;;  %v7038_v28 = vrot.slane %v1843_v20, %v7010_v6 }
 0x1bf   : > { %v5806_v16 = vpack.i.bf16 %v1790_v31, %v1774_v30  ;;  %v1792_v41 = vcombine.high %v1774_v30, %v8728_v59  ;;  %v1794_v44 = vcombine.high %v1790_v31, %v8728_v59  ;;  %v1791_v46 = vcombine.high %v7027_v32, %v8728_v59 }
 0x1c0   : > { %v1859_v45 = vcombine.high %v7035_v22, %v8728_v59  ;;  %v1861_v23 = vcombine.high %v7038_v28, %v8728_v59  ;;  %v5811_v35 = vpack.i.bf16 %v1858_v40, %v1842_v39  ;;  %v1793_v36 = vcombine.high %v7030_v33, %v8728_v59 }
 0x1c1   : > { %5807 = vrot.lane.b32.xlu0 %v5806_v16, %s6325_s25  ;;  %v5821_v29 = vpack.i.bf16 %v1794_v44, %v1792_v41  ;;  %v1860_v54 = vcombine.high %v1842_v39, %v8728_v59  ;;  %v1862_v37 = vcombine.high %v1858_v40, %v8728_v59  ;;  %v2480_v21 = vcombine.low %v7072_v52, %v7075_v53 }
 0x1c2   : > { %v5826_v48 = vpack.i.bf16 %v1861_v23, %v1859_v45  ;;  %v5816_v49 = vpack.i.bf16 %v1793_v36, %v1791_v46  ;;  %v2481_v62 = vcombine.high %v7072_v52, %v7075_v53  ;;  %v2472_v26 = vrot.slane %v2464_v58, %v7004_v38  ;;  %v5599_v58 = vld [vmem:[%s6966_s22 + $0x7a] sm:$0xff] }
 0x1c3   : > { %5822 = vrot.lane.b32.xlu1 %v5821_v29, %s6326_s30  ;;  %v5831_v24 = vpack.i.bf16 %v1862_v37, %v1860_v54  ;;  %v2479_v7 = vrot.slane %v2465_v27, %v7004_v38  ;;  %v2532_v34 = vcombine.low %v7090_v63, %v7093_v0  ;;  %v2533_v60 = vcombine.high %v7090_v63, %v7093_v0  ;;  %v5593_v37 = vld [vmem:[%s6966_s22 + $0x2] sm:$0xff]  ;;  %v7217_v27 = vld [vmem:[%s7052_s27 + $0x4a] sm:$0xff] }
 0x1c4   : > { %v2488_v15 = vrot.slane %v2480_v21, %v7004_v38  ;;  %v2495_v8 = vrot.slane %v2481_v62, %v7004_v38  ;;  %v2548_v47 = vcombine.low %v7096_v25, %v7099_v4  ;;  %v2549_v9 = vcombine.high %v7096_v25, %v7099_v4  ;;  %v7222_v21 = vld [vmem:[%s6966_s22 + $0xa] sm:$0xff]  ;;  %v7232_v62 = vld [vmem:[%s6966_s22 + $0x5a] sm:$0xff] }
 0x1c5   : > { %5812 = vrot.lane.b32.xlu0 %v5811_v35, %s6325_s25  ;;  %v2540_v11 = vrot.slane %v2532_v34, %v7004_v38  ;;  %v2547_v13 = vrot.slane %v2533_v60, %v7004_v38  ;;  %vm3989_vm5 = vcmask 1041408   ;;  %vm3985_vm6 = vcmask 293888  }
 0x1c6   : > { %v2496_v12 = vcombine.low %v2472_v26, %v2488_v15  ;;  %v2512_v61 = vcombine.low %v2479_v7, %v2495_v8  ;;  %v2556_v14 = vrot.slane %v2548_v47, %v7004_v38  ;;  %v2563_v43 = vrot.slane %v2549_v9, %v7004_v38 }
 0x1c7   : > { %5827 = vrot.lane.b32.xlu1 %v5826_v48, %s6327_s28  ;;  %v2497_v18 = vcombine.high %v2472_v26, %v2488_v15  ;;  %v7237_v26 = vld [vmem:[%s6966_s22 + $0x82] sm:$0xff]  ;;  %vm6334_vm7 = vmmov 0   ;;  %vm4214_vm8 = vcmask 130048   ;;  %vm4217_vm9 = vcmask 392192  }
 0x1c8   : > { %v7128_v5 = vrot.slane %v2496_v12, %v7010_v6  ;;  %v2564_v10 = vcombine.low %v2540_v11, %v2556_v14  ;;  %v2580_v19 = vcombine.low %v2547_v13, %v2563_v43  ;;  %v2565_v31 = vcombine.high %v2540_v11, %v2556_v14 }
 0x1c9   : > { %5817 = vrot.lane.b32.xlu0 %v5816_v49, %s6327_s28  ;;  %v2511_v30 = vrot.slane %v2497_v18, %v7010_v6  ;;  %v5595_v49 = vld [vmem:[%s6966_s22 + $0x2a] sm:$0xff]  ;;  %vm4220_vm10 = vcmask 654336   ;;  %vm4223_vm11 = vcmask 916480  }
 0x1ca   : > { %v2528_v20 = vcombine.high %v7128_v5, %v8728_v59  ;;  %v7146_v39 = vrot.slane %v2564_v10, %v7010_v6  ;;  %v7149_v40 = vrot.slane %v2580_v19, %v7010_v6  ;;  %v2579_v45 = vrot.slane %v2565_v31, %v7010_v6 }
 0x1cb   : > { %5832 = vrot.lane.b32.xlu1 %v5831_v24, %s6326_s30  ;;  %v2529_v41 = vcombine.high %v2511_v30, %v8728_v59  ;;  %v5597_v24 = vld [vmem:[%s6966_s22 + $0x52] sm:$0xff]  ;;  %v3217_v14 = vcombine.high %v5595_v49, %v5599_v58 }
 0x1cc   : > { %v2596_v23 = vcombine.high %v7146_v39, %v8728_v59  ;;  %v2598_v29 = vcombine.high %v7149_v40, %v8728_v59  ;;  %v2597_v36 = vcombine.high %v2579_v45, %v8728_v59  ;;  %v3201_v11 = vcombine.high %v5593_v37, %v5597_v24 }
 0x1cd   : > { %1964 = vrot.lane.b32.xlu0 %v6975_v57, %s6323_s23  ;;  %v7255_v31 = vrot.slane %v3217_v14, %v7004_v38 }
 0x1ce   : > { %v5851_v46 = vpack.i.bf16 %v2598_v29, %v2596_v23 }
 0x1cf   : > { %1966 = vrot.lane.b32.xlu1 %v6996_v1, %s6323_s23 }
 0x1d1   : > { %1968 = vrot.lane.b32.xlu0 %v6982_v42, %s6323_s23 }
 0x1d3   : > { %1970 = vrot.lane.b32.xlu1 %v6999_v2, %s6323_s23 }
 0x1d5   : > { %1972 = vrot.lane.b32.xlu0 %v6985_v17, %s6323_s23 }
 0x1d7   : > { %1974 = vrot.lane.b32.xlu1 %v7002_v3, %s6323_s23 }
 0x1d9   : > { %2216 = vrot.lane.b32.xlu0 %v6969_v55, %s6328_s29  ;;  %v7131_v55 = vrot.slane %v2512_v61, %v7010_v6  ;;  %v3200_v61 = vcombine.low %v5593_v37, %v5597_v24 }
 0x1db   : > { %2218 = vrot.lane.b32.xlu1 %v6972_v56, %s6328_s29  ;;  %v2513_v56 = vcombine.high %v2479_v7, %v2495_v8 }
 0x1dd   : > { %2220 = vrot.lane.b32.xlu0 %v6975_v57, %s6328_s29  ;;  %v2530_v57 = vcombine.high %v7131_v55, %v8728_v59 }
 0x1df   : > { %2222 = vrot.lane.b32.xlu1 %v6996_v1, %s6328_s29  ;;  %v2527_v1 = vrot.slane %v2513_v56, %v7010_v6  ;;  %v5836_v16 = vpack.i.bf16 %v2530_v57, %v2528_v20  ;;  %v7246_v20 = vrot.slane %v3200_v61, %v7004_v38  ;;  %v7249_v57 = vrot.slane %v3201_v11, %v7004_v38 }
 0x1e1   : > { %2224 = vrot.lane.b32.xlu0 %v6982_v42, %s6328_s29  ;;  %v2581_v42 = vcombine.high %v2547_v13, %v2563_v43  ;;  %v2531_v44 = vcombine.high %v2527_v1, %v8728_v59  ;;  %v3216_v13 = vcombine.low %v5595_v49, %v5599_v58 }
 0x1e3   : > { %2226 = vrot.lane.b32.xlu1 %v6999_v2, %s6328_s29  ;;  %v5841_v2 = vpack.i.bf16 %v2527_v1, %v2511_v30  ;;  %v2595_v35 = vrot.slane %v2581_v42, %v7010_v6  ;;  %v7252_v30 = vrot.slane %v3216_v13, %v7004_v38 }
 0x1e5   : > { %2228 = vrot.lane.b32.xlu0 %v6985_v17, %s6328_s29  ;;  %v5846_v17 = vpack.i.bf16 %v2531_v44, %v2529_v41  ;;  %v5856_v48 = vpack.i.bf16 %v2595_v35, %v2579_v45 }
 0x1e7   : > { %2230 = vrot.lane.b32.xlu1 %v7002_v3, %s6328_s29  ;;  %v2599_v3 = vcombine.high %v2595_v35, %v8728_v59 }
 0x1e9   : > { %5837 = vrot.lane.b32.xlu0 %v5836_v16, %s6327_s28  ;;  %v5861_v54 = vpack.i.bf16 %v2599_v3, %v2597_v36 }
 0x1eb   : > { %5842 = vrot.lane.b32.xlu1 %v5841_v2, %s6325_s25 }
 0x1ed   : > { %5847 = vrot.lane.b32.xlu0 %v5846_v17, %s6326_s30 }
 0x1ef   : > { %5852 = vrot.lane.b32.xlu1 %v5851_v46, %s6327_s28 }
 0x1f1   : > { %5857 = vrot.lane.b32.xlu0 %v5856_v48, %s6325_s25 }
 0x1f3   : > { %5862 = vrot.lane.b32.xlu1 %v5861_v54, %s6326_s30 }
 0x1f5   : > { %2696 = vrot.lane.b32.xlu0 %v7066_v50, %s6323_s23 }
 0x1f7   : > { %2698 = vrot.lane.b32.xlu1 %v7090_v63, %s6323_s23 }
 0x1f9   : > { %2700 = vrot.lane.b32.xlu0 %v7072_v52, %s6323_s23 }
 0x1fb   : > { %2702 = vrot.lane.b32.xlu1 %v7096_v25, %s6323_s23 }
 0x1fd   : > { %2704 = vrot.lane.b32.xlu0 %v7069_v51, %s6323_s23 }
 0x1ff   : > { %3686 = vrot.lane.b32.xlu1 %v5593_v37, %s6328_s29 }
 0x201   : > { %3690 = vrot.lane.b32.xlu0 %v5595_v49, %s6328_s29 }
 0x203   : > { %3694 = vrot.lane.b32.xlu1 %v5597_v24, %s6328_s29 }
 0x205   : > { %3698 = vrot.lane.b32.xlu0 %v5599_v58, %s6328_s29 }
 0x207   : > { %2950 = vrot.lane.b32.xlu1 %v7066_v50, %s6328_s29  ;;  %v7202_v50 = vld [vmem:[%s7052_s27 + $0x2] sm:$0xff] }
 0x209   : > { %2954 = vrot.lane.b32.xlu0 %v7072_v52, %s6328_s29  ;;  %v7212_v52 = vld [vmem:[%s7052_s27 + $0x32] sm:$0xff] }
 0x20b   : > { %2958 = vrot.lane.b32.xlu1 %v7069_v51, %s6328_s29  ;;  %v7207_v51 = vld [vmem:[%s7052_s27 + $0x1a] sm:$0xff] }
 0x20d   : > { %2962 = vrot.lane.b32.xlu0 %v7075_v53, %s6328_s29 }
 0x20f   : > { %3430 = vrot.lane.b32.xlu1 %v5593_v37, %s6323_s23 }
 0x211   : > { %3434 = vrot.lane.b32.xlu0 %v5595_v49, %s6323_s23 }
 0x213   : > { %3438 = vrot.lane.b32.xlu1 %v5597_v24, %s6323_s23 }
 0x215   : > { %3442 = vrot.lane.b32.xlu0 %v5599_v58, %s6323_s23 }
 0x217   : > { %2708 = vrot.lane.b32.xlu1 %v7075_v53, %s6323_s23  ;;  %v7227_v53 = vld [vmem:[%s6966_s22 + $0x32] sm:$0xff] }
 0x219   : > { %5102 = vrot.lane.b32.xlu0 %v7202_v50, %s6328_s29 }
 0x21b   : > { %5104 = vrot.lane.b32.xlu1 %v7207_v51, %s6328_s29 }
 0x21d   : > { %5106 = vrot.lane.b32.xlu0 %v7212_v52, %s6328_s29 }
 0x21f   : > { %5108 = vrot.lane.b32.xlu1 %v7217_v27, %s6328_s29 }
 0x221   : > { %3688 = vrot.lane.b32.xlu0 %v7222_v21, %s6328_s29 }
 0x223   : > { %3692 = vrot.lane.b32.xlu1 %v7227_v53, %s6328_s29 }
 0x225   : > { %3696 = vrot.lane.b32.xlu0 %v7232_v62, %s6328_s29 }
 0x227   : > { %3700 = vrot.lane.b32.xlu1 %v7237_v26, %s6328_s29  ;;  %v1961_v7 = vpop.permute.xlu0 %1960  ;;  %v7243_v34 = vpop.permute.xlu1 %1962 }
 0x233   : > { %v5808_v60 = vpop.permute.xlu0 %5807 }
 0x234   : > { %v5810_v47 = vunpack.i.h.bf16 %v5808_v60  ;;  %v5809_v9 = vunpack.i.l.bf16 %v5808_v60 }
 0x235   : > { %v5823_v15 = vpop.permute.xlu1 %5822 }
 0x236   : > { %v5825_v44 = vunpack.i.h.bf16 %v5823_v15  ;;  %v5824_v45 = vunpack.i.l.bf16 %v5823_v15 }
 0x237   : > { %v5813_v8 = vpop.permute.xlu0 %5812 }
 0x238   : > { %v5815_v43 = vunpack.i.h.bf16 %v5813_v8  ;;  %v5814_v18 = vunpack.i.l.bf16 %v5813_v8 }
 0x239   : > { %v5828_v12 = vpop.permute.xlu1 %5827 }
 0x23a   : > { %v5830_v56 = vunpack.i.h.bf16 %v5828_v12  ;;  %v5829_v10 = vunpack.i.l.bf16 %v5828_v12 }
 0x23b   : > { %v5818_v19 = vpop.permute.xlu0 %5817 }
 0x23c   : > { %v1923_v1 = vsel %vm1911_vm2, %v7038_v28, %v5830_v56  ;;  %v1920_v42 = vsel %vm1911_vm2, %v7035_v22, %v5829_v10  ;;  %v5820_v16 = vunpack.i.h.bf16 %v5818_v19  ;;  %v5819_v41 = vunpack.i.l.bf16 %v5818_v19 }
 0x23d   : > { %v5833_v2 = vpop.permute.xlu1 %5832  ;;  %v1921_v3 = vsel %vm1913_vm3, %v1920_v42, %v5814_v18  ;;  %v1924_v48 = vsel %vm1913_vm3, %v1923_v1, %v5815_v43  ;;  %v3233_v10 = vcombine.high %v7246_v20, %v7252_v30  ;;  %v3249_v19 = vcombine.high %v7249_v57, %v7255_v31 }
 0x23e   : > { %v1917_v35 = vsel %vm1911_vm2, %v7030_v33, %v5820_v16  ;;  %v1912_v28 = vsel %vm1911_vm2, %v7027_v32, %v5819_v41  ;;  %v5835_v17 = vunpack.i.h.bf16 %v5833_v2  ;;  %v5834_v46 = vunpack.i.l.bf16 %v5833_v2 }
 0x23f   : > { %v1918_v22 = vsel %vm1913_vm3, %v1917_v35, %v5810_v47  ;;  %v1914_v36 = vsel %vm1913_vm3, %v1912_v28, %v5809_v9  ;;  %v1965_v54 = vpop.permute.xlu0 %1964 }
 0x240   : > { %v1919_v37 = vsel %vm1915_vm4, %v1918_v22, %v5825_v44  ;;  %v1916_v49 = vsel %vm1915_vm4, %v1914_v36, %v5824_v45  ;;  %v1922_v33 = vsel %vm1915_vm4, %v1921_v3, %v5834_v46  ;;  %v1925_v24 = vsel %vm1915_vm4, %v1924_v48, %v5835_v17 }
 0x241   : > { %v5657_v32 = vpack.c.bf16 %v1919_v37, %v1916_v49  ;;  %v5658_v58 = vpack.c.bf16 %v1925_v24, %v1922_v33  ;;  %v1967_v60 = vpop.permute.xlu1 %1966  ;;  %v7288_v44 = vrot.slane %v3233_v10, %v7010_v6  ;;  %v7291_v45 = vrot.slane %v3249_v19, %v7010_v6 }
 0x243   : > { %1942 = vst [vmem:[#allocation4 + $0x30] sm:$0x33] %v5657_v32  ;;  %1943 = vst [vmem:[#allocation4] sm:$0x33] %v5658_v58  ;;  %v1969_v15 = vpop.permute.xlu0 %1968 }
 0x244   : > { %v1984_v8 = vcombine.low %v1961_v7, %v1969_v15  ;;  %v1985_v47 = vcombine.high %v1961_v7, %v1969_v15  ;;  %v7313_v15 = vcombine.high %v7291_v45, %v8728_v59 }
 0x245   : > { %v1971_v9 = vpop.permute.xlu1 %1970 }
 0x246   : > { %v1992_v61 = vrot.slane %v1984_v8, %v7004_v38  ;;  %v2052_v11 = vcombine.low %v7243_v34, %v1971_v9  ;;  %v1999_v43 = vrot.slane %v1985_v47, %v7004_v38  ;;  %v2053_v18 = vcombine.high %v7243_v34, %v1971_v9 }
 0x247   : > { %v1973_v12 = vpop.permute.xlu0 %1972 }
 0x248   : > { %v2000_v13 = vcombine.low %v1965_v54, %v1973_v12  ;;  %v2001_v14 = vcombine.high %v1965_v54, %v1973_v12  ;;  %v2060_v34 = vrot.slane %v2052_v11, %v7004_v38  ;;  %v2067_v28 = vrot.slane %v2053_v18, %v7004_v38 }
 0x249   : > { %v1975_v56 = vpop.permute.xlu1 %1974 }
 0x24a   : > { %v2008_v7 = vrot.slane %v2000_v13, %v7004_v38  ;;  %v2015_v1 = vrot.slane %v2001_v14, %v7004_v38  ;;  %v2068_v42 = vcombine.low %v1967_v60, %v1975_v56  ;;  %v2069_v16 = vcombine.high %v1967_v60, %v1975_v56 }
 0x24b   : > { %v2217_v41 = vpop.permute.xlu0 %2216  ;;  %v7308_v60 = vcombine.high %v7288_v44, %v8728_v59 }
 0x24c   : > { %v2017_v2 = vcombine.high %v1992_v61, %v2008_v7  ;;  %v2033_v35 = vcombine.high %v1999_v43, %v2015_v1  ;;  %v2076_v17 = vrot.slane %v2068_v42, %v7004_v38  ;;  %v2083_v46 = vrot.slane %v2069_v16, %v7004_v38 }
 0x24d   : > { %v2219_v22 = vpop.permute.xlu1 %2218  ;;  %v2016_v8 = vcombine.low %v1992_v61, %v2008_v7  ;;  %v2032_v47 = vcombine.low %v1999_v43, %v2015_v1 }
 0x24e   : > { %v2031_v3 = vrot.slane %v2017_v2, %v7010_v6  ;;  %v7301_v48 = vrot.slane %v2033_v35, %v7010_v6  ;;  %v2085_v54 = vcombine.high %v2060_v34, %v2076_v17  ;;  %v2101_v37 = vcombine.high %v2067_v28, %v2083_v46 }
 0x24f   : > { %v2221_v49 = vpop.permute.xlu0 %2220  ;;  %v2084_v11 = vcombine.low %v2060_v34, %v2076_v17  ;;  %v2100_v13 = vcombine.low %v2067_v28, %v2083_v46  ;;  %v7319_v42 = vrot.slane %v2016_v8, %v7010_v6  ;;  %v7322_v16 = vrot.slane %v2032_v47, %v7010_v6 }
 0x250   : > { %v5866_v33 = vpack.i.bf16 %v7301_v48, %v2031_v3  ;;  %v2099_v32 = vrot.slane %v2085_v54, %v7010_v6  ;;  %v2115_v58 = vrot.slane %v2101_v37, %v7010_v6 }
 0x251   : > { %v2223_v24 = vpop.permute.xlu1 %2222  ;;  %8759 = vst [vmem:[#allocation10_spill] sm:$0xff] %v7319_v42  ;;  %8760 = vst [vmem:[#allocation11_spill] sm:$0xff] %v7322_v16  ;;  %v7325_v7 = vrot.slane %v2084_v11, %v7010_v6  ;;  %v7328_v1 = vrot.slane %v2100_v13, %v7010_v6 }
 0x252   : > { %5867 = vrot.lane.b32.xlu1 %v5866_v33, %s6325_s25  ;;  %v5871_v12 = vpack.i.bf16 %v2115_v58, %v2099_v32  ;;  %v2050_v33 = vcombine.high %v7322_v16, %v8728_v59 }
 0x253   : > { %v2225_v9 = vpop.permute.xlu0 %2224 }
 0x254   : > { %v2240_v14 = vcombine.low %v2217_v41, %v2225_v9  ;;  %v2241_v18 = vcombine.high %v2217_v41, %v2225_v9  ;;  %5872 = vrot.lane.b32.xlu0 %v5871_v12, %s6325_s25  ;;  %v7343_v12 = vcombine.high %v2031_v3, %v8728_v59  ;;  %v2117_v3 = vcombine.high %v2099_v32, %v8728_v59 }
 0x255   : > { %v2227_v56 = vpop.permute.xlu1 %2226 }
 0x256   : > { %v2248_v41 = vrot.slane %v2240_v14, %v7004_v38  ;;  %v2255_v34 = vrot.slane %v2241_v18, %v7004_v38  ;;  %v2308_v2 = vcombine.low %v2219_v22, %v2227_v56  ;;  %v2309_v35 = vcombine.high %v2219_v22, %v2227_v56 }
 0x257   : > { %v2229_v19 = vpop.permute.xlu0 %2228  ;;  %v2116_v22 = vcombine.high %v7325_v7, %v8728_v59 }
 0x258   : > { %v2256_v61 = vcombine.low %v2221_v49, %v2229_v19  ;;  %v2257_v43 = vcombine.high %v2221_v49, %v2229_v19  ;;  %v7336_v49 = vcombine.high %v7319_v42, %v8728_v59  ;;  %v2316_v11 = vrot.slane %v2308_v2, %v7004_v38 }
 0x259   : > { %v2231_v28 = vpop.permute.xlu1 %2230 }
 0x25a   : > { %v2264_v17 = vrot.slane %v2256_v61, %v7004_v38  ;;  %v2271_v46 = vrot.slane %v2257_v43, %v7004_v38  ;;  %v2324_v54 = vcombine.low %v2223_v24, %v2231_v28  ;;  %v2325_v37 = vcombine.high %v2223_v24, %v2231_v28 }
 0x25b   : > { %v5838_v8 = vpop.permute.xlu0 %5837  ;;  %v2323_v24 = vrot.slane %v2309_v35, %v7004_v38  ;;  %v2118_v61 = vcombine.high %v7328_v1, %v8728_v59  ;;  %v2119_v35 = vcombine.high %v2115_v58, %v8728_v59  ;;  %v2051_v58 = vcombine.high %v7301_v48, %v8728_v59 }
 0x25c   : > { %v2273_v47 = vcombine.high %v2248_v41, %v2264_v17  ;;  %v2289_v9 = vcombine.high %v2255_v34, %v2271_v46  ;;  %v2332_v13 = vrot.slane %v2324_v54, %v7004_v38  ;;  %v2339_v14 = vrot.slane %v2325_v37, %v7004_v38 }
 0x25d   : > { %v5843_v18 = vpop.permute.xlu1 %5842  ;;  %v2272_v10 = vcombine.low %v2248_v41, %v2264_v17  ;;  %v2288_v37 = vcombine.low %v2255_v34, %v2271_v46  ;;  %v5840_v42 = vunpack.i.h.bf16 %v5838_v8  ;;  %v5839_v16 = vunpack.i.l.bf16 %v5838_v8 }
 0x25e   : > { %v7350_v56 = vrot.slane %v2273_v47, %v7010_v6  ;;  %v7353_v19 = vrot.slane %v2289_v9, %v7010_v6  ;;  %v2340_v43 = vcombine.low %v2316_v11, %v2332_v13  ;;  %v2341_v2 = vcombine.high %v2316_v11, %v2332_v13 }
 0x25f   : > { %v2357_v28 = vcombine.high %v2323_v24, %v2339_v14  ;;  %v5848_v54 = vpop.permute.xlu0 %5847  ;;  %v2356_v36 = vcombine.low %v2323_v24, %v2339_v14  ;;  %v5896_v32 = vpack.i.bf16 %v2118_v61, %v2116_v22  ;;  %v5886_v11 = vpack.i.bf16 %v2050_v33, %v7336_v49 }
 0x260   : > { %v5876_v47 = vpack.i.bf16 %v7353_v19, %v7350_v56  ;;  %v2355_v9 = vrot.slane %v2341_v2, %v7010_v6  ;;  %v7368_v41 = vrot.slane %v2340_v43, %v7010_v6  ;;  %v5901_v17 = vpack.i.bf16 %v2119_v35, %v2117_v3 }
 0x261   : > { %v2371_v29 = vrot.slane %v2357_v28, %v7010_v6  ;;  %v5853_v23 = vpop.permute.xlu1 %5852  ;;  %v5845_v46 = vunpack.i.h.bf16 %v5843_v18  ;;  %v5844_v24 = vunpack.i.l.bf16 %v5843_v18  ;;  %v7371_v13 = vrot.slane %v2356_v36, %v7010_v6 }
 0x262   : > { %5877 = vrot.lane.b32.xlu1 %v5876_v47, %s6325_s25  ;;  %v7374_v8 = vrot.slane %v2272_v10, %v7010_v6  ;;  %v5855_v14 = vunpack.i.h.bf16 %v5853_v23  ;;  %v5854_v22 = vunpack.i.l.bf16 %v5853_v23  ;;  %v7378_v49 = vrot.slane %v2288_v37, %v7010_v6 }
 0x263   : > { %v5881_v34 = vpack.i.bf16 %v2371_v29, %v2355_v9  ;;  %v2651_v33 = vsel %vm1911_vm2, %v7131_v55, %v5840_v42  ;;  %v2648_v18 = vsel %vm1911_vm2, %v7128_v5, %v5839_v16  ;;  %v5850_v61 = vunpack.i.h.bf16 %v5848_v54  ;;  %v5858_v36 = vpop.permute.xlu0 %5857 }
 0x264   : > { %v2372_v10 = vcombine.high %v7368_v41, %v8728_v59  ;;  %v2657_v23 = vsel %vm1911_vm2, %v7149_v40, %v5855_v14  ;;  %v2654_v3 = vsel %vm1911_vm2, %v7146_v39, %v5854_v22  ;;  %v5849_v28 = vunpack.i.l.bf16 %v5848_v54 }
 0x265   : > { %5882 = vrot.lane.b32.xlu0 %v5881_v34, %s6325_s25  ;;  %v5863_v48 = vpop.permute.xlu1 %5862  ;;  %v2649_v55 = vsel %vm1913_vm3, %v2648_v18, %v5844_v24  ;;  %v2652_v5 = vsel %vm1913_vm3, %v2651_v33, %v5845_v46  ;;  %v2374_v42 = vcombine.high %v7371_v13, %v8728_v59  ;;  %v5860_v35 = vunpack.i.h.bf16 %v5858_v36 }
 0x266   : > { %5897 = vrot.lane.b32.xlu1 %v5896_v32, %s6327_s28  ;;  %v5865_v43 = vunpack.i.h.bf16 %v5863_v48  ;;  %v5864_v2 = vunpack.i.l.bf16 %v5863_v48  ;;  %v2653_v16 = vsel %vm1915_vm4, %v2652_v5, %v5850_v61  ;;  %v5859_v37 = vunpack.i.l.bf16 %v5858_v36 }
 0x267   : > { %v5891_v40 = vpack.i.bf16 %v2051_v58, %v7343_v12  ;;  %v2650_v39 = vsel %vm1915_vm4, %v2649_v55, %v5849_v28  ;;  %v2304_v54 = vcombine.high %v7374_v8, %v8728_v59  ;;  %v2658_v32 = vsel %vm1913_vm3, %v2657_v23, %v5860_v35  ;;  %v7409_v58 = vpop.permute.xlu0 %2696  ;;  %v5632_v23 = vld [vmem:[%s7052_s27 + $0x19] sm:$0xff]  ;;  %v5633_v28 = vld [vmem:[%s7052_s27 + $0x31] sm:$0xff] }
 0x268   : > { %v5663_v47 = vpack.c.bf16 %v2653_v16, %v2650_v39  ;;  %v2655_v34 = vsel %vm1913_vm3, %v2654_v3, %v5859_v37  ;;  %v2306_v46 = vcombine.high %v7378_v49, %v8728_v59  ;;  %v2373_v24 = vcombine.high %v2355_v9, %v8728_v59 }
 0x269   : > { %5887 = vrot.lane.b32.xlu0 %v5886_v11, %s6327_s28  ;;  %v2659_v11 = vsel %vm1915_vm4, %v2658_v32, %v5865_v43  ;;  %v2656_v12 = vsel %vm1915_vm4, %v2655_v34, %v5864_v2  ;;  %v2375_v14 = vcombine.high %v2371_v29, %v8728_v59  ;;  %v2305_v18 = vcombine.high %v7350_v56, %v8728_v59  ;;  %v7423_v3 = vpop.permute.xlu1 %2698  ;;  %v5631_v56 = vld [vmem:[%s7052_s27 + $0x1] sm:$0xff]  ;;  %v5634_v43 = vld [vmem:[%s7052_s27 + $0x49] sm:$0xff]  ;;  %v4228_v32 = vld [vmem:[%s7052_s27 + $0x18] sm:$0xff] }
 0x26a   : > { %5902 = vrot.lane.b32.xlu1 %v5901_v17, %s6326_s30  ;;  %v5916_v17 = vpack.i.bf16 %v2374_v42, %v2372_v10  ;;  %v2674_v22 = vrot.slane %v5663_v47, 6  ;;  %v5664_v48 = vpack.c.bf16 %v2659_v11, %v2656_v12  ;;  %v5906_v33 = vpack.i.bf16 %v2306_v46, %v2304_v54 }
 0x26b   : > { %v2307_v61 = vcombine.high %v7353_v19, %v8728_v59  ;;  %v5921_v36 = vpack.i.bf16 %v2375_v14, %v2373_v24  ;;  %v7419_v29 = vpop.permute.xlu0 %2700 }
 0x26c   : > { %2678 = vst [vmem:[#allocation4 + $0x18] sm:$0xcc] %v2674_v22  ;;  %v2675_v9 = vrot.slane %v5664_v48, 6 }
 0x26d   : > { %5892 = vrot.lane.b32.xlu0 %v5891_v40, %s6326_s30  ;;  %v5911_v10 = vpack.i.bf16 %v2307_v61, %v2305_v18  ;;  %v7432_v2 = vpop.permute.xlu1 %2702  ;;  %v4230_v61 = vld [vmem:[%s7052_s27 + $0x48] sm:$0xff] }
 0x26e   : > { %5917 = vrot.lane.b32.xlu1 %v5916_v17, %s6327_s28  ;;  %2679 = vst [vmem:[#allocation4 + $0x10] sm:$0xcc] %v2675_v9  ;;  %v4227_v9 = vld [vmem:[%s7052_s27] sm:$0xff] }
 0x26f   : > { %v7429_v19 = vpop.permute.xlu0 %2704 }
 0x271   : > { %5907 = vrot.lane.b32.xlu0 %v5906_v33, %s6327_s28  ;;  %v3687_v5 = vpop.permute.xlu1 %3686 }
 0x272   : > { %5922 = vrot.lane.b32.xlu1 %v5921_v36, %s6326_s30 }
 0x273   : > { %v3691_v55 = vpop.permute.xlu0 %3690 }
 0x275   : > { %5912 = vrot.lane.b32.xlu0 %v5911_v10, %s6326_s30  ;;  %v3695_v16 = vpop.permute.xlu1 %3694 }
 0x276   : > { %4733 = vrot.lane.b32.xlu1 %v5632_v23, %s6328_s29  ;;  %v3711_v37 = vcombine.high %v3687_v5, %v3695_v16 }
 0x277   : > { %v3699_v42 = vpop.permute.xlu0 %3698 }
 0x278   : > { %v3727_v40 = vcombine.high %v3691_v55, %v3699_v42  ;;  %v3725_v46 = vrot.slane %v3711_v37, %v7004_v38 }
 0x279   : > { %4731 = vrot.lane.b32.xlu0 %v5631_v56, %s6328_s29 }
 0x27a   : > { %4737 = vrot.lane.b32.xlu1 %v5634_v43, %s6328_s29  ;;  %v3741_v11 = vrot.slane %v3727_v40, %v7004_v38 }
 0x27b   : > { %v2955_v35 = vpop.permute.xlu0 %2954 }
 0x27c   : > { %v3758_v10 = vcombine.low %v3725_v46, %v3741_v11 }
 0x27d   : > { %4735 = vrot.lane.b32.xlu0 %v5633_v28, %s6328_s29 }
 0x27e   : > { %4974 = vrot.lane.b32.xlu1 %v7207_v51, %s6323_s23  ;;  %v2951_v51 = vpop.permute.xlu1 %2950  ;;  %v7513_v40 = vrot.slane %v3758_v10, %v7010_v6 }
 0x281   : > { %4972 = vrot.lane.b32.xlu0 %v7202_v50, %s6323_s23  ;;  %v2963_v50 = vpop.permute.xlu0 %2962 }
 0x282   : > { %4978 = vrot.lane.b32.xlu1 %v7217_v27, %s6323_s23  ;;  %v2990_v14 = vcombine.low %v2955_v35, %v2963_v50 }
 0x285   : > { %4976 = vrot.lane.b32.xlu0 %v7212_v52, %s6323_s23  ;;  %v2959_v52 = vpop.permute.xlu1 %2958 }
 0x286   : > { %2956 = vrot.lane.b32.xlu1 %v7096_v25, %s6328_s29  ;;  %v2974_v12 = vcombine.low %v2951_v51, %v2959_v52  ;;  %v2975_v17 = vcombine.high %v2951_v51, %v2959_v52  ;;  %v2720_v51 = vcombine.low %v7409_v58, %v7429_v19 }
 0x289   : > { %2952 = vrot.lane.b32.xlu0 %v7090_v63, %s6328_s29  ;;  %v3435_v63 = vpop.permute.xlu0 %3434  ;;  %v3431_v25 = vpop.permute.xlu1 %3430 }
 0x28a   : > { %2964 = vrot.lane.b32.xlu1 %v7099_v4, %s6328_s29 }
 0x28d   : > { %2960 = vrot.lane.b32.xlu0 %v7093_v0, %s6328_s29  ;;  %v3443_v27 = vpop.permute.xlu0 %3442  ;;  %v3439_v39 = vpop.permute.xlu1 %3438 }
 0x28e   : > { %3436 = vrot.lane.b32.xlu1 %v7227_v53, %s6323_s23  ;;  %v3710_v53 = vcombine.low %v3687_v5, %v3695_v16  ;;  %v3455_v54 = vcombine.high %v3431_v25, %v3439_v39  ;;  %v3471_v47 = vcombine.high %v3435_v63, %v3443_v27 }
 0x290   : > { %v3718_v34 = vrot.slane %v3710_v53, %v7004_v38  ;;  %v7478_v48 = vrot.slane %v3455_v54, %v7004_v38  ;;  %v7486_v18 = vrot.slane %v3471_v47, %v7004_v38 }
 0x291   : > { %3432 = vrot.lane.b32.xlu0 %v7222_v21, %s6323_s23  ;;  %v3726_v21 = vcombine.low %v3691_v55, %v3699_v42  ;;  %v2998_v55 = vrot.slane %v2990_v14, %v7004_v38  ;;  %v4229_v42 = vld [vmem:[%s7052_s27 + $0x30] sm:$0xff] }
 0x292   : > { %3444 = vrot.lane.b32.xlu1 %v7237_v26, %s6323_s23  ;;  %v3454_v26 = vcombine.low %v3431_v25, %v3439_v39  ;;  %v7524_v39 = vpop.permute.xlu0 %5102 }
 0x293   : > { %v3734_v24 = vrot.slane %v3726_v21, %v7004_v38 }
 0x294   : > { %v7475_v22 = vrot.slane %v3454_v26, %v7004_v38  ;;  %v7527_v26 = vrot.slane %v2720_v51, %v7004_v38 }
 0x295   : > { %3440 = vrot.lane.b32.xlu0 %v7232_v62, %s6323_s23  ;;  %v3470_v62 = vcombine.low %v3435_v63, %v3443_v27  ;;  %v3743_v36 = vcombine.high %v3718_v34, %v3734_v24 }
 0x296   : > { %4608 = vrot.lane.b32.xlu1 %v5632_v23, %s6323_s23  ;;  %v3759_v23 = vcombine.high %v3725_v46, %v3741_v11  ;;  %v3776_v11 = vcombine.high %v7513_v40, %v8728_v59  ;;  %v7554_v10 = vpop.permute.xlu0 %5106 }
 0x297   : > { %v7483_v33 = vrot.slane %v3470_v62, %v7004_v38  ;;  %v3757_v25 = vrot.slane %v3743_v36, %v7010_v6 }
 0x298   : > { %v3773_v27 = vrot.slane %v3759_v23, %v7010_v6 }
 0x299   : > { %4606 = vrot.lane.b32.xlu0 %v5631_v56, %s6323_s23  ;;  %v2982_v56 = vrot.slane %v2974_v12, %v7004_v38  ;;  %v3486_v16 = vcombine.low %v7475_v22, %v7483_v33 }
 0x29a   : > { %4612 = vrot.lane.b32.xlu1 %v5634_v43, %s6323_s23  ;;  %v2989_v43 = vrot.slane %v2975_v17, %v7004_v38 }
 0x29b   : > { %v3006_v53 = vcombine.low %v2982_v56, %v2998_v55  ;;  %v3007_v12 = vcombine.high %v2982_v56, %v2998_v55 }
 0x29d   : > { %4610 = vrot.lane.b32.xlu0 %v5633_v28, %s6323_s23  ;;  %v2709_v28 = vpop.permute.xlu1 %2708  ;;  %v7535_v46 = vrot.slane %v3006_v53, %v7010_v6  ;;  %v8768_v53 = vcombine.low %v7246_v20, %v7252_v30 }
 0x29e   : > { %2710 = vrot.lane.b32.xlu1 %v7099_v4, %s6323_s23  ;;  %v2991_v4 = vcombine.high %v2955_v35, %v2963_v50  ;;  %v3502_v35 = vcombine.low %v7478_v48, %v7486_v18  ;;  %v2721_v50 = vcombine.high %v7409_v58, %v7429_v19  ;;  %v2736_v52 = vcombine.low %v7419_v29, %v2709_v28 }
 0x29f   : > { %v2737_v63 = vcombine.high %v7419_v29, %v2709_v28  ;;  %v7516_v58 = vrot.slane %v3486_v16, %v7010_v6  ;;  %8764 = vst [vmem:[#allocation15_spill] sm:$0xff] %v7535_v46  ;;  %v3021_v28 = vrot.slane %v3007_v12, %v7010_v6 }
 0x2a0   : > { %v3005_v5 = vrot.slane %v2991_v4, %v7004_v38  ;;  %v7519_v19 = vrot.slane %v3502_v35, %v7010_v6  ;;  %v7530_v54 = vrot.slane %v2721_v50, %v7004_v38  ;;  %v2744_v62 = vrot.slane %v2736_v52, %v7004_v38 }
 0x2a1   : > { %2706 = vrot.lane.b32.xlu0 %v7093_v0, %s6323_s23  ;;  %v3742_v0 = vcombine.low %v3718_v34, %v3734_v24  ;;  %8762 = vst [vmem:[#allocation13_spill] sm:$0xff] %v7516_v58  ;;  %v7522_v29 = vpop.permute.xlu1 %5104  ;;  %v2751_v47 = vrot.slane %v2737_v63, %v7004_v38  ;;  %v5931_v34 = vpack.i.bf16 %v3773_v27, %v3757_v25  ;;  %v7578_v63 = vpop.permute.xlu0 %3688 }
 0x2a2   : > { %4237 = vrot.lane.b32.xlu1 %v4228_v32, %s6323_s23  ;;  %v3022_v37 = vcombine.low %v2989_v43, %v3005_v5  ;;  %8763 = vst [vmem:[#allocation14_spill] sm:$0xff] %v7519_v19  ;;  %v3023_v17 = vcombine.high %v2989_v43, %v3005_v5  ;;  %v3518_v14 = vcombine.high %v7516_v58, %v8728_v59 }
 0x2a3   : > { %v7510_v21 = vrot.slane %v3742_v0, %v7010_v6  ;;  %v3520_v4 = vcombine.high %v7519_v19, %v8728_v59  ;;  %v2752_v0 = vcombine.low %v7527_v26, %v2744_v62  ;;  %v3503_v35 = vcombine.high %v7478_v48, %v7486_v18 }
 0x2a4   : > { %v3037_v55 = vrot.slane %v3023_v17, %v7010_v6  ;;  %v3775_v18 = vcombine.high %v3757_v25, %v8728_v59 }
 0x2a5   : > { %4235 = vrot.lane.b32.xlu0 %v4227_v9, %s6323_s23  ;;  %8761 = vst [vmem:[#allocation12_spill] sm:$0xff] %v7510_v21  ;;  %v3774_v24 = vcombine.high %v7510_v21, %v8728_v59  ;;  %v7552_v36 = vpop.permute.xlu1 %5108  ;;  %v5941_v43 = vpack.i.bf16 %v3520_v4, %v3518_v14  ;;  %v7565_v5 = vrot.slane %v2752_v0, %v7010_v6  ;;  %v7610_v14 = vpop.permute.xlu0 %3696 }
 0x2a6   : > { %4241 = vrot.lane.b32.xlu1 %v4230_v61, %s6323_s23  ;;  %v5951_v50 = vpack.i.bf16 %v3037_v55, %v3021_v28  ;;  %v3517_v30 = vrot.slane %v3503_v35, %v7010_v6 }
 0x2a7   : > { %v5926_v23 = vpack.i.bf16 %v3776_v11, %v3774_v24  ;;  %8766 = vst [vmem:[#allocation17_spill] sm:$0xff] %v7565_v5  ;;  %v2769_v11 = vcombine.high %v7530_v54, %v2751_v47 }
 0x2a8   : > { %v3521_v35 = vcombine.high %v3517_v30, %v8728_v59 }
 0x2a9   : > { %4239 = vrot.lane.b32.xlu0 %v4229_v42, %s6323_s23  ;;  %v7576_v52 = vpop.permute.xlu1 %3692 }
 0x2aa   : > { %4367 = vrot.lane.b32.xlu1 %v4228_v32, %s6328_s29  ;;  %v7538_v32 = vrot.slane %v3022_v37, %v7010_v6  ;;  %v7584_v37 = vrot.slane %v8768_v53, %v7010_v6 }
 0x2ac   : > { %8765 = vst [vmem:[#allocation16_spill] sm:$0xff] %v7538_v32  ;;  %v3040_v56 = vcombine.high %v7538_v32, %v8728_v59  ;;  %8769 = vst [vmem:[#allocation19_spill] sm:$0xff] %v7584_v37 }
 0x2ad   : > { %4365 = vrot.lane.b32.xlu0 %v4227_v9, %s6328_s29  ;;  %v2768_v9 = vcombine.low %v7530_v54, %v2751_v47  ;;  %v7608_v17 = vpop.permute.xlu1 %3700  ;;  %v3778_v54 = vcombine.low %v7578_v63, %v7610_v14  ;;  %v2783_v47 = vrot.slane %v2769_v11, %v7010_v6  ;;  %v8774_v11 = vpack.i.bf16 %v7313_v15, %v7308_v60 }
 0x2ae   : > { %4371 = vrot.lane.b32.xlu1 %v4230_v61, %s6328_s29  ;;  %v3038_v61 = vcombine.high %v7535_v46, %v8728_v59 }
 0x2af   : > { %v7568_v16 = vrot.slane %v2768_v9, %v7010_v6  ;;  %v3039_v9 = vcombine.high %v3021_v28, %v8728_v59  ;;  %v2787_v53 = vcombine.high %v2783_v47, %v8728_v59 }
 0x2b0   : > { %v5936_v51 = vpack.i.bf16 %v3040_v56, %v3038_v61  ;;  %v5130_v61 = vcombine.low %v7522_v29, %v7552_v36  ;;  %v5114_v56 = vcombine.low %v7524_v39, %v7554_v10 }
 0x2b1   : > { %4369 = vrot.lane.b32.xlu0 %v4229_v42, %s6328_s29  ;;  %8767 = vst [vmem:[#allocation18_spill] sm:$0xff] %v7568_v16  ;;  %v3487_v42 = vcombine.high %v7475_v22, %v7483_v33  ;;  %v8770_v22 = vcombine.low %v7249_v57, %v7255_v31  ;;  %v3777_v33 = vcombine.high %v3773_v27, %v8728_v59 }
 0x2b2   : > { %5932 = vrot.lane.b32.xlu1 %v5931_v34, %s6325_s25  ;;  %v2784_v34 = vcombine.high %v7565_v5, %v8728_v59  ;;  %v2786_v24 = vcombine.high %v7568_v16, %v8728_v59  ;;  %v3264_v57 = vcombine.high %v7584_v37, %v8728_v59  ;;  %v2753_v27 = vcombine.high %v7527_v26, %v2744_v62  ;;  %v6255_v37 = vld [vmem:[%s7052_s27 + $0x19] ss:$48 sps:$4 sm:$0xff]  }
 0x2b3   : > { %v7590_v48 = vrot.slane %v8770_v22, %v7010_v6  ;;  %v3501_v20 = vrot.slane %v3487_v42, %v7010_v6  ;;  %v5946_v25 = vpack.i.bf16 %v3777_v33, %v3775_v18  ;;  %v3794_v26 = vcombine.low %v7576_v52, %v7608_v17 }
 0x2b4   : > { %v5961_v12 = vpack.i.bf16 %v2786_v24, %v2784_v34  ;;  %v2767_v62 = vrot.slane %v2753_v27, %v7010_v6  ;;  %v7641_v22 = vrot.slane %v5130_v61, %v7004_v38  ;;  %v7644_v33 = vrot.slane %v5114_v56, %v7004_v38 }
 0x2b5   : > { %5927 = vrot.lane.b32.xlu0 %v5926_v23, %s6327_s28  ;;  %8771 = vst [vmem:[#allocation20_spill] sm:$0xff] %v7590_v48  ;;  %v3266_v31 = vcombine.high %v7590_v48, %v8728_v59  ;;  %v5956_v4 = vpack.i.bf16 %v3517_v30, %v3501_v20  ;;  %v3041_v23 = vcombine.high %v3037_v55, %v8728_v59 }
 0x2b6   : > { %5942 = vrot.lane.b32.xlu1 %v5941_v43, %s6327_s28  ;;  %v7629_v28 = vrot.slane %v3794_v26, %v7004_v38  ;;  %v7632_v55 = vrot.slane %v3778_v54, %v7004_v38  ;;  %v3519_v42 = vcombine.high %v3501_v20, %v8728_v59  ;;  %v5147_v20 = vcombine.high %v7644_v33, %v7641_v22 }
 0x2b7   : > { %v5971_v0 = vpack.i.bf16 %v3266_v31, %v3264_v57  ;;  %v5966_v43 = vpack.i.bf16 %v3041_v23, %v3039_v9  ;;  %v8773_v57 = vpack.i.bf16 %v7291_v45, %v7288_v44 }
 0x2b8   : > { %v3810_v18 = vcombine.low %v7632_v55, %v7629_v28  ;;  %v5976_v34 = vpack.i.bf16 %v3521_v35, %v3519_v42  ;;  %v8775_v35 = vld [vmem:[#allocation11_spill] sm:$0xff] }
 0x2b9   : > { %5937 = vrot.lane.b32.xlu0 %v5936_v51, %s6327_s28  ;;  %v5981_v51 = vpack.i.bf16 %v2783_v47, %v2767_v62 }
 0x2ba   : > { %5952 = vrot.lane.b32.xlu1 %v5951_v50, %s6325_s25  ;;  %v2785_v50 = vcombine.high %v2767_v62, %v8728_v59  ;;  %v7653_v30 = vrot.slane %v3810_v18, %v7010_v6 }
 0x2bc   : > { %v5991_v24 = vpack.i.bf16 %v2787_v53, %v2785_v50  ;;  %8772 = vst [vmem:[#allocation21_spill] sm:$0xff] %v7653_v30  ;;  %v3842_v31 = vcombine.high %v7653_v30, %v8728_v59  ;;  %v8776_v50 = vld [vmem:[#allocation10_spill] sm:$0xff] }
 0x2bd   : > { %5947 = vrot.lane.b32.xlu0 %v5946_v25, %s6326_s30  ;;  %v7662_v25 = vrot.slane %v5147_v20, %v7010_v6 }
 0x2be   : > { %5962 = vrot.lane.b32.xlu1 %v5961_v12, %s6327_s28 }
 0x2c1   : > { %5957 = vrot.lane.b32.xlu0 %v5956_v4, %s6325_s25  ;;  %v6006_v4 = vpack.i.bf16 %v3842_v31, %v7662_v25 }
 0x2c2   : > { %5972 = vrot.lane.b32.xlu1 %v5971_v0, %s6327_s28 }
 0x2c4   : > { %v5868_v27 = vpop.permute.xlu1 %5867 }
 0x2c5   : > { %5967 = vrot.lane.b32.xlu0 %v5966_v43, %s6326_s30 }
 0x2c6   : > { %5982 = vrot.lane.b32.xlu1 %v5981_v51, %s6325_s25  ;;  %v5873_v12 = vpop.permute.xlu0 %5872 }
 0x2c7   : > { %v5875_v60 = vunpack.i.h.bf16 %v5873_v12  ;;  %v5874_v15 = vunpack.i.l.bf16 %v5873_v12 }
 0x2c9   : > { %5977 = vrot.lane.b32.xlu0 %v5976_v34, %s6326_s30  ;;  %v5870_v34 = vunpack.i.h.bf16 %v5868_v27 }
 0x2ca   : > { %5992 = vrot.lane.b32.xlu1 %v5991_v24, %s6326_s30 }
 0x2cd   : > { %5987 = vrot.lane.b32.xlu0 %v8773_v57, %s6325_s25 }
 0x2d1   : > { %5997 = vrot.lane.b32.xlu0 %v8774_v11, %s6326_s30 }
 0x2d4   : > { %v7669_v0 = vpop.permute.xlu1 %5877 }
 0x2d5   : > { %6007 = vrot.lane.b32.xlu0 %v6006_v4, %s6327_s28 }
 0x2d7   : > { %v5883_v44 = vpop.permute.xlu0 %5882 }
 0x2d8   : > { %v5898_v45 = vpop.permute.xlu1 %5897 }
 0x2d9   : > { %v5900_v9 = vunpack.i.h.bf16 %v5898_v45  ;;  %v5899_v23 = vunpack.i.l.bf16 %v5898_v45 }
 0x2db   : > { %v2177_v26 = vsel %vm1911_vm2, %v7328_v1, %v5900_v9  ;;  %v2174_v54 = vsel %vm1911_vm2, %v7325_v7, %v5899_v23  ;;  %v5888_v62 = vpop.permute.xlu0 %5887  ;;  %v5869_v7 = vunpack.i.l.bf16 %v5868_v27 }
 0x2dc   : > { %v5890_v47 = vunpack.i.h.bf16 %v5888_v62  ;;  %v5889_v61 = vunpack.i.l.bf16 %v5888_v62  ;;  %v5903_v56 = vpop.permute.xlu1 %5902  ;;  %v2175_v18 = vsel %vm1913_vm3, %v2174_v54, %v5874_v15  ;;  %v2178_v1 = vsel %vm1913_vm3, %v2177_v26, %v5875_v60 }
 0x2dd   : > { %v5905_v43 = vunpack.i.h.bf16 %v5903_v56  ;;  %v5904_v42 = vunpack.i.l.bf16 %v5903_v56  ;;  %v5885_v56 = vunpack.i.h.bf16 %v5883_v44 }
 0x2de   : > { %v2171_v51 = vsel %vm1911_vm2, %v8775_v35, %v5890_v47  ;;  %v2168_v53 = vsel %vm1911_vm2, %v8776_v50, %v5889_v61 }
 0x2df   : > { %v2176_v24 = vsel %vm1915_vm4, %v2175_v18, %v5904_v42  ;;  %v2179_v20 = vsel %vm1915_vm4, %v2178_v1, %v5905_v43  ;;  %v5893_v57 = vpop.permute.xlu0 %5892  ;;  %v2169_v45 = vsel %vm1913_vm3, %v2168_v53, %v5869_v7  ;;  %v2172_v9 = vsel %vm1913_vm3, %v2171_v51, %v5870_v34 }
 0x2e0   : > { %v5660_v31 = vpack.c.bf16 %v2179_v20, %v2176_v24  ;;  %v5895_v11 = vunpack.i.h.bf16 %v5893_v57  ;;  %v5894_v12 = vunpack.i.l.bf16 %v5893_v57  ;;  %v5918_v4 = vpop.permute.xlu1 %5917  ;;  %v5884_v43 = vunpack.i.l.bf16 %v5883_v44 }
 0x2e1   : > { %v5920_v23 = vunpack.i.h.bf16 %v5918_v4  ;;  %v5919_v62 = vunpack.i.l.bf16 %v5918_v4  ;;  %v5880_v7 = vunpack.i.h.bf16 %v7669_v0  ;;  %v5879_v44 = vunpack.i.l.bf16 %v7669_v0 }
 0x2e2   : > { %v2195_v54 = vrot.slane %v5660_v31, 6  ;;  %v2170_v26 = vsel %vm1915_vm4, %v2169_v45, %v5894_v12  ;;  %v2173_v27 = vsel %vm1915_vm4, %v2172_v9, %v5895_v11 }
 0x2e3   : > { %v5659_v60 = vpack.c.bf16 %v2173_v27, %v2170_v26  ;;  %v2433_v15 = vsel %vm1911_vm2, %v7371_v13, %v5920_v23  ;;  %v2430_v47 = vsel %vm1911_vm2, %v7368_v41, %v5919_v62  ;;  %v5908_v61 = vpop.permute.xlu0 %5907  ;;  %v5146_v27 = vcombine.low %v7644_v33, %v7641_v22 }
 0x2e4   : > { %2199 = vst [vmem:[#allocation4] sm:$0xcc] %v2195_v54  ;;  %v5910_v42 = vunpack.i.h.bf16 %v5908_v61  ;;  %v5909_v35 = vunpack.i.l.bf16 %v5908_v61  ;;  %v5923_v51 = vpop.permute.xlu1 %5922  ;;  %v2431_v13 = vsel %vm1913_vm3, %v2430_v47, %v5884_v43  ;;  %v2434_v41 = vsel %vm1913_vm3, %v2433_v15, %v5885_v56 }
 0x2e5   : > { %v2194_v50 = vrot.slane %v5659_v60, 6  ;;  %v5925_v53 = vunpack.i.h.bf16 %v5923_v51  ;;  %v5924_v18 = vunpack.i.l.bf16 %v5923_v51  ;;  %v7727_v43 = vrot.slane %v5146_v27, %v7010_v6 }
 0x2e6   : > { %v2427_v1 = vsel %vm1911_vm2, %v7378_v49, %v5910_v42  ;;  %v2424_v34 = vsel %vm1911_vm2, %v7374_v8, %v5909_v35 }
 0x2e7   : > { %2198 = vst [vmem:[#allocation4 + $0x30] sm:$0xcc] %v2194_v50  ;;  %v2432_v24 = vsel %vm1915_vm4, %v2431_v13, %v5924_v18  ;;  %v2435_v20 = vsel %vm1915_vm4, %v2434_v41, %v5925_v53  ;;  %v5913_v57 = vpop.permute.xlu0 %5912  ;;  %v2425_v8 = vsel %vm1913_vm3, %v2424_v34, %v5879_v44  ;;  %v2428_v4 = vsel %vm1913_vm3, %v2427_v1, %v5880_v7  ;;  %v6246_v50 = vld [vmem:[%s6966_s22 + $0xe] ss:$80 sps:$4 sm:$0xff]   ;;  %v6247_v53 = vld [vmem:[%s6966_s22 + $0x36] ss:$80 sps:$4 sm:$0xff]  }
 0x2e8   : > { %v5662_v31 = vpack.c.bf16 %v2435_v20, %v2432_v24  ;;  %v5915_v11 = vunpack.i.h.bf16 %v5913_v57  ;;  %v5914_v49 = vunpack.i.l.bf16 %v5913_v57  ;;  %v7702_v12 = vpop.permute.xlu1 %4733  ;;  %8777 = vst [vmem:[#allocation11_spill] sm:$0xff] %v7727_v43  ;;  %v5131_v18 = vcombine.high %v7522_v29, %v7552_v36 }
 0x2e9   : > { %v5115_v1 = vcombine.high %v7524_v39, %v7554_v10  ;;  %v3795_v34 = vcombine.high %v7576_v52, %v7608_v17  ;;  %v3779_v13 = vcombine.high %v7578_v63, %v7610_v14  ;;  %v5179_v24 = vcombine.high %v7662_v25, %v8728_v59 }
 0x2ea   : > { %2453 = vst [vmem:[#allocation4 + $0x10] sm:$0x33] %v5662_v31  ;;  %v2426_v45 = vsel %vm1915_vm4, %v2425_v8, %v5914_v49  ;;  %v2429_v0 = vsel %vm1915_vm4, %v2428_v4, %v5915_v11  ;;  %v5178_v39 = vcombine.high %v7727_v43, %v8728_v59  ;;  %v3283_v52 = vrot.slane %v6246_v50, %v7004_v38  ;;  %v6244_v50 = vld [vmem:[%s6966_s22 + $0x32] ss:$80 sps:$4 sm:$0xff]  }
 0x2eb   : > { %v5661_v9 = vpack.c.bf16 %v2429_v0, %v2426_v45  ;;  %v7708_v23 = vpop.permute.xlu0 %4731  ;;  %v3299_v63 = vrot.slane %v6247_v53, %v7004_v38  ;;  %v5145_v17 = vrot.slane %v5131_v18, %v7004_v38  ;;  %v5129_v14 = vrot.slane %v5115_v1, %v7004_v38 }
 0x2ec   : > { %v7710_v62 = vpop.permute.xlu1 %4737  ;;  %v3809_v25 = vrot.slane %v3795_v34, %v7004_v38  ;;  %v3793_v57 = vrot.slane %v3779_v13, %v7004_v38  ;;  %v3811_v34 = vcombine.high %v7632_v55, %v7629_v28 }
 0x2ed   : > { %2452 = vst [vmem:[#allocation4 + $0x18] sm:$0x33] %v5661_v9  ;;  %v4759_v54 = vcombine.low %v7702_v12, %v7710_v62  ;;  %v3317_v49 = vcombine.high %v3283_v52, %v3299_v63  ;;  %v5162_v8 = vcombine.low %v5129_v14, %v5145_v17 }
 0x2ee   : > { %v3826_v45 = vcombine.low %v3793_v57, %v3809_v25  ;;  %v3827_v13 = vcombine.high %v3793_v57, %v3809_v25 }
 0x2ef   : > { %v7714_v26 = vpop.permute.xlu0 %4735  ;;  %v4767_v47 = vrot.slane %v4759_v54, %v7004_v38 }
 0x2f0   : > { %v4743_v60 = vcombine.low %v7708_v23, %v7714_v26  ;;  %v7720_v15 = vpop.permute.xlu1 %4974  ;;  %v7790_v53 = vrot.slane %v3826_v45, %v7010_v6  ;;  %v3825_v45 = vrot.slane %v3811_v34, %v7010_v6 }
 0x2f2   : > { %v4751_v61 = vrot.slane %v4743_v60, %v7004_v38  ;;  %v7782_v60 = vrot.slane %v3317_v49, %v7010_v6  ;;  %8780 = vst [vmem:[#allocation23_spill] sm:$0xff] %v7790_v53 }
 0x2f3   : > { %v7724_v56 = vpop.permute.xlu0 %4972 }
 0x2f4   : > { %v4775_v42 = vcombine.low %v4751_v61, %v4767_v47  ;;  %v4776_v35 = vcombine.high %v4751_v61, %v4767_v47  ;;  %v7729_v51 = vpop.permute.xlu1 %4978  ;;  %8779 = vst [vmem:[#allocation22_spill] sm:$0xff] %v7782_v60  ;;  %v5163_v47 = vcombine.high %v5129_v14, %v5145_v17  ;;  %v6238_v17 = vld [vmem:[%s7052_s27 + $0x2] ss:$48 sps:$4 sm:$0xff]   ;;  %v7814_v14 = vrot.slane %v6244_v50, %v7004_v38 }
 0x2f5   : > { %v5000_v49 = vcombine.low %v7720_v15, %v7729_v51 }
 0x2f6   : > { %v7732_v22 = vrot.slane %v4775_v42, %v7010_v6  ;;  %v7735_v33 = vrot.slane %v4776_v35, %v7010_v6  ;;  %v7785_v42 = vrot.slane %v5162_v8, %v7010_v6  ;;  %v6242_v35 = vld [vmem:[%s6966_s22 + $0xa] ss:$80 sps:$4 sm:$0xff]   ;;  %v7808_v28 = vrot.slane %v5163_v47, %v7010_v6 }
 0x2f7   : > { %v7747_v41 = vpop.permute.xlu0 %4976  ;;  %v7811_v55 = vrot.slane %v6242_v35, %v7004_v38  ;;  %v6240_v47 = vld [vmem:[%s7052_s27 + $0x1a] ss:$48 sps:$4 sm:$0xff]  }
 0x2f8   : > { %8778 = vst [vmem:[#allocation10_spill] sm:$0xff] %v7732_v22  ;;  %v7749_v7 = vpop.permute.xlu1 %2956  ;;  %v4808_v44 = vcombine.high %v7735_v33, %v8728_v59  ;;  %v4807_v29 = vcombine.high %v7732_v22, %v8728_v59 }
 0x2fa   : > { %v6016_v36 = vpack.i.bf16 %v4808_v44, %v5179_v24  ;;  %v6001_v10 = vpack.i.bf16 %v4807_v29, %v5178_v39  ;;  %v3316_v29 = vcombine.low %v3283_v52, %v3299_v63  ;;  %v7800_v39 = vcombine.high %v7782_v60, %v8728_v59 }
 0x2fb   : > { %v7763_v20 = vpop.permute.xlu0 %2952  ;;  %v4984_v52 = vcombine.low %v7724_v56, %v7747_v41 }
 0x2fc   : > { %6017 = vrot.lane.b32.xlu0 %v6016_v36, %s6329_s17  ;;  %v7768_v31 = vpop.permute.xlu1 %2964  ;;  %6002 = vrot.lane.b32.xlu1 %v6001_v10, %s6330_s16  ;;  %8782 = vst [vmem:[#allocation25_spill] sm:$0xff] %v7800_v39  ;;  %v7804_v10 = vcombine.high %v7785_v42, %v8728_v59 }
 0x2fd   : > { %v3058_v11 = vcombine.low %v7749_v7, %v7768_v31 }
 0x2ff   : > { %v7773_v4 = vpop.permute.xlu0 %2960  ;;  %v3066_v54 = vrot.slane %v3058_v11, %v7004_v38  ;;  %v3844_v11 = vcombine.high %v7790_v53, %v8728_v59  ;;  %v6251_v53 = vld [vmem:[%s7052_s27 + $0x18] ss:$48 sps:$4 sm:$0xff]  }
 0x300   : > { %v3042_v0 = vcombine.low %v7763_v20, %v7773_v4  ;;  %v7777_v9 = vpop.permute.xlu1 %3436 }
 0x302   : > { %v3050_v27 = vrot.slane %v3042_v0, %v7004_v38  ;;  %v3841_v0 = vrot.slane %v3827_v13, %v7010_v6  ;;  %v3043_v13 = vcombine.high %v7763_v20, %v7773_v4  ;;  %v7867_v20 = vrot.slane %v5000_v49, %v7004_v38 }
 0x303   : > { %v3433_v61 = vpop.permute.xlu0 %3432 }
 0x304   : > { %v3074_v18 = vcombine.low %v3050_v27, %v3066_v54  ;;  %v3445_v1 = vpop.permute.xlu1 %3444  ;;  %v3075_v8 = vcombine.high %v3050_v27, %v3066_v54  ;;  %v3300_v54 = vcombine.low %v7811_v55, %v7814_v14  ;;  %v7843_v27 = vrot.slane %v3316_v29, %v7010_v6 }
 0x305   : > { %v3539_v24 = vcombine.high %v7777_v9, %v3445_v1  ;;  %v3059_v29 = vcombine.high %v7749_v7, %v7768_v31  ;;  %v8785_v31 = vmov 0.0  }
 0x306   : > { %v7795_v44 = vrot.slane %v3074_v18, %v7010_v6  ;;  %8783 = vst [vmem:[#allocation26_spill] sm:$0xff] %v7843_v27  ;;  %v7886_v49 = vrot.slane %v3300_v54, %v7010_v6  ;;  %v4744_v54 = vcombine.high %v7708_v23, %v7714_v26 }
 0x307   : > { %v3441_v36 = vpop.permute.xlu0 %3440  ;;  %v7830_v35 = vrot.slane %v3539_v24, %v7004_v38  ;;  %v3538_v24 = vcombine.low %v7777_v9, %v3445_v1  ;;  %v7880_v1 = vcombine.high %v3825_v45, %v8785_v31  ;;  %v7908_v34 = vrot.slane %v3059_v29, %v7004_v38 }
 0x308   : > { %8781 = vst [vmem:[#allocation24_spill] sm:$0xff] %v7795_v44  ;;  %v3523_v63 = vcombine.high %v3433_v61, %v3441_v36  ;;  %v7818_v25 = vpop.permute.xlu1 %4608  ;;  %v3106_v57 = vcombine.high %v7795_v44, %v8728_v59  ;;  %v3522_v50 = vcombine.low %v3433_v61, %v3441_v36  ;;  %v7838_v59 = vrot.slane %v6238_v17, %v7004_v38  ;;  %v6249_v44 = vld [vmem:[%s7052_s27] ss:$48 sps:$4 sm:$0xff]  }
 0x309   : > { %v7848_v61 = vrot.slane %v4984_v52, %v7004_v38  ;;  %v6021_v52 = vpack.i.bf16 %v3841_v0, %v3825_v45  ;;  %8786 = vst [vmem:[#allocation28_spill] sm:$0xff] %v7886_v49  ;;  %v7934_v60 = vcombine.high %v7886_v49, %v8785_v31 }
 0x30a   : > { %v7833_v18 = vrot.slane %v3523_v63, %v7004_v38  ;;  %v6011_v22 = vpack.i.bf16 %v3106_v57, %v3844_v11  ;;  %v7861_v63 = vrot.slane %v3075_v8, %v7010_v6  ;;  %v7864_v57 = vrot.slane %v6240_v47, %v7004_v38 }
 0x30b   : > { %v7835_v43 = vpop.permute.xlu0 %4606  ;;  %v7870_v4 = vrot.slane %v3522_v50, %v7004_v38  ;;  %v7883_v11 = vcombine.high %v3841_v0, %v8785_v31  ;;  %v7890_v8 = vcombine.high %v7808_v28, %v8785_v31  ;;  %v5016_v47 = vcombine.low %v7848_v61, %v7867_v20  ;;  %8787 = vst [vmem:[#allocation29_spill] sm:$0xff] %v7934_v60 }
 0x30c   : > { %v3570_v36 = vcombine.low %v7833_v18, %v7830_v35  ;;  %6012 = vrot.lane.b32.xlu1 %v6011_v22, %s6327_s28  ;;  %v7856_v17 = vpop.permute.xlu1 %4612  ;;  %v7895_v50 = vrot.slane %v3043_v13, %v7004_v38  ;;  %v6031_v13 = vpack.i.bf16 %v7861_v63, %v7785_v42 }
 0x30d   : > { %v4634_v9 = vcombine.low %v7818_v25, %v7856_v17  ;;  %v7945_v48 = vrot.slane %v5016_v47, %v7010_v6  ;;  %v7966_v47 = vrot.slane %v4744_v54, %v7004_v38  ;;  %v7987_v54 = vrot.slane %v6255_v37, %v7004_v38 }
 0x30e   : > { %v7873_v22 = vrot.slane %v3570_v36, %v7010_v6  ;;  %v7898_v36 = vrot.slane %v3538_v24, %v7004_v38  ;;  %v4891_v24 = vcombine.low %v7838_v59, %v7864_v57  ;;  %v3090_v5 = vcombine.low %v7895_v50, %v7908_v34 }
 0x30f   : > { %v7877_v7 = vpop.permute.xlu0 %4610  ;;  %v7919_v30 = vrot.slane %v4634_v9, %v7004_v38  ;;  %v7938_v9 = vcombine.high %v7843_v27, %v8785_v31  ;;  %8788 = vst [vmem:[#allocation30_spill] sm:$0xff] %v7945_v48  ;;  %v5017_v37 = vcombine.high %v7848_v61, %v7867_v20  ;;  %v6259_v61 = vld [vmem:[%s7052_s27 + $0x1e] ss:$48 sps:$4 sm:$0xff]  }
 0x310   : > { %8784 = vst [vmem:[#allocation27_spill] sm:$0xff] %v7873_v22  ;;  %v4618_v45 = vcombine.low %v7835_v43, %v7877_v7  ;;  %6022 = vrot.lane.b32.xlu1 %v6021_v52, %s6325_s25  ;;  %v7903_v0 = vpop.permute.xlu1 %2710  ;;  %v3554_v52 = vcombine.low %v7870_v4, %v7898_v36  ;;  %v3588_v26 = vcombine.high %v7873_v22, %v8785_v31 }
 0x311   : > { %v2804_v42 = vcombine.low %v7432_v2, %v7903_v0  ;;  %v4760_v22 = vcombine.high %v7702_v12, %v7710_v62  ;;  %v7957_v16 = vrot.slane %v4891_v24, %v7010_v6  ;;  %v7960_v12 = vrot.slane %v6249_v44, %v7004_v38 }
 0x312   : > { %v7922_v23 = vrot.slane %v4618_v45, %v7004_v38  ;;  %v6253_v45 = vld [vmem:[%s7052_s27 + $0x1] ss:$48 sps:$4 sm:$0xff]   ;;  %v7963_v62 = vrot.slane %v6251_v53, %v7004_v38  ;;  %v7969_v58 = vrot.slane %v3554_v52, %v7010_v6  ;;  %v6041_v19 = vpack.i.bf16 %v7735_v33, %v3588_v26  ;;  %v6258_v52 = vld [vmem:[%s7052_s27 + $0x6] ss:$48 sps:$4 sm:$0xff]  }
 0x313   : > { %v7928_v29 = vpop.permute.xlu0 %2706  ;;  %8789 = vst [vmem:[#allocation31_spill] sm:$0xff] %v7957_v16  ;;  %8790 = vst [vmem:[#allocation32_spill] sm:$0xff] %v7960_v12  ;;  %v7976_v24 = vrot.slane %v2804_v42, %v7004_v38  ;;  %v7984_v53 = vrot.slane %v6253_v45, %v7004_v38  ;;  %v7992_v33 = vrot.slane %v3090_v5, %v7010_v6 }
 0x314   : > { %v4650_v39 = vcombine.low %v7922_v23, %v7919_v30  ;;  %6032 = vrot.lane.b32.xlu1 %v6031_v13, %s6325_s25  ;;  %v7952_v49 = vpop.permute.xlu1 %4237  ;;  %v2788_v27 = vcombine.low %v7423_v3, %v7928_v29  ;;  %8791 = vst [vmem:[#allocation33_spill] sm:$0xff] %v7963_v62  ;;  %8792 = vst [vmem:[#allocation34_spill] sm:$0xff] %v7969_v58  ;;  %v5048_v42 = vcombine.high %v7945_v48, %v8785_v31 }
 0x315   : > { %8794 = vst [vmem:[#allocation36_spill] sm:$0xff] %v7984_v53  ;;  %8795 = vst [vmem:[#allocation37_spill] sm:$0xff] %v7992_v33  ;;  %v8007_v5 = vcombine.high %v7957_v16, %v8785_v31  ;;  %v3586_v48 = vcombine.high %v7969_v58, %v8785_v31  ;;  %v3555_v20 = vcombine.high %v7870_v4, %v7898_v36 }
 0x316   : > { %v7972_v13 = vrot.slane %v4650_v39, %v7010_v6  ;;  %v7979_v44 = vrot.slane %v2788_v27, %v7004_v38  ;;  %v4774_v39 = vrot.slane %v4760_v22, %v7004_v38  ;;  %v8027_v21 = vrot.slane %v6258_v52, %v7004_v38 }
 0x317   : > { %v7981_v46 = vpop.permute.xlu0 %4235  ;;  %v3108_v36 = vcombine.high %v7992_v33, %v8785_v31  ;;  %v8042_v58 = vrot.slane %v5017_v37, %v7010_v6  ;;  %v2789_v52 = vcombine.high %v7423_v3, %v7928_v29  ;;  %v2805_v3 = vcombine.high %v7432_v2, %v7903_v0 }
 0x318   : > { %8793 = vst [vmem:[#allocation35_spill] sm:$0xff] %v7972_v13  ;;  %6042 = vrot.lane.b32.xlu1 %v6041_v19, %s6327_s28  ;;  %v7995_v26 = vpop.permute.xlu1 %4241  ;;  %v4682_v27 = vcombine.high %v7972_v13, %v8785_v31  ;;  %v2820_v45 = vcombine.low %v7979_v44, %v7976_v24  ;;  %v4791_v22 = vcombine.low %v7966_v47, %v4774_v39 }
 0x319   : > { %v4263_v13 = vcombine.low %v7952_v49, %v7995_v26  ;;  %v4150_v19 = vcombine.low %v7960_v12, %v7963_v62  ;;  %v6036_v62 = vpack.i.bf16 %v3586_v48, %v3108_v36  ;;  %v4792_v37 = vcombine.high %v7966_v47, %v4774_v39 }
 0x31a   : > { %v6026_v32 = vpack.i.bf16 %v4682_v27, %v5048_v42  ;;  %v8020_v60 = vrot.slane %v2820_v45, %v7010_v6  ;;  %v4520_v45 = vcombine.low %v7984_v53, %v7987_v54  ;;  %v8051_v12 = vrot.slane %v4791_v22, %v7010_v6 }
 0x31b   : > { %v8022_v16 = vpop.permute.xlu0 %4239  ;;  %v8030_v27 = vrot.slane %v4263_v13, %v7004_v38  ;;  %v3091_v13 = vcombine.high %v7895_v50, %v7908_v34  ;;  %v8057_v53 = vrot.slane %v6259_v61, %v7004_v38  ;;  %v3569_v34 = vrot.slane %v3555_v20, %v7010_v6 }
 0x31c   : > { %v4247_v42 = vcombine.low %v7981_v46, %v8022_v16  ;;  %6027 = vrot.lane.b32.xlu0 %v6026_v32, %s6330_s16  ;;  %v8035_v4 = vpop.permute.xlu1 %4367  ;;  %v2852_v32 = vcombine.high %v8020_v60, %v8785_v31  ;;  %v4985_v22 = vcombine.high %v7724_v56, %v7747_v41  ;;  %v8074_v47 = vrot.slane %v4150_v19, %v7010_v6 }
 0x31d   : > { %v8077_v39 = vrot.slane %v4520_v45, %v7010_v6  ;;  %v3105_v2 = vrot.slane %v3091_v13, %v7010_v6  ;;  %v3571_v0 = vcombine.high %v7833_v18, %v7830_v35  ;;  %v4619_v56 = vcombine.high %v7835_v43, %v7877_v7 }
 0x31e   : > { %v8054_v33 = vrot.slane %v4247_v42, %v7004_v38  ;;  %v6051_v29 = vpack.i.bf16 %v2852_v32, %v8042_v58  ;;  %v8085_v41 = vrot.slane %v2789_v52, %v7004_v38  ;;  %v4651_v19 = vcombine.high %v7922_v23, %v7919_v30 }
 0x31f   : > { %v8063_v50 = vpop.permute.xlu0 %4365  ;;  %8796 = vst [vmem:[#allocation38_spill] sm:$0xff] %v8077_v39  ;;  %v4809_v35 = vcombine.high %v8051_v12, %v8785_v31  ;;  %v8098_v18 = vrot.slane %v4792_v37, %v7010_v6  ;;  %v4635_v43 = vcombine.high %v7818_v25, %v7856_v17  ;;  %v2819_v7 = vrot.slane %v2805_v3, %v7004_v38 }
 0x320   : > { %v4279_v48 = vcombine.low %v8054_v33, %v8030_v27  ;;  %6037 = vrot.lane.b32.xlu0 %v6036_v62, %s6327_s28  ;;  %v8071_v61 = vpop.permute.xlu1 %4371  ;;  %6052 = vrot.lane.b32.xlu1 %v6051_v29, %s6327_s28  ;;  %v5001_v62 = vcombine.high %v7720_v15, %v7729_v51  ;;  %v6061_v15 = vpack.i.bf16 %v3569_v34, %v3105_v2 }
 0x321   : > { %v8106_v51 = vrot.slane %v4985_v22, %v7004_v38  ;;  %v8797_v30 = vpack.i.bf16 %v7883_v11, %v7880_v1  ;;  %v8118_v25 = vcombine.high %v8074_v47, %v8785_v31  ;;  %v8122_v17 = vcombine.high %v8077_v39, %v8785_v31 }
 0x322   : > { %v8093_v20 = vrot.slane %v4279_v48, %v7010_v6  ;;  %v3585_v45 = vrot.slane %v3571_v0, %v7010_v6  ;;  %v8126_v13 = vrot.slane %v4619_v56, %v7004_v38  ;;  %v2836_v1 = vcombine.low %v8085_v41, %v2819_v7 }
 0x323   : > { %v8103_v42 = vpop.permute.xlu0 %4369  ;;  %v8798_v11 = vcombine.high %v7811_v55, %v7814_v14  ;;  %v8137_v32 = vrot.slane %v5001_v62, %v7004_v38  ;;  %v8140_v37 = vrot.slane %v4651_v19, %v7010_v6  ;;  %v6056_v3 = vpack.i.bf16 %v4809_v35, %v7804_v10 }
 0x324   : > { %6047 = vrot.lane.b32.xlu0 %v8797_v30, %s6326_s30  ;;  %v8112_v23 = vpop.permute.xlu1 %5932  ;;  %v4311_v36 = vcombine.high %v8093_v20, %v8785_v31  ;;  %6062 = vrot.lane.b32.xlu1 %v6061_v15, %s6325_s25  ;;  %v8145_v22 = vrot.slane %v4635_v43, %v7004_v38  ;;  %v2821_v48 = vcombine.high %v7979_v44, %v7976_v24 }
 0x325   : > { %v8134_v52 = vrot.slane %v8798_v11, %v7010_v6  ;;  %v3107_v55 = vcombine.high %v7861_v63, %v8785_v31  ;;  %v8153_v14 = vcombine.high %v8098_v18, %v8785_v31  ;;  %v5032_v56 = vcombine.low %v8106_v51, %v8137_v32 }
 0x326   : > { %v6071_v29 = vpack.i.bf16 %v4311_v36, %v8007_v5  ;;  %v8799_v24 = vcombine.high %v7838_v59, %v7864_v57  ;;  %v4666_v62 = vcombine.low %v8126_v13, %v8145_v22  ;;  %v8173_v19 = vrot.slane %v2836_v1, %v7010_v6 }
 0x327   : > { %v5928_v0 = vpop.permute.xlu0 %5927  ;;  %v6066_v35 = vpack.i.bf16 %v8051_v12, %v3585_v45  ;;  %v3587_v59 = vcombine.high %v3569_v34, %v8785_v31  ;;  %v2837_v57 = vcombine.high %v8085_v41, %v2819_v7  ;;  %v4683_v30 = vcombine.high %v8140_v37, %v8785_v31  ;;  %v8808_v12 = vld [vmem:[#allocation20_spill] sm:$0xff] }
 0x328   : > { %6057 = vrot.lane.b32.xlu0 %v6056_v3, %s6331_s10  ;;  %v8158_v10 = vpop.permute.xlu1 %5942  ;;  %v8164_v44 = vrot.slane %v8799_v24, %v7010_v6  ;;  %6072 = vrot.lane.b32.xlu1 %v6071_v29, %s6330_s16  ;;  %v5930_v43 = vunpack.i.h.bf16 %v5928_v0  ;;  %v5929_v15 = vunpack.i.l.bf16 %v5928_v0  ;;  %v8182_v36 = vrot.slane %v2821_v48, %v7010_v6 }
 0x329   : > { %v6081_v1 = vpack.i.bf16 %v3107_v55, %v7808_v28  ;;  %v3109_v3 = vcombine.high %v3105_v2, %v8785_v31  ;;  %v8189_v34 = vrot.slane %v5032_v56, %v7010_v6  ;;  %v4264_v41 = vcombine.high %v7952_v49, %v7995_v26  ;;  %v8800_v55 = vld [vmem:[#allocation12_spill] sm:$0xff] }
 0x32a   : > { %v5049_v29 = vcombine.high %v8042_v58, %v8785_v31  ;;  %v3589_v28 = vcombine.high %v3585_v45, %v8785_v31  ;;  %v8200_v2 = vrot.slane %v4666_v62, %v7010_v6  ;;  %v2854_v0 = vcombine.high %v8173_v19, %v8785_v31 }
 0x32b   : > { %v5938_v11 = vpop.permute.xlu0 %5937  ;;  %v6091_v48 = vpack.i.bf16 %v3587_v59, %v3109_v3  ;;  %v6096_v49 = vpack.i.bf16 %v8140_v37, %v7938_v9  ;;  %v8208_v26 = vrot.slane %v2837_v57, %v7010_v6  ;;  %v3897_v58 = vsel %vm1911_vm2, %v7513_v40, %v5930_v43 }
 0x32c   : > { %6067 = vrot.lane.b32.xlu0 %v6066_v35, %s6325_s25  ;;  %v8194_v7 = vpop.permute.xlu1 %5952  ;;  %6082 = vrot.lane.b32.xlu1 %v6081_v1, %s6326_s30  ;;  %v3894_v45 = vsel %vm1911_vm2, %v8800_v55, %v5929_v15  ;;  %v6076_v56 = vpack.i.bf16 %v4683_v30, %v5049_v29  ;;  %v4280_v24 = vcombine.high %v8054_v33, %v8030_v27  ;;  %v5935_v62 = vunpack.i.h.bf16 %v8112_v23 }
 0x32d   : > { %v5934_v35 = vunpack.i.l.bf16 %v8112_v23  ;;  %v2853_v9 = vcombine.high %v8182_v36, %v8785_v31  ;;  %v8221_v37 = vrot.slane %v4264_v41, %v7004_v38  ;;  %v4248_v40 = vcombine.high %v7981_v46, %v8022_v16  ;;  %v8801_v23 = vld [vmem:[#allocation29_spill] sm:$0xff] }
 0x32e   : > { %v3898_v27 = vsel %vm1913_vm3, %v3897_v58, %v5935_v62  ;;  %v6086_v30 = vpack.i.bf16 %v8801_v23, %v2854_v0  ;;  %v6111_v1 = vpack.i.bf16 %v8182_v36, %v8189_v34  ;;  %v5940_v3 = vunpack.i.h.bf16 %v5938_v11 }
 0x32f   : > { %v5948_v59 = vpop.permute.xlu0 %5947  ;;  %v3895_v33 = vsel %vm1913_vm3, %v3894_v45, %v5934_v35  ;;  %v5939_v41 = vunpack.i.l.bf16 %v5938_v11  ;;  %v8235_v29 = vrot.slane %v4280_v24, %v7010_v6  ;;  %v5945_v55 = vunpack.i.h.bf16 %v8158_v10 }
 0x330   : > { %v5950_v57 = vunpack.i.h.bf16 %v5948_v59  ;;  %v5949_v43 = vunpack.i.l.bf16 %v5948_v59  ;;  %6077 = vrot.lane.b32.xlu0 %v6076_v56, %s6329_s17  ;;  %v5963_v15 = vpop.permute.xlu1 %5962  ;;  %6092 = vrot.lane.b32.xlu1 %v6091_v48, %s6326_s30  ;;  %v6101_v56 = vpack.i.bf16 %v2853_v9, %v3589_v28  ;;  %v8239_v48 = vrot.slane %v4248_v40, %v7004_v38  ;;  %v8802_v9 = vld [vmem:[#allocation16_spill] sm:$0xff] }
 0x331   : > { %v5944_v0 = vunpack.i.l.bf16 %v8158_v10  ;;  %v6121_v11 = vpack.i.bf16 %v8134_v52, %v8208_v26  ;;  %v8247_v24 = vcombine.high %v8200_v2, %v8785_v31  ;;  %v5955_v28 = vunpack.i.h.bf16 %v8194_v7 }
 0x332   : > { %v3896_v46 = vsel %vm1915_vm4, %v3895_v33, %v5949_v43  ;;  %v3899_v16 = vsel %vm1915_vm4, %v3898_v27, %v5950_v57  ;;  %v5954_v35 = vunpack.i.l.bf16 %v8194_v7  ;;  %v5965_v10 = vunpack.i.h.bf16 %v5963_v15  ;;  %v8803_v57 = vld [vmem:[#allocation15_spill] sm:$0xff]  ;;  %v8804_v27 = vld [vmem:[#allocation14_spill] sm:$0xff] }
 0x333   : > { %v5673_v45 = vpack.c.bf16 %v3899_v16, %v3896_v46  ;;  %v5958_v58 = vpop.permute.xlu0 %5957  ;;  %v4377_v59 = vcombine.low %v8063_v50, %v8103_v42  ;;  %v3161_v40 = vsel %vm1911_vm2, %v8802_v9, %v5940_v3  ;;  %v3158_v43 = vsel %vm1911_vm2, %v8803_v57, %v5939_v41  ;;  %v8807_v57 = vld [vmem:[#allocation17_spill] sm:$0xff] }
 0x334   : > { %6087 = vrot.lane.b32.xlu0 %v6086_v30, %s6327_s28  ;;  %v5973_v36 = vpop.permute.xlu1 %5972  ;;  %6102 = vrot.lane.b32.xlu1 %v6101_v56, %s6326_s30  ;;  %v5964_v33 = vunpack.i.l.bf16 %v5963_v15  ;;  %v3641_v23 = vsel %vm1911_vm2, %v8804_v27, %v5945_v55  ;;  %v5960_v30 = vunpack.i.h.bf16 %v5958_v58  ;;  %v5959_v46 = vunpack.i.l.bf16 %v5958_v58  ;;  %v8806_v55 = vld [vmem:[#allocation18_spill] sm:$0xff] }
 0x335   : > { %3922 = vst [vmem:[#allocation4 + $0x40] sm:$0x33] %v5673_v45  ;;  %v6106_v16 = vpack.i.bf16 %v8235_v29, %v8164_v44  ;;  %v8805_v45 = vld [vmem:[#allocation13_spill] sm:$0xff]  ;;  %v5975_v5 = vunpack.i.h.bf16 %v5973_v36  ;;  %v3159_v15 = vsel %vm1913_vm3, %v3158_v43, %v5954_v35  ;;  %v3162_v41 = vsel %vm1913_vm3, %v3161_v40, %v5955_v28 }
 0x336   : > { %v3638_v56 = vsel %vm1911_vm2, %v8805_v45, %v5944_v0  ;;  %v2907_v58 = vsel %vm1911_vm2, %v8806_v55, %v5965_v10  ;;  %v2904_v27 = vsel %vm1911_vm2, %v8807_v57, %v5964_v33  ;;  %v5974_v43 = vunpack.i.l.bf16 %v5973_v36 }
 0x337   : > { %v5968_v7 = vpop.permute.xlu0 %5967  ;;  %v3639_v35 = vsel %vm1913_vm3, %v3638_v56, %v5959_v46  ;;  %v3387_v10 = vsel %vm1911_vm2, %v8808_v12, %v5975_v5 }
 0x338   : > { %v5970_v63 = vunpack.i.h.bf16 %v5968_v7  ;;  %v5969_v62 = vunpack.i.l.bf16 %v5968_v7  ;;  %6097 = vrot.lane.b32.xlu0 %v6096_v49, %s6327_s28  ;;  %v5983_v3 = vpop.permute.xlu1 %5982  ;;  %6112 = vrot.lane.b32.xlu1 %v6111_v1, %s6325_s25  ;;  %v3642_v49 = vsel %vm1913_vm3, %v3641_v23, %v5960_v30 }
 0x339   : > { %v5984_v9 = vunpack.i.l.bf16 %v5983_v3  ;;  %v5985_v45 = vunpack.i.h.bf16 %v5983_v3  ;;  %v8809_v3 = vld [vmem:[#allocation19_spill] sm:$0xff] }
 0x33a   : > { %v3160_v0 = vsel %vm1915_vm4, %v3159_v15, %v5969_v62  ;;  %v3163_v7 = vsel %vm1915_vm4, %v3162_v41, %v5970_v63  ;;  %v3384_v15 = vsel %vm1911_vm2, %v8809_v3, %v5974_v43  ;;  %v8812_v43 = vpack.i.bf16 %v8118_v25, %v8122_v17  ;;  %v8818_v3 = vld [vmem:[#allocation25_spill] sm:$0xff] }
 0x33b   : > { %v5667_v28 = vpack.c.bf16 %v3163_v7, %v3160_v0  ;;  %v5978_v40 = vpop.permute.xlu0 %5977  ;;  %v2905_v1 = vsel %vm1913_vm3, %v2904_v27, %v5984_v9  ;;  %v2908_v36 = vsel %vm1913_vm3, %v2907_v58, %v5985_v45  ;;  %v8811_v7 = vcombine.low %v8035_v4, %v8071_v61 }
 0x33c   : > { %v5980_v55 = vunpack.i.h.bf16 %v5978_v40  ;;  %v5979_v39 = vunpack.i.l.bf16 %v5978_v40  ;;  %6107 = vrot.lane.b32.xlu0 %v6106_v16, %s6327_s28  ;;  %v5993_v62 = vpop.permute.xlu1 %5992  ;;  %v3933_v33 = vld [vmem:[#allocation4 + $0x40] sm:$0x33]  ;;  %6122 = vrot.lane.b32.xlu1 %v6121_v11, %s6325_s25  ;;  %v4312_v40 = vcombine.high %v8235_v29, %v8785_v31  ;;  %v4295_v25 = vcombine.low %v8239_v48, %v8221_v37 }
 0x33d   : > { %v3184_v63 = vrot.slane %v5667_v28, 6  ;;  %v5995_v23 = vunpack.i.h.bf16 %v5993_v62  ;;  %v5994_v30 = vunpack.i.l.bf16 %v5993_v62  ;;  %v5612_v46 = vcombine.high %v3933_v33, %v3933_v33  ;;  %v8814_v29 = vld [vmem:[#allocation33_spill] sm:$0xff] }
 0x33e   : > { %v3640_v56 = vsel %vm1915_vm4, %v3639_v35, %v5979_v39  ;;  %v3643_v5 = vsel %vm1915_vm4, %v3642_v49, %v5980_v55  ;;  %v5611_v12 = vcombine.low %v3933_v33, %v3933_v33  ;;  %v8810_v39 = vpack.i.bf16 %v8153_v14, %v7890_v8  ;;  %v8813_v14 = vld [vmem:[#allocation22_spill] sm:$0xff] }
 0x33f   : > { %3188 = vst [vmem:[#allocation4 + $0x48] sm:$0xcc] %v3184_v63  ;;  %v5671_v16 = vpack.c.bf16 %v3643_v5, %v3640_v56  ;;  %v2906_v41 = vsel %vm1915_vm4, %v2905_v1, %v5994_v30  ;;  %v2909_v9 = vsel %vm1915_vm4, %v2908_v36, %v5995_v23  ;;  %v5988_v11 = vpop.permute.xlu0 %5987  ;;  %5615 = vmatprep.subr.msk.bf16.mxu0 %vm3989_vm5, %v5612_v46 }
 0x340   : > { %v5665_v57 = vpack.c.bf16 %v2909_v9, %v2906_v41  ;;  %v5990_v27 = vunpack.i.h.bf16 %v5988_v11  ;;  %v5989_v58 = vunpack.i.l.bf16 %v5988_v11  ;;  %6117 = vrot.lane.b32.xlu0 %v8810_v39, %s6332_s18  ;;  %v3991_v0 = vsel %vm3989_vm5, %v5611_v12, 0  ;;  %6132 = vrot.lane.b32.xlu1 %v8812_v43, %s6330_s16  ;;  %v6263_v9 = vld [vmem:[%s7052_s27 + $0x4] ss:$48 sps:$4 sm:$0xff]  }
 0x341   : > { %v8300_v45 = vrot.slane %v8811_v7, %v7004_v38  ;;  %v8303_v49 = vrot.slane %v4377_v59, %v7004_v38  ;;  %v3664_v35 = vrot.slane %v5671_v16, 6  ;;  %4013 = vmatpush1.bf16.msra.mxu0 %v3991_v0  ;;  %v5050_v8 = vcombine.high %v8189_v34, %v8785_v31 }
 0x342   : > { %2932 = vst [vmem:[#allocation4 + $0x48] sm:$0x33] %v5665_v57  ;;  %v6126_v28 = vpack.i.bf16 %v8200_v2, %v8813_v14  ;;  %v4924_v59 = vcombine.high %v8164_v44, %v8785_v31  ;;  %v3333_v1 = vcombine.high %v8134_v52, %v8785_v31  ;;  %v3388_v17 = vsel %vm1913_vm3, %v3387_v10, %v5990_v27  ;;  %v8815_v44 = vld [vmem:[#allocation32_spill] sm:$0xff]  ;;  %v6264_v57 = vld [vmem:[%s7052_s27 + $0x1c] ss:$48 sps:$4 sm:$0xff]  }
 0x343   : > { %3668 = vst [vmem:[#allocation4 + $0x8] sm:$0xcc] %v3664_v35  ;;  %v3385_v34 = vsel %vm1913_vm3, %v3384_v15, %v5989_v58  ;;  %v5998_v55 = vpop.permute.xlu0 %5997  ;;  %v6141_v2 = vpack.i.bf16 %v8247_v24, %v5050_v8  ;;  %v4151_v63 = vcombine.high %v8815_v44, %v8814_v29  ;;  %v8816_v52 = vld [vmem:[#allocation36_spill] sm:$0xff]  ;;  %v4409_v30 = vcombine.low %v8303_v49, %v8300_v45  ;;  %v6266_v58 = vld [vmem:[%s7052_s27 + $0x1d] ss:$48 sps:$4 sm:$0xff]  }
 0x344   : > { %v6000_v62 = vunpack.i.h.bf16 %v5998_v55  ;;  %v5999_v33 = vunpack.i.l.bf16 %v5998_v55  ;;  %6127 = vrot.lane.b32.xlu0 %v6126_v28, %s6325_s25  ;;  %v4521_v23 = vcombine.high %v8816_v52, %v7987_v54  ;;  %v2855_v10 = vcombine.high %v8208_v26, %v8785_v31  ;;  %v6265_v27 = vld [vmem:[%s7052_s27 + $0x5] ss:$48 sps:$4 sm:$0xff]  }
 0x345   : > { %6142 = vrot.lane.b32.xlu1 %v6141_v2, %s6331_s10  ;;  %v8817_v24 = vcombine.low %v8027_v21, %v8057_v53  ;;  %v6136_v5 = vpack.i.bf16 %v4312_v40, %v4924_v59  ;;  %v6333_v54 = vmov 0   ;;  %v4303_v12 = vrot.slane %v4295_v25, %v7010_v6 }
 0x346   : > { %v3386_v36 = vsel %vm1915_vm4, %v3385_v34, %v5999_v33  ;;  %v3389_v56 = vsel %vm1915_vm4, %v3388_v17, %v6000_v62  ;;  %4034 = vmatprep.mubr.bf16.mxu0 %v6333_v54  ;;  %4075 = vmatprep.mubr.bf16.mxu1 %v6333_v54  ;;  %v6151_v15 = vpack.i.bf16 %v8098_v18, %v8818_v3 }
 0x347   : > { %v4915_v46 = vrot.slane %v8817_v24, %v7010_v6  ;;  %v5669_v26 = vpack.c.bf16 %v3389_v56, %v3386_v36  ;;  %6216 = vset.pattern.permute.xlu1 %v6333_v54  ;;  %6217 = vset.pattern.permute.xlu0 %v6333_v54  ;;  %v4165_v16 = vrot.slane %v4151_v63, %v7010_v6  ;;  %v8409_v56 = vld [vmem:[%s8713_s1] sm:$0x7] }
 0x348   : > { %6137 = vrot.lane.b32.xlu0 %v6136_v5, %s6329_s17  ;;  %v4535_v41 = vrot.slane %v4521_v23, %v7010_v6  ;;  %v8348_v11 = vrot.slane %v4409_v30, %v7010_v6  ;;  %v4667_v18 = vcombine.high %v8126_v13, %v8145_v22  ;;  %v6146_v39 = vpack.i.bf16 %v3333_v1, %v2855_v10  ;;  %v6260_v23 = vld [vmem:[#allocation4 + $0x34] ss:$-24 sps:$4 sm:$0xff]  }
 0x349   : > { %3412 = vst [vmem:[#allocation4 + $0x8] sm:$0x33] %v5669_v26  ;;  %6152 = vrot.lane.b32.xlu1 %v6151_v15, %s6326_s30  ;;  %v6161_v0 = vpack.i.bf16 %v4303_v12, %v4915_v46  ;;  %v5033_v7 = vcombine.high %v8106_v51, %v8137_v32  ;;  %v8360_v43 = vrot.slane %v6263_v9, %v7004_v38  ;;  %v3929_v59 = vld [vmem:[#allocation4 + $0x48] sm:$0xff] }
 0x34a   : > { %v6156_v35 = vpack.i.bf16 %v4165_v16, %v4535_v41  ;;  %v4441_v8 = vcombine.high %v8348_v11, %v8785_v31  ;;  %v8366_v14 = vrot.slane %v6264_v57, %v7004_v38  ;;  %v8369_v13 = vrot.slane %v6265_v27, %v7004_v38 }
 0x34b   : > { %v8372_v22 = vrot.slane %v6266_v58, %v7004_v38  ;;  %v4681_v51 = vrot.slane %v4667_v18, %v7010_v6  ;;  %v4313_v32 = vcombine.high %v4303_v12, %v8785_v31  ;;  %v4925_v28 = vcombine.high %v4915_v46, %v8785_v31 }
 0x34c   : > { %6147 = vrot.lane.b32.xlu0 %v6146_v39, %s6326_s30  ;;  %v5047_v40 = vrot.slane %v5033_v7, %v7010_v6  ;;  %v4183_v25 = vcombine.high %v4165_v16, %v8785_v31  ;;  %v4553_v17 = vcombine.high %v4535_v41, %v8785_v31  ;;  %v4166_v2 = vcombine.low %v8360_v43, %v8366_v14 }
 0x34d   : > { %6162 = vrot.lane.b32.xlu1 %v6161_v0, %s6325_s25  ;;  %v4536_v62 = vcombine.low %v8369_v13, %v8372_v22  ;;  %v4908_v29 = vcombine.high %v8027_v21, %v8057_v53  ;;  %v4296_v44 = vcombine.high %v8239_v48, %v8221_v37  ;;  %v4410_v63 = vcombine.high %v8303_v49, %v8300_v45  ;;  %v6262_v53 = vld [vmem:[#allocation4 + $0x30] ss:$-24 sps:$4 sm:$0xff]  }
 0x34e   : > { %v6166_v33 = vpack.i.bf16 %v4681_v51, %v5047_v40  ;;  %v6176_v52 = vpack.i.bf16 %v4313_v32, %v4925_v28  ;;  %v6171_v30 = vpack.i.bf16 %v4183_v25, %v4553_v17  ;;  %v4174_v10 = vrot.slane %v4166_v2, %v7010_v6  ;;  %v5293_v28 = vld [vmem:[%s8718_s6] sm:$0x3] }
 0x34f   : > { %v4544_v21 = vrot.slane %v4536_v62, %v7010_v6  ;;  %v4685_v37 = vcombine.high %v4681_v51, %v8785_v31  ;;  %v4922_v48 = vrot.slane %v4908_v29, %v7010_v6  ;;  %v4310_v45 = vrot.slane %v4296_v44, %v7010_v6  ;;  %v4094_v51 = vld [vmem:[%s8716_s4] sm:$0x3f] }
 0x350   : > { %6157 = vrot.lane.b32.xlu0 %v6156_v35, %s6327_s28  ;;  %v3931_v1 = vld [vmem:[#allocation4 + $0x8] sm:$0xff]  ;;  %v4394_v49 = vcombine.high %v8035_v4, %v8071_v61  ;;  %v4378_v24 = vcombine.high %v8063_v50, %v8103_v42  ;;  %v4424_v46 = vrot.slane %v4410_v63, %v7010_v6  ;;  %v5051_v36 = vcombine.high %v5047_v40, %v8785_v31 }
 0x351   : > { %4446 = vrot.lane.b32.xlu1 %v4441_v8, %s6330_s16  ;;  %v5608_v34 = vcombine.high %v3929_v59, %v3931_v1  ;;  %v5607_v55 = vcombine.low %v3929_v59, %v3931_v1  ;;  %v4184_v4 = vcombine.high %v4174_v10, %v8785_v31  ;;  %v4554_v61 = vcombine.high %v4544_v21, %v8785_v31  ;;  %v8461_v1 = vpop.permute.xlu0 %6007 }
 0x352   : > { %v6181_v50 = vpack.i.bf16 %v4685_v37, %v5051_v36  ;;  %v4408_v42 = vrot.slane %v4394_v49, %v7004_v38  ;;  %v4392_v5 = vrot.slane %v4378_v24, %v7004_v38  ;;  %v6191_v54 = vpack.i.bf16 %v4310_v45, %v4922_v48 }
 0x353   : > { %4014 = vmatprep.subr.bf16.mxu0 %v5608_v34  ;;  %v6186_v12 = vpack.i.bf16 %v4174_v10, %v4544_v21  ;;  %v6196_v26 = vpack.i.bf16 %v4184_v4, %v4554_v61  ;;  %v4167_v15 = vcombine.high %v8360_v43, %v8366_v14  ;;  %v4537_v16 = vcombine.high %v8369_v13, %v8372_v22  ;;  %v4084_v22 = vld [vmem:[%s8715_s3] sm:$0x3f]  ;;  %v8820_v10 = vld [vmem:[#allocation23_spill] sm:$0xff] }
 0x354   : > { %6167 = vrot.lane.b32.xlu0 %v6166_v33, %s6326_s30  ;;  %4015 = vmatpush1.bf16.msra.mxu0 %v5607_v55  ;;  %v4425_v3 = vcombine.low %v4392_v5, %v4408_v42  ;;  %v4442_v38 = vcombine.high %v4424_v46, %v8785_v31  ;;  %v4314_v41 = vcombine.high %v4310_v45, %v8785_v31  ;;  %v6010_v62 = vunpack.i.h.bf16 %v8461_v1 }
 0x355   : > { %6177 = vrot.lane.b32.xlu1 %v6176_v52, %s6331_s10  ;;  %4016 = vmatprep.subr.bf16.mxu0 %v6260_v23  ;;  %v4926_v9 = vcombine.high %v4922_v48, %v8785_v31  ;;  %v4181_v27 = vrot.slane %v4167_v15, %v7010_v6  ;;  %v4551_v58 = vrot.slane %v4537_v16, %v7010_v6  ;;  %v8819_v23 = vld [vmem:[#allocation21_spill] sm:$0xff]  ;;  %v8821_v16 = vld [vmem:[#allocation24_spill] sm:$0xff] }
 0x356   : > { %v4433_v57 = vrot.slane %v4425_v3, %v7010_v6  ;;  %v4426_v39 = vcombine.high %v4392_v5, %v4408_v42 }
 0x357   : > { %v6201_v18 = vpack.i.bf16 %v4314_v41, %v4926_v9  ;;  %v6206_v7 = vpack.i.bf16 %v4181_v27, %v4551_v58  ;;  %v4185_v35 = vcombine.high %v4181_v27, %v8785_v31  ;;  %v4555_v43 = vcombine.high %v4551_v58, %v8785_v31  ;;  %v8822_v58 = vld [vmem:[#allocation37_spill] sm:$0xff] }
 0x358   : > { %6172 = vrot.lane.b32.xlu0 %v6171_v30, %s6329_s17  ;;  %4017 = vmatpush1.bf16.msra.mxu0 %v6262_v53  ;;  %v4443_v0 = vcombine.high %v4433_v57, %v8785_v31  ;;  %v4440_v8 = vrot.slane %v4426_v39, %v7010_v6  ;;  %v5286_v6 = vld [vmem:[%s8717_s5] sm:$0x3]  ;;  %v3900_v30 = vsel %vm1911_vm2, %v8819_v23, %v6010_v62  ;;  %v8823_v62 = vld [vmem:[#allocation27_spill] sm:$0xff] }
 0x359   : > { %4450 = vrot.lane.b32.xlu1 %v4424_v46, %s6327_s28  ;;  %5715 = vmatprep.subr.bf16.mxu0 %v8785_v31  ;;  %v6211_v14 = vpack.i.bf16 %v4185_v35, %v4555_v43 }
 0x35a   : > { %v4444_v13 = vcombine.high %v4440_v8, %v8785_v31 }
 0x35b   : > { %5616 = vmatmul.mubr.msk.bf16.vlgmr.msra.gmra.mxu0 %vm3985_vm6, %v8409_v56 }
 0x35c   : > { %6182 = vrot.lane.b32.xlu0 %v6181_v50, %s6332_s18  ;;  %5721 = vmatprep.mubr.msk.bf16.mxu0 %vm6334_vm7, %v8785_v31 }
 0x35d   : > { %6192 = vrot.lane.b32.xlu1 %v6191_v54, %s6326_s30 }
 0x360   : > { %6187 = vrot.lane.b32.xlu0 %v6186_v12, %s6325_s25 }
 0x361   : > { %6197 = vrot.lane.b32.xlu1 %v6196_v26, %s6331_s10 }
 0x364   : > { %4454 = vrot.lane.b32.xlu0 %v4442_v38, %s6329_s17 }
 0x365   : > { %4458 = vrot.lane.b32.xlu1 %v4433_v57, %s6325_s25 }
 0x368   : > { %6202 = vrot.lane.b32.xlu0 %v6201_v18, %s6332_s18 }
 0x369   : > { %4462 = vrot.lane.b32.xlu1 %v4443_v0, %s6331_s10 }
 0x36c   : > { %6207 = vrot.lane.b32.xlu0 %v6206_v7, %s6326_s30 }
 0x36d   : > { %4466 = vrot.lane.b32.xlu1 %v4440_v8, %s6326_s30 }
 0x36e   : > { %v8456_v32 = vpop.permute.xlu1 %6002  ;;  %v8465_v17 = vpop.permute.xlu0 %6017 }
 0x370   : > { %6212 = vrot.lane.b32.xlu0 %v6211_v14, %s6332_s18 }
 0x371   : > { %4087 = vperm.xlu1 %6216, %v4084_v22  }
 0x374   : > { %4470 = vrot.lane.b32.xlu0 %v4444_v13, %s6332_s18 }
 0x375   : > { %4097 = vperm.xlu1 %6216, %v4094_v51  }
 0x378   : > { %5289 = vperm.xlu0 %6217, %v5286_v6  }
 0x379   : > { %5296 = vperm.xlu1 %6216, %v5293_v28  }
 0x37e   : > { %v6013_v40 = vpop.permute.xlu1 %6012 }
 0x37f   : > { %v6014_v33 = vunpack.i.l.bf16 %v6013_v40  ;;  %v6015_v42 = vunpack.i.h.bf16 %v6013_v40  ;;  %v6004_v40 = vunpack.i.l.bf16 %v8456_v32 }
 0x381   : > { %v3903_v21 = vsel %vm1911_vm2, %v8820_v10, %v6014_v33  ;;  %v3164_v38 = vsel %vm1911_vm2, %v8821_v16, %v6015_v42 }
 0x382   : > { %v6023_v59 = vpop.permute.xlu1 %6022 }
 0x383   : > { %v6025_v44 = vunpack.i.h.bf16 %v6023_v59  ;;  %v6024_v63 = vunpack.i.l.bf16 %v6023_v59 }
 0x385   : > { %v3901_v45 = vsel %vm1913_vm3, %v3900_v30, %v6024_v63  ;;  %v3904_v49 = vsel %vm1913_vm3, %v3903_v21, %v6025_v44  ;;  %v8824_v44 = vld [vmem:[#allocation34_spill] sm:$0xff] }
 0x386   : > { %v8463_v25 = vpop.permute.xlu1 %6032 }
 0x387   : > { %v6035_v12 = vunpack.i.h.bf16 %v8463_v25 }
 0x389   : > { %v3165_v35 = vsel %vm1913_vm3, %v3164_v38, %v6035_v12  ;;  %v6005_v38 = vunpack.i.h.bf16 %v8456_v32 }
 0x38a   : > { %v8469_v55 = vpop.permute.xlu1 %6042 }
 0x38b   : > { %v6044_v41 = vunpack.i.l.bf16 %v8469_v55 }
 0x38d   : > { %v3647_v33 = vsel %vm1911_vm2, %v8823_v62, %v6044_v41 }
 0x38e   : > { %v8467_v34 = vpop.permute.xlu0 %6027 }
 0x392   : > { %v6038_v2 = vpop.permute.xlu0 %6037  ;;  %v8472_v29 = vpop.permute.xlu1 %6052 }
 0x393   : > { %v6039_v54 = vunpack.i.l.bf16 %v6038_v2  ;;  %v6040_v9 = vunpack.i.h.bf16 %v6038_v2 }
 0x395   : > { %v3167_v18 = vsel %vm1911_vm2, %v8822_v58, %v6039_v54  ;;  %v3644_v63 = vsel %vm1911_vm2, %v8824_v44, %v6040_v9  ;;  %v6034_v54 = vunpack.i.l.bf16 %v8463_v25  ;;  %v6045_v9 = vunpack.i.h.bf16 %v8469_v55 }
 0x396   : > { %v6048_v52 = vpop.permute.xlu0 %6047  ;;  %v6063_v53 = vpop.permute.xlu1 %6062 }
 0x397   : > { %v6050_v37 = vunpack.i.h.bf16 %v6048_v52  ;;  %v6049_v48 = vunpack.i.l.bf16 %v6048_v52  ;;  %v6064_v26 = vunpack.i.l.bf16 %v6063_v53  ;;  %v6065_v43 = vunpack.i.h.bf16 %v6063_v53 }
 0x399   : > { %v3905_v24 = vsel %vm1915_vm4, %v3904_v49, %v6050_v37  ;;  %v3902_v46 = vsel %vm1915_vm4, %v3901_v45, %v6049_v48  ;;  %v3168_v8 = vsel %vm1913_vm3, %v3167_v18, %v6064_v26  ;;  %v3645_v23 = vsel %vm1913_vm3, %v3644_v63, %v6065_v43  ;;  %v8825_v48 = vld [vmem:[#allocation11_spill] sm:$0xff] }
 0x39a   : > { %v5674_v36 = vpack.c.bf16 %v3905_v24, %v3902_v46  ;;  %v8482_v4 = vpop.permute.xlu0 %6057  ;;  %v8484_v61 = vpop.permute.xlu1 %6072  ;;  %v5210_v45 = vsel %vm4214_vm8, %v8825_v48, %v6004_v40  ;;  %v6009_v46 = vunpack.i.l.bf16 %v8461_v1  ;;  %v6019_v26 = vunpack.i.l.bf16 %v8465_v17 }
 0x39c   : > { %3923 = vst [vmem:[#allocation4 + $0x38] sm:$0x33] %v5674_v36  ;;  %v5211_v42 = vsel %vm1911_vm2, %v5210_v45, %v6009_v46 }
 0x39d   : > { %v5212_v1 = vsel %vm4217_vm9, %v5211_v42, %v6019_v26 }
 0x39e   : > { %v8486_v50 = vpop.permute.xlu0 %6067  ;;  %v8488_v5 = vpop.permute.xlu1 %6082 }
 0x39f   : > { %v6085_v3 = vunpack.i.h.bf16 %v8488_v5  ;;  %v6069_v14 = vunpack.i.l.bf16 %v8486_v50  ;;  %v6084_v41 = vunpack.i.l.bf16 %v8488_v5 }
 0x3a1   : > { %v3166_v13 = vsel %vm1915_vm4, %v3165_v35, %v6085_v3  ;;  %v3648_v30 = vsel %vm1913_vm3, %v3647_v33, %v6069_v14  ;;  %v6059_v3 = vunpack.i.l.bf16 %v8482_v4  ;;  %v6020_v35 = vunpack.i.h.bf16 %v8465_v17 }
 0x3a2   : > { %v8492_v15 = vpop.permute.xlu0 %6077  ;;  %v6093_v57 = vpop.permute.xlu1 %6092  ;;  %v6055_v14 = vunpack.i.h.bf16 %v8472_v29 }
 0x3a3   : > { %v3934_v27 = vld [vmem:[#allocation4 + $0x38] sm:$0x33]  ;;  %v6094_v39 = vunpack.i.l.bf16 %v6093_v57  ;;  %v6095_v22 = vunpack.i.h.bf16 %v6093_v57  ;;  %v5213_v57 = vsel %vm1913_vm3, %v5212_v1, %v6034_v54 }
 0x3a4   : > { %v5614_v0 = vcombine.high %v3934_v27, %v3934_v27  ;;  %v5613_v7 = vcombine.low %v3934_v27, %v3934_v27  ;;  %v5214_v27 = vsel %vm4220_vm10, %v5213_v57, %v6059_v3  ;;  %v2910_v62 = vsel %vm1911_vm2, %v8020_v60, %v6055_v14  ;;  %v8829_v14 = vld [vmem:[#allocation35_spill] sm:$0xff] }
 0x3a5   : > { %v3169_v6 = vsel %vm1915_vm4, %v3168_v8, %v6094_v39  ;;  %v3646_v21 = vsel %vm1915_vm4, %v3645_v23, %v6095_v22  ;;  %v8826_v39 = vld [vmem:[#allocation10_spill] sm:$0xff]  ;;  %v5215_v32 = vsel %vm1915_vm4, %v5214_v27, %v6084_v41 }
 0x3a6   : > { %v8504_v51 = vpop.permute.xlu0 %6087  ;;  %5617 = vmatprep.subr.msk.bf16.mxu1 %vm3989_vm5, %v5614_v0  ;;  %v3997_v28 = vsel %vm3989_vm5, %v5613_v7, 0  ;;  %v5668_v59 = vpack.c.bf16 %v3169_v6, %v3166_v13  ;;  %v8509_v2 = vpop.permute.xlu1 %6102  ;;  %v4839_v0 = vsel %vm4214_vm8, %v8826_v39, %v6005_v38  ;;  %v6070_v7 = vunpack.i.h.bf16 %v8486_v50 }
 0x3a7   : > { %4054 = vmatpush1.bf16.msra.mxu1 %v3997_v28  ;;  %v6104_v52 = vunpack.i.l.bf16 %v8509_v2  ;;  %v4840_v5 = vsel %vm1911_vm2, %v4839_v0, %v6045_v9  ;;  %v6060_v50 = vunpack.i.h.bf16 %v8482_v4  ;;  %v6090_v40 = vunpack.i.h.bf16 %v8504_v51 }
 0x3a8   : > { %v3185_v10 = vrot.slane %v5668_v59, 6  ;;  %v4841_v22 = vsel %vm4217_vm9, %v4840_v5, %v6020_v35  ;;  %v6089_v17 = vunpack.i.l.bf16 %v8504_v51  ;;  %v6030_v5 = vunpack.i.h.bf16 %v8467_v34 }
 0x3a9   : > { %v3649_v53 = vsel %vm1915_vm4, %v3648_v30, %v6104_v52  ;;  %v4842_v6 = vsel %vm1913_vm3, %v4841_v22, %v6070_v7 }
 0x3aa   : > { %v8520_v37 = vpop.permute.xlu0 %6097  ;;  %3189 = vst [vmem:[#allocation4 + $0x28] sm:$0xcc] %v3185_v10  ;;  %v5672_v49 = vpack.c.bf16 %v3649_v53, %v3646_v21  ;;  %v8524_v24 = vpop.permute.xlu1 %6112  ;;  %v4843_v30 = vsel %vm4220_vm10, %v4842_v6, %v6060_v50  ;;  %v6105_v10 = vunpack.i.h.bf16 %v8509_v2  ;;  %v8827_v53 = vld [vmem:[#allocation28_spill] sm:$0xff]  ;;  %v2913_v60 = vsel %vm1911_vm2, %v8173_v19, %v6089_v17 }
 0x3ab   : > { %v6115_v28 = vunpack.i.h.bf16 %v8524_v24  ;;  %v6099_v33 = vunpack.i.l.bf16 %v8520_v37  ;;  %v3390_v48 = vsel %vm1911_vm2, %v8827_v53, %v6090_v40  ;;  %v6100_v35 = vunpack.i.h.bf16 %v8520_v37 }
 0x3ac   : > { %v3665_v36 = vrot.slane %v5672_v49, 6  ;;  %v4714_v22 = vsel %vm4214_vm8, %v8829_v14, %v6030_v5  ;;  %v6029_v6 = vunpack.i.l.bf16 %v8467_v34  ;;  %v6054_v50 = vunpack.i.l.bf16 %v8472_v29 }
 0x3ad   : > { %v2911_v4 = vsel %vm1913_vm3, %v2910_v62, %v6115_v28  ;;  %v4715_v40 = vsel %vm1911_vm2, %v4714_v22, %v6100_v35  ;;  %v6080_v62 = vunpack.i.h.bf16 %v8492_v15  ;;  %v6079_v37 = vunpack.i.l.bf16 %v8492_v15 }
 0x3ae   : > { %v8529_v12 = vpop.permute.xlu0 %6107  ;;  %3669 = vst [vmem:[#allocation4 + $0x20] sm:$0xcc] %v3665_v36  ;;  %v6123_v16 = vpop.permute.xlu1 %6122  ;;  %v8828_v36 = vld [vmem:[#allocation26_spill] sm:$0xff]  ;;  %v2912_v19 = vsel %vm1915_vm4, %v2911_v4, %v6105_v10 }
 0x3af   : > { %v6125_v63 = vunpack.i.h.bf16 %v6123_v16  ;;  %v6124_v52 = vunpack.i.l.bf16 %v6123_v16  ;;  %v3393_v42 = vsel %vm1911_vm2, %v8828_v36, %v6099_v33  ;;  %v6114_v33 = vunpack.i.l.bf16 %v8524_v24 }
 0x3b0   : > { %v4716_v29 = vsel %vm4217_vm9, %v4715_v40, %v6080_v62 }
 0x3b1   : > { %v2914_v38 = vsel %vm1913_vm3, %v2913_v60, %v6124_v52  ;;  %v3391_v41 = vsel %vm1913_vm3, %v3390_v48, %v6125_v63  ;;  %v8830_v63 = vld [vmem:[#allocation30_spill] sm:$0xff] }
 0x3b2   : > { %v6118_v25 = vpop.permute.xlu0 %6117  ;;  %v8539_v58 = vpop.permute.xlu1 %6132  ;;  %v5080_v52 = vsel %vm4214_vm8, %v8830_v63, %v6029_v6  ;;  %v6273_v60 = vld [vmem:[#allocation4 + $0x4] ss:$16 sps:$4 sm:$0xff]  }
 0x3b3   : > { %v6119_v18 = vunpack.i.l.bf16 %v6118_v25  ;;  %v6120_v21 = vunpack.i.h.bf16 %v6118_v25  ;;  %v6134_v14 = vunpack.i.l.bf16 %v8539_v58 }
 0x3b5   : > { %v5216_v55 = vsel %vm4223_vm11, %v5215_v32, %v6119_v18 }
 0x3b6   : > { %v5217_v43 = vpack.c.bf16 %v5216_v55, %v5216_v55  ;;  %v8548_v8 = vpop.permute.xlu0 %6127 }
 0x3b7   : > { %v8551_v13 = vpop.permute.xlu1 %6142  ;;  %v6129_v51 = vunpack.i.l.bf16 %v8548_v8  ;;  %v6130_v17 = vunpack.i.h.bf16 %v8548_v8  ;;  %v5081_v8 = vsel %vm1911_vm2, %v5080_v52, %v6054_v50  ;;  %v8832_v52 = vld [vmem:[#allocation38_spill] sm:$0xff] }
 0x3b8   : > { %5218 = vst [vmem:[#allocation5 + $0x10] sm:$0x3] %v5217_v43  ;;  %v6145_v34 = vunpack.i.h.bf16 %v8551_v13 }
 0x3b9   : > { %v3394_v9 = vsel %vm1913_vm3, %v3393_v42, %v6129_v51  ;;  %v4717_v10 = vsel %vm1913_vm3, %v4716_v29, %v6130_v17  ;;  %v5082_v51 = vsel %vm4217_vm9, %v5081_v8, %v6079_v37 }
 0x3ba   : > { %v8559_v59 = vpop.permute.xlu0 %6137  ;;  %v5083_v53 = vsel %vm1913_vm3, %v5082_v51, %v6114_v33 }
 0x3bb   : > { %v6153_v44 = vpop.permute.xlu1 %6152 }
 0x3bc   : > { %v6155_v23 = vunpack.i.h.bf16 %v6153_v44  ;;  %v6154_v45 = vunpack.i.l.bf16 %v6153_v44 }
 0x3be   : > { %v4844_v49 = vsel %vm1915_vm4, %v4843_v30, %v6155_v23  ;;  %v6148_v46 = vpop.permute.xlu0 %6147  ;;  %v3395_v18 = vsel %vm1915_vm4, %v3394_v9, %v6154_v45  ;;  %v6144_v23 = vunpack.i.l.bf16 %v8551_v13  ;;  %v4718_v45 = vsel %vm4220_vm10, %v4717_v10, %v6145_v34 }
 0x3bf   : > { %v4845_v2 = vsel %vm4223_vm11, %v4844_v49, %v6120_v21  ;;  %v8576_v54 = vpop.permute.xlu1 %6162  ;;  %v6150_v26 = vunpack.i.h.bf16 %v6148_v46  ;;  %v6149_v3 = vunpack.i.l.bf16 %v6148_v46  ;;  %v6269_v16 = vld [vmem:[#allocation5 + $0x10] ss:$0 sps:$4 sm:$0x33]   ;;  %v4584_v34 = vsel %vm4214_vm8, %v8832_v52, %v6134_v14 }
 0x3c0   : > { %v5677_v1 = vpack.c.bf16 %v4845_v2, %v4845_v2  ;;  %v5244_v27 = vsel %vm3989_vm5, %v6269_v16, 0  ;;  %v5084_v13 = vsel %vm4220_vm10, %v5083_v53, %v6144_v23  ;;  %v6164_v35 = vunpack.i.l.bf16 %v8576_v54 }
 0x3c1   : > { %v2915_v57 = vsel %vm1915_vm4, %v2914_v38, %v6149_v3  ;;  %v3392_v25 = vsel %vm1915_vm4, %v3391_v41, %v6150_v26  ;;  %5716 = vmatpush3.bf16.msra.mxu0 %v5244_v27  ;;  %v6075_v26 = vunpack.i.h.bf16 %v8484_v61  ;;  %v6275_v38 = vld [vmem:[#allocation4] ss:$16 sps:$4 sm:$0xff]   ;;  %v6074_v41 = vunpack.i.l.bf16 %v8484_v61 }
 0x3c2   : > { %v4850_v39 = vrot.slane %v5677_v1, 6  ;;  %v5666_v0 = vpack.c.bf16 %v2915_v57, %v2912_v19  ;;  %v8586_v32 = vpop.permute.xlu0 %6157  ;;  %v5670_v7 = vpack.c.bf16 %v3395_v18, %v3392_v25  ;;  %5717 = vmatprep.subr.bf16.mxu0 %v8785_v31  ;;  %v6110_v57 = vunpack.i.h.bf16 %v8529_v12 }
 0x3c3   : > { %v8589_v55 = vpop.permute.xlu1 %4446  ;;  %v6109_v25 = vunpack.i.l.bf16 %v8529_v12  ;;  %v6135_v27 = vunpack.i.h.bf16 %v8539_v58  ;;  %v4343_v61 = vsel %vm4214_vm8, %v8093_v20, %v6075_v26  ;;  %v6159_v63 = vunpack.i.l.bf16 %v8586_v32 }
 0x3c4   : > { %4852 = vst [vmem:[#allocation5 + $0x8] sm:$0xc] %v4850_v39  ;;  %2933 = vst [vmem:[#allocation4 + $0x28] sm:$0x33] %v5666_v0  ;;  %v6140_v39 = vunpack.i.h.bf16 %v8559_v59  ;;  %v6139_v0 = vunpack.i.l.bf16 %v8559_v59  ;;  %v4344_v20 = vsel %vm1911_vm2, %v4343_v61, %v6110_v57 }
 0x3c5   : > { %3413 = vst [vmem:[#allocation4 + $0x20] sm:$0x33] %v5670_v7  ;;  %v6165_v7 = vunpack.i.h.bf16 %v8576_v54  ;;  %v4215_v54 = vsel %vm4214_vm8, %v8074_v47, %v6135_v27 }
 0x3c6   : > { %v6168_v43 = vpop.permute.xlu0 %6167  ;;  %v4345_v17 = vsel %vm4217_vm9, %v4344_v20, %v6140_v39 }
 0x3c7   : > { %v8596_v28 = vpop.permute.xlu1 %6177  ;;  %v6170_v15 = vunpack.i.h.bf16 %v6168_v43  ;;  %v6169_v4 = vunpack.i.l.bf16 %v6168_v43  ;;  %v8831_v43 = vld [vmem:[#allocation31_spill] sm:$0xff] }
 0x3c8   : > { %v4955_v12 = vsel %vm4214_vm8, %v8831_v43, %v6074_v41  ;;  %v6180_v22 = vunpack.i.h.bf16 %v8596_v28  ;;  %v6179_v6 = vunpack.i.l.bf16 %v8596_v28  ;;  %v4346_v28 = vsel %vm1913_vm3, %v4345_v17, %v6165_v7 }
 0x3c9   : > { %v4719_v42 = vsel %vm1915_vm4, %v4718_v45, %v6170_v15  ;;  %v5085_v2 = vsel %vm1915_vm4, %v5084_v13, %v6169_v4  ;;  %v4956_v50 = vsel %vm1911_vm2, %v4955_v12, %v6109_v25 }
 0x3ca   : > { %v8604_v44 = vpop.permute.xlu0 %6172  ;;  %v4957_v58 = vsel %vm4217_vm9, %v4956_v50, %v6139_v0  ;;  %v4347_v47 = vsel %vm4220_vm10, %v4346_v28, %v6180_v22 }
 0x3cb   : > { %v8611_v30 = vpop.permute.xlu1 %4450  ;;  %v4958_v33 = vsel %vm1913_vm3, %v4957_v58, %v6164_v35  ;;  %v6175_v29 = vunpack.i.h.bf16 %v8604_v44  ;;  %v6174_v10 = vunpack.i.l.bf16 %v8604_v44 }
 0x3cc   : > { %v6270_v24 = vld [vmem:[#allocation4 + $0x2c] ss:$-8 sps:$4 sm:$0xff]   ;;  %v6272_v21 = vld [vmem:[#allocation4 + $0x28] ss:$-8 sps:$4 sm:$0xff]   ;;  %v4959_v23 = vsel %vm4220_vm10, %v4958_v33, %v6179_v6 }
 0x3cd   : > { %4055 = vmatprep.subr.bf16.mxu1 %v6270_v24 }
 0x3ce   : > { %v6183_v48 = vpop.permute.xlu0 %6182  ;;  %4056 = vmatpush1.bf16.msra.mxu1 %v6272_v21  ;;  %v4473_v21 = vsel %vm4214_vm8, %v8348_v11, %v8589_v55 }
 0x3cf   : > { %v6193_v49 = vpop.permute.xlu1 %6192  ;;  %v6185_v46 = vunpack.i.h.bf16 %v6183_v48  ;;  %v6184_v36 = vunpack.i.l.bf16 %v6183_v48  ;;  %4057 = vmatprep.subr.bf16.mxu1 %v6273_v60  ;;  %v4585_v60 = vsel %vm1911_vm2, %v4584_v34, %v6159_v63 }
 0x3d0   : > { %v6195_v62 = vunpack.i.h.bf16 %v6193_v49  ;;  %v6194_v37 = vunpack.i.l.bf16 %v6193_v49  ;;  %v4474_v49 = vsel %vm1911_vm2, %v4473_v21, %v8611_v30 }
 0x3d1   : > { %v4720_v3 = vsel %vm4223_vm11, %v4719_v42, %v6185_v46  ;;  %v5086_v16 = vsel %vm4223_vm11, %v5085_v2, %v6184_v36  ;;  %v4586_v42 = vsel %vm4217_vm9, %v4585_v60, %v6174_v10 }
 0x3d2   : > { %v4721_v1 = vpack.c.bf16 %v4720_v3, %v4720_v3  ;;  %v5678_v19 = vpack.c.bf16 %v5086_v16, %v5086_v16  ;;  %v6188_v9 = vpop.permute.xlu0 %6187  ;;  %4058 = vmatpush1.bf16.msra.mxu1 %v6275_v38  ;;  %v4960_v51 = vsel %vm1915_vm4, %v4959_v23, %v6194_v37 }
 0x3d3   : > { %v8628_v18 = vpop.permute.xlu1 %6197  ;;  %v6190_v15 = vunpack.i.h.bf16 %v6188_v9  ;;  %v6189_v53 = vunpack.i.l.bf16 %v6188_v9 }
 0x3d4   : > { %4722 = vst [vmem:[#allocation5 + $0x8] sm:$0x3] %v4721_v1  ;;  %v5091_v5 = vrot.slane %v5678_v19, 6  ;;  %v6200_v2 = vunpack.i.h.bf16 %v8628_v18  ;;  %v6199_v26 = vunpack.i.l.bf16 %v8628_v18 }
 0x3d5   : > { %5618 = vmatmul.mubr.msk.bf16.vlgmr.msra.gmra.mxu1 %vm3985_vm6, %v8409_v56  ;;  %v6160_v56 = vunpack.i.h.bf16 %v8586_v32  ;;  %v4348_v32 = vsel %vm1915_vm4, %v4347_v47, %v6195_v62  ;;  %v4587_v16 = vsel %vm1913_vm3, %v4586_v42, %v6189_v53 }
 0x3d6   : > { %5093 = vst [vmem:[#allocation5 + $0xc] sm:$0xc] %v5091_v5  ;;  %v4455_v59 = vpop.permute.xlu0 %4454  ;;  %v4588_v25 = vsel %vm4220_vm10, %v4587_v16, %v6199_v26 }
 0x3d7   : > { %v4459_v40 = vpop.permute.xlu1 %4458  ;;  %v4216_v48 = vsel %vm1911_vm2, %v4215_v54, %v6160_v56  ;;  %v4475_v30 = vsel %vm4217_vm9, %v4474_v49, %v4455_v59 }
 0x3d8   : > { %v4218_v46 = vsel %vm4217_vm9, %v4216_v48, %v6175_v29  ;;  %v4476_v18 = vsel %vm1913_vm3, %v4475_v30, %v4459_v40  ;;  %v5219_v40 = vld [vmem:[%s8714_s2] sm:$0x1] }
 0x3d9   : > { %v4219_v3 = vsel %vm1913_vm3, %v4218_v46, %v6190_v15 }
 0x3da   : > { %v6203_v8 = vpop.permute.xlu0 %6202  ;;  %v4221_v57 = vsel %vm4220_vm10, %v4219_v3, %v6200_v2 }
 0x3db   : > { %v6205_v4 = vunpack.i.h.bf16 %v6203_v8  ;;  %v6204_v24 = vunpack.i.l.bf16 %v6203_v8  ;;  %v4463_v13 = vpop.permute.xlu1 %4462 }
 0x3dc   : > { %v4477_v61 = vsel %vm4220_vm10, %v4476_v18, %v4463_v13 }
 0x3dd   : > { %v4349_v45 = vsel %vm4223_vm11, %v4348_v32, %v6205_v4  ;;  %v4961_v44 = vsel %vm4223_vm11, %v4960_v51, %v6204_v24 }
 0x3de   : > { %v5675_v11 = vpack.c.bf16 %v4349_v45, %v4349_v45  ;;  %v4962_v55 = vpack.c.bf16 %v4961_v44, %v4961_v44  ;;  %v6208_v36 = vpop.permute.xlu0 %6207 }
 0x3df   : > { %v6210_v41 = vunpack.i.h.bf16 %v6208_v36  ;;  %v6209_v1 = vunpack.i.l.bf16 %v6208_v36  ;;  %v4467_v9 = vpop.permute.xlu1 %4466 }
 0x3e0   : > { %v4354_v38 = vrot.slane %v5675_v11, 6  ;;  %4963 = vst [vmem:[#allocation5 + $0xc] sm:$0x3] %v4962_v55  ;;  %v4478_v43 = vsel %vm1915_vm4, %v4477_v61, %v4467_v9 }
 0x3e1   : > { %v4222_v0 = vsel %vm1915_vm4, %v4221_v57, %v6210_v41  ;;  %v4589_v5 = vsel %vm1915_vm4, %v4588_v25, %v6209_v1 }
 0x3e2   : > { %4356 = vst [vmem:[#allocation5] sm:$0xc] %v4354_v38  ;;  %v6213_v19 = vpop.permute.xlu0 %6212 }
 0x3e3   : > { %v6215_v27 = vunpack.i.h.bf16 %v6213_v19  ;;  %v6214_v39 = vunpack.i.l.bf16 %v6213_v19 }
 0x3e5   : > { %v4224_v7 = vsel %vm4223_vm11, %v4222_v0, %v6215_v27  ;;  %v4590_v35 = vsel %vm4223_vm11, %v4589_v5, %v6214_v39 }
 0x3e6   : > { %v4225_v12 = vpack.c.bf16 %v4224_v7, %v4224_v7  ;;  %v5676_v14 = vpack.c.bf16 %v4590_v35, %v4590_v35  ;;  %v4471_v22 = vpop.permute.xlu0 %4470 }
 0x3e7   : > { %v4479_v6 = vsel %vm4223_vm11, %v4478_v43, %v4471_v22  ;;  %v6276_v59 = vld [vmem:[#allocation5 + $0x8] sm:$0xff]  }
 0x3e8   : > { %4226 = vst [vmem:[#allocation5] sm:$0x3] %v4225_v12  ;;  %v4595_v20 = vrot.slane %v5676_v14, 6  ;;  %v4480_v50 = vpack.c.bf16 %v4479_v6, %v4479_v6  ;;  %5718 = vmatpush3.bf16.msra.mxu0 %v6276_v59 }
 0x3e9   : > { %5719 = vmatprep.subr.bf16.mxu0 %v8785_v31 }
 0x3ea   : > { %4597 = vst [vmem:[#allocation5 + $0x4] sm:$0xc] %v4595_v20  ;;  %4481 = vst [vmem:[#allocation5 + $0x4] sm:$0x3] %v4480_v50 }
 0x3ec   : > { %v4088_v17 = vpop.permute.xlu1 %4087 }
 0x3f0   : > { %v4098_v62 = vpop.permute.xlu1 %4097 }
 0x3f1   : > { %v6277_v54 = vld [vmem:[#allocation5] sm:$0xff]  }
 0x3f2   : > { %5720 = vmatpush3.bf16.msra.mxu0 %v6277_v54 }
 0x3f3   : > { %v5290_v53 = vpop.permute.xlu0 %5289 }
 0x3f4   : > { %v5297_v13 = vpop.permute.xlu1 %5296 }
 0x3f5   : > { %5722 = vmatmul.mubr.msk.bf16.vlgmr.msra.gmra.mxu0 %vm3985_vm6, %v5219_v40 }
 0x41b   : > { %v4036_v58 = vpop.f32.mrf.mxu0 }
 0x41c   : > { %v4090_v37 = vmul.f32 %v4088_v17, %v4036_v58 }
 0x41d   : > { %v4038_v28 = vpop.f32.mrf.mxu0 }
 0x41e   : > { %v4091_v33 = vmul.f32 %v4088_v17, %v4038_v28  ;;  %v4100_v56 = vadd.f32 %v4098_v62, %v4090_v37 }
 0x41f   : > { %v4040_v63 = vpop.f32.mrf.mxu0 }
 0x420   : > { %v4101_v31 = vadd.f32 %v4098_v62, %v4091_v33  ;;  %v4104_v52 = vmax.f32 %v4100_v56, 0.0 }
 0x421   : > { %v4041_v34 = vpop.f32.mrf.mxu0 }
 0x422   : > { %v4105_v47 = vmax.f32 %v4101_v31, 0.0  ;;  %4108 = vst [vmem:[%s6427_s26] sm:$0x3f] %v4104_v52 }
 0x424   : > { %4109 = vst [vmem:[%s6427_s26 + $0x8] sm:$0x3f] %v4105_v47 }
 0x495   : > { %v4077_v23 = vpop.f32.mrf.mxu1 }
 0x496   : > { %v4092_v29 = vmul.f32 %v4088_v17, %v4077_v23 }
 0x497   : > { %v4079_v8 = vpop.f32.mrf.mxu1 }
 0x498   : > { %v4102_v10 = vadd.f32 %v4098_v62, %v4092_v29  ;;  %v4093_v15 = vmul.f32 %v4088_v17, %v4079_v8 }
 0x499   : > { %v4081_v4 = vpop.f32.mrf.mxu1 }
 0x49a   : > { %v4106_v24 = vmax.f32 %v4102_v10, 0.0  ;;  %v4103_v21 = vadd.f32 %v4098_v62, %v4093_v15 }
 0x49b   : > { %v4082_v32 = vpop.f32.mrf.mxu1 }
 0x49c   : > { %4110 = vst [vmem:[%s6427_s26 + $0x10] sm:$0x3f] %v4106_v24  ;;  %v4107_v51 = vmax.f32 %v4103_v21, 0.0 }
 0x49e   : > { %4111 = vst [vmem:[%s6427_s26 + $0x18] sm:$0x3f] %v4107_v51 }
 0x4b5   : > { %v5280_v48 = vpop.f32.mrf.mxu0 }
 0x4b6   : > { %v5292_v60 = vmul.f32 %v5290_v53, %v5280_v48 }
 0x4b7   : > { %v5723_v45 = vpop.f32.mrf.mxu0 }
 0x4b8   : > { %v5299_v44 = vadd.f32 %v5297_v13, %v5292_v60 }
 0x4b9   : > { %v5283_v49 = vpop.f32.mrf.mxu0 }
 0x4ba   : > { %v5300_v46 = vmax.f32 %v5299_v44, 0.0 }
 0x4bb   : > { %v5724_v11 = vpop.f32.mrf.mxu0 }
 0x4bc   : > { %5301 = vst [vmem:[%s6433_s11] sm:$0x3] %v5300_v46 }
 0x4bd PF: > { %s20_s13 = sadd.s32 1, %s6316_s13   ;;  %s8833_s30 = sld [smem:[#allocation6_spill]] }
 0x4be   : > { %p17_p9 = scmp.ge.s32.totalorder %s20_s13, 6   ;;  %s8834_s10 = sld [smem:[#allocation7_spill]] }
 0x4bf   : > { %s8835_s11 = sld [smem:[#allocation8_spill]] }
 0x4c0   : > { %s8836_s12 = sld [smem:[#allocation9_spill]]  ;;  %19 = sbr.rel (!%p17_p9) target bundleno = 3 (0x3), region = 104 }

</bundles_post_ra>
